<compile_context>
chip_gen: v7x
topology: tpu7x:2x2x1
jax: 0.10.0
libtpu: 0.0.40
codegen_flags: <defaults>
</compile_context>

<pallas_src>
import functools

import numpy as np

import jax
import jax.numpy as jnp
from jax import lax
from jax.experimental import pallas as pl
from jax.experimental.pallas import tpu as pltpu

EPS = 1e-5      # BatchNorm2d default eps
LANE = 128      # lane width / padded logits width


# --------------------------- static geometry ----------------------------------

@functools.lru_cache(maxsize=None)
def _geometry(n, h, w):
    """All static shapes, shift offsets, masks and selection matrices."""
    # conv1: 3x3 s1 p0
    h1, w1 = h - 2, w - 2
    # conv2: 4x4 s2 p1  (padded grid == input grid)
    hp2, wp2 = h1 + 2, w1 + 2
    h2, w2 = (hp2 - 4) // 2 + 1, (wp2 - 4) // 2 + 1
    # conv3: 4x4 s2 p1
    hp3, wp3 = h2 + 2, w2 + 2
    h3, w3 = (hp3 - 4) // 2 + 1, (wp3 - 4) // 2 + 1
    # residual-block padded grid (3x3 conv, pad 1)
    hp4, wp4 = h3 + 2, w3 + 2

    m0 = n * h * w
    m3 = n * hp3 * wp3
    m4 = n * hp4 * wp4

    deltas1 = tuple(di * w + dj for di in range(3) for dj in range(3))
    deltas2 = tuple(di * wp2 + dj for di in range(4) for dj in range(4))
    deltas3 = tuple(di * wp3 + dj for di in range(4) for dj in range(4))
    deltas_b = tuple((di - 1) * wp4 + (dj - 1)
                     for di in range(3) for dj in range(3))
    lpad = wp4 + 1

    def sel(hi, wi, ho, wo, fmap):
        p = np.zeros((n * hi * wi, n * ho * wo), np.float32)
        for ni in range(n):
            for oh in range(ho):
                for ow in range(wo):
                    src = fmap(oh, ow)
                    if src is None:
                        continue
                    ih, iw = src
                    p[(ni * hi + ih) * wi + iw, (ni * ho + oh) * wo + ow] = 1.0
        return p

    # crop conv1 valid output and place with a 1-pixel zero ring (conv2 pad)
    p1 = sel(h, w, hp2, wp2,
             lambda oh, ow: (oh - 1, ow - 1)
             if 1 <= oh <= h1 and 1 <= ow <= w1 else None)
    # stride-2 subsample of conv2 output + 1-pixel zero ring (conv3 pad)
    p2 = sel(hp2, wp2, hp3, wp3,
             lambda oh, ow: (2 * (oh - 1), 2 * (ow - 1))
             if 1 <= oh <= h2 and 1 <= ow <= w2 else None)
    # stride-2 subsample of conv3 output + 1-pixel zero ring (block pad)
    p3 = sel(hp3, wp3, hp4, wp4,
             lambda oh, ow: (2 * (oh - 1), 2 * (ow - 1))
             if 1 <= oh <= h3 and 1 <= ow <= w3 else None)

    def grid_mask(hh, ww, pred):
        msk = np.zeros((1, n * hh * ww), np.float32)
        for ni in range(n):
            for i in range(hh):
                for j in range(ww):
                    if pred(i, j):
                        msk[0, (ni * hh + i) * ww + j] = 1.0
        return msk

    mask1 = grid_mask(h, w, lambda i, j: i < h1 and j < w1)
    mask2 = grid_mask(hp2, wp2,
                      lambda i, j: i % 2 == 0 and j % 2 == 0
                      and i <= 2 * (h2 - 1) and j <= 2 * (w2 - 1))
    mask_int = grid_mask(hp4, wp4,
                         lambda i, j: 1 <= i <= h3 and 1 <= j <= w3)

    pool_t = np.zeros((n, m4), np.float32)
    for ni in range(n):
        for i in range(1, h3 + 1):
            for j in range(1, w3 + 1):
                pool_t[ni, (ni * hp4 + i) * wp4 + j] = 1.0 / float(h3 * w3)

    return dict(
        m0=m0, m3=m3, m4=m4,
        deltas1=deltas1, deltas2=deltas2, deltas3=deltas3, deltas_b=deltas_b,
        lpad=lpad, d1max=deltas1[-1], d2max=deltas2[-1], d3max=deltas3[-1],
        cnt1=float(n * h1 * w1), cnt2=float(n * h2 * w2),
        cnt_int=float(n * h3 * w3),
        p1=p1, p2=p2, p3=p3,
        mask1=mask1, mask2=mask2, mask_int=mask_int, pool_t=pool_t,
    )


# ------------------------------ fused kernel -----------------------------------

def _make_kernel(g, layers, coef, c):
    m0, m3, m4 = g["m0"], g["m3"], g["m4"]
    lpad = g["lpad"]
    s2_shape = (c, m0 + g["d2max"])
    s3_shape = (c, m3 + g["d3max"])
    s4_shape = (c, m4 + 2 * lpad)
    n_in = 12 + 6 * layers + 8

    def bn(y, gamma, beta, mask, count, relu):
        # BatchNorm (train-mode batch stats) over masked positions only.
        inv = 1.0 / count
        mu = jnp.sum(y * mask, axis=1, keepdims=True) * inv
        d = (y - mu) * mask
        var = jnp.sum(d * d, axis=1, keepdims=True) * inv
        out = (y - mu) * (gamma * lax.rsqrt(var + EPS)) + beta
        return jnp.maximum(out, 0.0) if relu else out

    def conv_mxu(slab_ref, w2d, deltas, base, m):
        # sum over kernel offsets of (Cout,Cin) x (Cin,M) bf16 MXU matmuls.
        acc = jnp.zeros((c, m), jnp.float32)
        for k, d in enumerate(deltas):
            xs = slab_ref[:, base + d:base + d + m].astype(jnp.bfloat16)
            wk = w2d[k * c:(k + 1) * c, :]
            acc = acc + jnp.dot(wk, xs, preferred_element_type=jnp.float32)
        return acc

    def kernel(*refs):
        (x0, w1, g1, be1, p1,
         w2, g2, be2, p2,
         w3, b3, p3) = refs[:12]
        pos = 12
        blks = []
        for _ in range(layers):
            blks.append(refs[pos:pos + 6])
            pos += 6
        ghd, behd, lwp, lbp, m1m, m2m, mim, poolt = refs[pos:pos + 8]
        o_ref = refs[n_in]
        s2, s3, s4 = refs[n_in + 1:n_in + 4]

        # ---- conv1 (cin=1): 9 shifted VPU multiply-adds, BN + ReLU ----------
        w1v = w1[...]                                     # (C, 9)
        y = jnp.zeros((c, m0), jnp.float32)
        for k, d in enumerate(g["deltas1"]):
            y = y + w1v[:, k:k + 1] * x0[:, d:d + m0]
        y = bn(y, g1[...], be1[...], m1m[...], g["cnt1"], relu=True)

        # ---- crop + zero-pad onto conv2 grid; conv2 + BN + ReLU -------------
        x2 = jnp.dot(y, p1[...], preferred_element_type=jnp.float32)
        s2[...] = jnp.zeros(s2_shape, jnp.float32)
        s2[:, 0:m0] = x2
        y = conv_mxu(s2, w2[...], g["deltas2"], 0, m0)
        y = bn(y, g2[...], be2[...], m2m[...], g["cnt2"], relu=True)

        # ---- stride-2 select + pad onto conv3 grid; conv3 + bias ------------
        x3 = jnp.dot(y, p2[...], preferred_element_type=jnp.float32)
        s3[...] = jnp.zeros(s3_shape, jnp.float32)
        s3[:, 0:m3] = x3
        y = conv_mxu(s3, w3[...], g["deltas3"], 0, m3)
        y = y + b3[...]

        # ---- stride-2 select + pad onto block grid --------------------------
        x4 = jnp.dot(y, p3[...], preferred_element_type=jnp.float32)

        # ---- residual blocks (coef-scaled BasicBlock) -----------------------
        mint = mim[...]                                   # (1, m4) interior
        for (wb1, gb1, bb1, wb2, gb2, bb2) in blks:
            s4[...] = jnp.zeros(s4_shape, jnp.float32)
            s4[:, lpad:lpad + m4] = x4
            hb = conv_mxu(s4, wb1[...], g["deltas_b"], lpad, m4)
            hb = bn(hb, gb1[...], bb1[...], mint, g["cnt_int"], relu=True) * mint
            s4[...] = jnp.zeros(s4_shape, jnp.float32)
            s4[:, lpad:lpad + m4] = hb
            y = conv_mxu(s4, wb2[...], g["deltas_b"], lpad, m4)
            y = bn(y, gb2[...], bb2[...], mint, g["cnt_int"], relu=False)
            x4 = jnp.maximum(coef * y + x4, 0.0) * mint

        # ---- head: BN + ReLU + global avg pool + linear (128-lane padded) ---
        z = bn(x4, ghd[...], behd[...], mint, g["cnt_int"], relu=True)
        pooled = lax.dot_general(poolt[...], z, (((1,), (1,)), ((), ())),
                                 preferred_element_type=jnp.float32)   # (N, C)
        o_ref[...] = (jnp.dot(pooled, lwp[...],
                              preferred_element_type=jnp.float32) + lbp[...])

    return kernel, n_in, (s2_shape, s3_shape, s4_shape)


# ------------------------------- wrapper ---------------------------------------

def mnist_forward(params, x_nchw, *, layers=1, coef=1.0):
    n, cin, hh, ww = x_nchw.shape
    assert cin == 1
    c = params["d1_w"].shape[-1]
    classes = params["lin_w"].shape[-1]
    assert classes <= LANE
    g = _geometry(n, hh, ww)
    m0 = g["m0"]

    # flattened, right-zero-padded conv1 input (so shifted reads stay in-bounds)
    x0 = jnp.zeros((1, m0 + g["d1max"]), jnp.float32)
    x0 = x0.at[0, :m0].set(x_nchw.reshape(-1).astype(jnp.float32))

    # conv1 weights: (3,3,1,C) -> (C, 9) for per-offset VPU broadcasts
    w1t = params["d1_w"][:, :, 0, :].reshape(9, c).T.astype(jnp.float32)

    def prep_w(wt):   # (kh,kw,cin,cout) -> (kh*kw*cout, cin) bf16 for the MXU
        kh, kw, ci, co = wt.shape
        return jnp.transpose(wt, (0, 1, 3, 2)).reshape(kh * kw * co, ci) \
                  .astype(jnp.bfloat16)

    def col(v):
        return v.reshape(-1, 1).astype(jnp.float32)

    lwp = jnp.zeros((c, LANE), jnp.float32).at[:, :classes].set(params["lin_w"])
    lbp = jnp.zeros((1, LANE), jnp.float32).at[0, :classes].set(params["lin_b"])

    inputs = [
        x0, w1t, col(params["d1_g"]), col(params["d1_be"]), jnp.asarray(g["p1"]),
        prep_w(params["d2_w"]), col(params["d2_g"]), col(params["d2_be"]),
        jnp.asarray(g["p2"]),
        prep_w(params["d3_w"]), col(params["d3_b"]), jnp.asarray(g["p3"]),
    ]
    for bp in params["blocks"][:layers]:
        inputs += [prep_w(bp["c1_w"]), col(bp["bn1_g"]), col(bp["bn1_be"]),
                   prep_w(bp["c2_w"]), col(bp["bn2_g"]), col(bp["bn2_be"])]
    inputs += [col(params["h_g"]), col(params["h_be"]), lwp, lbp,
               jnp.asarray(g["mask1"]), jnp.asarray(g["mask2"]),
               jnp.asarray(g["mask_int"]), jnp.asarray(g["pool_t"])]

    kernel, n_in, scratch = _make_kernel(g, layers, float(coef), c)
    assert len(inputs) == n_in

    vmem = pl.BlockSpec(memory_space=pltpu.MemorySpace.VMEM)
    out = pl.pallas_call(
        kernel,
        out_shape=jax.ShapeDtypeStruct((n, LANE), jnp.float32),
        in_specs=[vmem] * n_in,
        out_specs=vmem,
        scratch_shapes=[pltpu.VMEM(s, jnp.float32) for s in scratch],
    )(*inputs)
    return out[:, :classes]


# ------------------------------ parameters -------------------------------------

def init_params(key, channels=16, classes=10, layers=1):
    keys = jax.random.split(key, 8 + 4 * layers)
    c = channels

    def conv_w(k, kh, kw, ci, co):
        fan_in = kh * kw * ci
        return jax.random.normal(k, (kh, kw, ci, co), jnp.float32) / jnp.sqrt(
            jnp.float32(fan_in))

    ones = jnp.ones((c,), jnp.float32)
    zeros = jnp.zeros((c,), jnp.float32)
    # NOTE: biases of convs that are immediately followed by BatchNorm are
    # omitted (BN's mean subtraction cancels them exactly).
    p = {
        "d1_w": conv_w(keys[0], 3, 3, 1, c), "d1_g": ones, "d1_be": zeros,
        "d2_w": conv_w(keys[2], 4, 4, c, c), "d2_g": ones, "d2_be": zeros,
        "d3_w": conv_w(keys[4], 4, 4, c, c),
        "d3_b": 0.01 * jax.random.normal(keys[5], (c,), jnp.float32),
        "h_g": ones, "h_be": zeros,
        "lin_w": jax.random.normal(keys[6], (c, classes), jnp.float32)
                 / jnp.sqrt(jnp.float32(c)),
        "lin_b": 0.01 * jax.random.normal(keys[7], (classes,), jnp.float32),
        "blocks": [],
    }
    for l in range(layers):
        k0, _, k2, _ = keys[8 + 4 * l: 8 + 4 * l + 4]
        p["blocks"].append({
            "c1_w": conv_w(k0, 3, 3, c, c), "bn1_g": ones, "bn1_be": zeros,
            "c2_w": conv_w(k2, 3, 3, c, c), "bn2_g": ones, "bn2_be": zeros,
        })
    return p


# --------------------------------- main -----------------------------------------

if __name__ == "__main__":
    channels, layers, classes = 16, 1, 10
    key = jax.random.PRNGKey(0)
    kx, kp = jax.random.split(key)

    # small MNIST-like input: (batch=2, 1 channel, 16x16)
    x = jax.random.normal(kx, (2, 1, 16, 16), jnp.float32)
    params = init_params(kp, channels=channels, classes=classes, layers=layers)

    fwd = jax.jit(functools.partial(mnist_forward, layers=layers, coef=1.0))
    logits = fwd(params, x)
    jax.block_until_ready(logits)

    assert logits.shape == (2, classes), logits.shape
    assert bool(jnp.all(jnp.isfinite(logits)))
    print("KERNEL_OK")
</pallas_src>

<mosaic_0001>
module attributes {stable_mosaic.version = 11 : i64} {
  func.func @kernel(%arg0: memref<1x546xf32, #tpu.memory_space<vmem>>, %arg1: memref<16x9xf32, #tpu.memory_space<vmem>>, %arg2: memref<16x1xf32, #tpu.memory_space<vmem>>, %arg3: memref<16x1xf32, #tpu.memory_space<vmem>>, %arg4: memref<512x512xf32, #tpu.memory_space<vmem>>, %arg5: memref<256x16xbf16, #tpu.memory_space<vmem>>, %arg6: memref<16x1xf32, #tpu.memory_space<vmem>>, %arg7: memref<16x1xf32, #tpu.memory_space<vmem>>, %arg8: memref<512x162xf32, #tpu.memory_space<vmem>>, %arg9: memref<256x16xbf16, #tpu.memory_space<vmem>>, %arg10: memref<16x1xf32, #tpu.memory_space<vmem>>, %arg11: memref<162x50xf32, #tpu.memory_space<vmem>>, %arg12: memref<144x16xbf16, #tpu.memory_space<vmem>>, %arg13: memref<16x1xf32, #tpu.memory_space<vmem>>, %arg14: memref<16x1xf32, #tpu.memory_space<vmem>>, %arg15: memref<144x16xbf16, #tpu.memory_space<vmem>>, %arg16: memref<16x1xf32, #tpu.memory_space<vmem>>, %arg17: memref<16x1xf32, #tpu.memory_space<vmem>>, %arg18: memref<16x1xf32, #tpu.memory_space<vmem>>, %arg19: memref<16x1xf32, #tpu.memory_space<vmem>>, %arg20: memref<16x128xf32, #tpu.memory_space<vmem>>, %arg21: memref<1x128xf32, #tpu.memory_space<vmem>>, %arg22: memref<1x512xf32, #tpu.memory_space<vmem>>, %arg23: memref<1x512xf32, #tpu.memory_space<vmem>>, %arg24: memref<1x50xf32, #tpu.memory_space<vmem>>, %arg25: memref<2x50xf32, #tpu.memory_space<vmem>>, %arg26: memref<2x128xf32, #tpu.memory_space<vmem>>, %arg27: memref<16x563xf32, #tpu.memory_space<vmem>>, %arg28: memref<16x192xf32, #tpu.memory_space<vmem>>, %arg29: memref<16x62xf32, #tpu.memory_space<vmem>>) attributes {dimension_semantics = [], scalar_prefetch = 0 : i64, scratch_operands = 3 : i64, tpu.core_type = #tpu.core_type<tc>} {
    %c0 = arith.constant 0 : index
    %c0_0 = arith.constant 0 : index
    %0 = vector.load %arg1[%c0, %c0_0] : memref<16x9xf32, #tpu.memory_space<vmem>>, vector<16x9xf32>
    %cst = arith.constant 0.000000e+00 : f32
    %1 = vector.broadcast %cst : f32 to vector<16x512xf32>
    %2 = vector.extract_strided_slice %0 {offsets = [0, 0], sizes = [16, 1], strides = [1, 1]} : vector<16x9xf32> to vector<16x1xf32>
    %c0_1 = arith.constant 0 : index
    %c0_2 = arith.constant 0 : index
    %3 = vector.load %arg0[%c0_1, %c0_2] : memref<1x546xf32, #tpu.memory_space<vmem>>, vector<1x512xf32>
    %4 = vector.broadcast %2 : vector<16x1xf32> to vector<16x512xf32>
    %5 = vector.broadcast %3 : vector<1x512xf32> to vector<16x512xf32>
    %6 = arith.mulf %4, %5 : vector<16x512xf32>
    %7 = arith.addf %1, %6 : vector<16x512xf32>
    %8 = vector.extract_strided_slice %0 {offsets = [0, 1], sizes = [16, 1], strides = [1, 1]} : vector<16x9xf32> to vector<16x1xf32>
    %c0_3 = arith.constant 0 : index
    %c1 = arith.constant 1 : index
    %9 = vector.load %arg0[%c0_3, %c1] : memref<1x546xf32, #tpu.memory_space<vmem>>, vector<1x512xf32>
    %10 = vector.broadcast %8 : vector<16x1xf32> to vector<16x512xf32>
    %11 = vector.broadcast %9 : vector<1x512xf32> to vector<16x512xf32>
    %12 = arith.mulf %10, %11 : vector<16x512xf32>
    %13 = arith.addf %7, %12 : vector<16x512xf32>
    %14 = vector.extract_strided_slice %0 {offsets = [0, 2], sizes = [16, 1], strides = [1, 1]} : vector<16x9xf32> to vector<16x1xf32>
    %c0_4 = arith.constant 0 : index
    %c2 = arith.constant 2 : index
    %15 = vector.load %arg0[%c0_4, %c2] : memref<1x546xf32, #tpu.memory_space<vmem>>, vector<1x512xf32>
    %16 = vector.broadcast %14 : vector<16x1xf32> to vector<16x512xf32>
    %17 = vector.broadcast %15 : vector<1x512xf32> to vector<16x512xf32>
    %18 = arith.mulf %16, %17 : vector<16x512xf32>
    %19 = arith.addf %13, %18 : vector<16x512xf32>
    %20 = vector.extract_strided_slice %0 {offsets = [0, 3], sizes = [16, 1], strides = [1, 1]} : vector<16x9xf32> to vector<16x1xf32>
    %c0_5 = arith.constant 0 : index
    %c16 = arith.constant 16 : index
    %21 = vector.load %arg0[%c0_5, %c16] : memref<1x546xf32, #tpu.memory_space<vmem>>, vector<1x512xf32>
    %22 = vector.broadcast %20 : vector<16x1xf32> to vector<16x512xf32>
    %23 = vector.broadcast %21 : vector<1x512xf32> to vector<16x512xf32>
    %24 = arith.mulf %22, %23 : vector<16x512xf32>
    %25 = arith.addf %19, %24 : vector<16x512xf32>
    %26 = vector.extract_strided_slice %0 {offsets = [0, 4], sizes = [16, 1], strides = [1, 1]} : vector<16x9xf32> to vector<16x1xf32>
    %c0_6 = arith.constant 0 : index
    %c17 = arith.constant 17 : index
    %27 = vector.load %arg0[%c0_6, %c17] : memref<1x546xf32, #tpu.memory_space<vmem>>, vector<1x512xf32>
    %28 = vector.broadcast %26 : vector<16x1xf32> to vector<16x512xf32>
    %29 = vector.broadcast %27 : vector<1x512xf32> to vector<16x512xf32>
    %30 = arith.mulf %28, %29 : vector<16x512xf32>
    %31 = arith.addf %25, %30 : vector<16x512xf32>
    %32 = vector.extract_strided_slice %0 {offsets = [0, 5], sizes = [16, 1], strides = [1, 1]} : vector<16x9xf32> to vector<16x1xf32>
    %c0_7 = arith.constant 0 : index
    %c18 = arith.constant 18 : index
    %33 = vector.load %arg0[%c0_7, %c18] : memref<1x546xf32, #tpu.memory_space<vmem>>, vector<1x512xf32>
    %34 = vector.broadcast %32 : vector<16x1xf32> to vector<16x512xf32>
    %35 = vector.broadcast %33 : vector<1x512xf32> to vector<16x512xf32>
    %36 = arith.mulf %34, %35 : vector<16x512xf32>
    %37 = arith.addf %31, %36 : vector<16x512xf32>
    %38 = vector.extract_strided_slice %0 {offsets = [0, 6], sizes = [16, 1], strides = [1, 1]} : vector<16x9xf32> to vector<16x1xf32>
    %c0_8 = arith.constant 0 : index
    %c32 = arith.constant 32 : index
    %39 = vector.load %arg0[%c0_8, %c32] : memref<1x546xf32, #tpu.memory_space<vmem>>, vector<1x512xf32>
    %40 = vector.broadcast %38 : vector<16x1xf32> to vector<16x512xf32>
    %41 = vector.broadcast %39 : vector<1x512xf32> to vector<16x512xf32>
    %42 = arith.mulf %40, %41 : vector<16x512xf32>
    %43 = arith.addf %37, %42 : vector<16x512xf32>
    %44 = vector.extract_strided_slice %0 {offsets = [0, 7], sizes = [16, 1], strides = [1, 1]} : vector<16x9xf32> to vector<16x1xf32>
    %c0_9 = arith.constant 0 : index
    %c33 = arith.constant 33 : index
    %45 = vector.load %arg0[%c0_9, %c33] : memref<1x546xf32, #tpu.memory_space<vmem>>, vector<1x512xf32>
    %46 = vector.broadcast %44 : vector<16x1xf32> to vector<16x512xf32>
    %47 = vector.broadcast %45 : vector<1x512xf32> to vector<16x512xf32>
    %48 = arith.mulf %46, %47 : vector<16x512xf32>
    %49 = arith.addf %43, %48 : vector<16x512xf32>
    %50 = vector.extract_strided_slice %0 {offsets = [0, 8], sizes = [16, 1], strides = [1, 1]} : vector<16x9xf32> to vector<16x1xf32>
    %c0_10 = arith.constant 0 : index
    %c34 = arith.constant 34 : index
    %51 = vector.load %arg0[%c0_10, %c34] : memref<1x546xf32, #tpu.memory_space<vmem>>, vector<1x512xf32>
    %52 = vector.broadcast %50 : vector<16x1xf32> to vector<16x512xf32>
    %53 = vector.broadcast %51 : vector<1x512xf32> to vector<16x512xf32>
    %54 = arith.mulf %52, %53 : vector<16x512xf32>
    %55 = arith.addf %49, %54 : vector<16x512xf32>
    %c0_11 = arith.constant 0 : index
    %c0_12 = arith.constant 0 : index
    %56 = vector.load %arg2[%c0_11, %c0_12] : memref<16x1xf32, #tpu.memory_space<vmem>>, vector<16x1xf32>
    %c0_13 = arith.constant 0 : index
    %c0_14 = arith.constant 0 : index
    %57 = vector.load %arg3[%c0_13, %c0_14] : memref<16x1xf32, #tpu.memory_space<vmem>>, vector<16x1xf32>
    %c0_15 = arith.constant 0 : index
    %c0_16 = arith.constant 0 : index
    %58 = vector.load %arg22[%c0_15, %c0_16] : memref<1x512xf32, #tpu.memory_space<vmem>>, vector<1x512xf32>
    %59 = vector.broadcast %58 : vector<1x512xf32> to vector<16x512xf32>
    %60 = arith.mulf %55, %59 : vector<16x512xf32>
    %cst_17 = arith.constant dense<0.000000e+00> : vector<16xf32>
    %61 = vector.multi_reduction <add>, %60, %cst_17 [1] : vector<16x512xf32> to vector<16xf32>
    %62 = vector.shape_cast %61 : vector<16xf32> to vector<16x1xf32>
    %cst_18 = arith.constant 0.00255102036 : f32
    %63 = vector.broadcast %cst_18 : f32 to vector<16x1xf32>
    %64 = arith.mulf %62, %63 : vector<16x1xf32>
    %65 = vector.broadcast %64 : vector<16x1xf32> to vector<16x512xf32>
    %66 = arith.subf %55, %65 : vector<16x512xf32>
    %67 = vector.broadcast %58 : vector<1x512xf32> to vector<16x512xf32>
    %68 = arith.mulf %66, %67 : vector<16x512xf32>
    %69 = arith.mulf %68, %68 : vector<16x512xf32>
    %cst_19 = arith.constant dense<0.000000e+00> : vector<16xf32>
    %70 = vector.multi_reduction <add>, %69, %cst_19 [1] : vector<16x512xf32> to vector<16xf32>
    %71 = vector.shape_cast %70 : vector<16xf32> to vector<16x1xf32>
    %cst_20 = arith.constant 0.00255102036 : f32
    %72 = vector.broadcast %cst_20 : f32 to vector<16x1xf32>
    %73 = arith.mulf %71, %72 : vector<16x1xf32>
    %74 = vector.broadcast %64 : vector<16x1xf32> to vector<16x512xf32>
    %75 = arith.subf %55, %74 : vector<16x512xf32>
    %cst_21 = arith.constant 9.99999974E-6 : f32
    %76 = vector.broadcast %cst_21 : f32 to vector<16x1xf32>
    %77 = arith.addf %73, %76 : vector<16x1xf32>
    %78 = math.rsqrt %77 : vector<16x1xf32>
    %79 = arith.mulf %56, %78 : vector<16x1xf32>
    %80 = vector.broadcast %79 : vector<16x1xf32> to vector<16x512xf32>
    %81 = arith.mulf %75, %80 : vector<16x512xf32>
    %82 = vector.broadcast %57 : vector<16x1xf32> to vector<16x512xf32>
    %83 = arith.addf %81, %82 : vector<16x512xf32>
    %cst_22 = arith.constant 0.000000e+00 : f32
    %84 = vector.broadcast %cst_22 : f32 to vector<16x512xf32>
    %85 = arith.maximumf %83, %84 : vector<16x512xf32>
    %c0_23 = arith.constant 0 : index
    %c0_24 = arith.constant 0 : index
    %86 = vector.load %arg4[%c0_23, %c0_24] : memref<512x512xf32, #tpu.memory_space<vmem>>, vector<512x512xf32>
    %cst_25 = arith.constant dense<0.000000e+00> : vector<16x512xf32>
    %87 = tpu.matmul %85, %86, %cst_25 {dimension_numbers = #tpu.dot_dimension_numbers<[1], [0], [0], [1], [0, 0, 1, 1], [], []>} : vector<16x512xf32>, vector<512x512xf32>, vector<16x512xf32> -> vector<16x512xf32>
    %cst_26 = arith.constant 0.000000e+00 : f32
    %88 = vector.broadcast %cst_26 : f32 to vector<16x563xf32>
    %c0_27 = arith.constant 0 : index
    %c0_28 = arith.constant 0 : index
    %89 = vector.load %arg27[%c0_27, %c0_28] : memref<16x563xf32, #tpu.memory_space<vmem>>, vector<16x563xf32>
    tpu.vector_store %arg27[%c0_27, %c0_28], %88 {strides = array<i32>} : memref<16x563xf32, #tpu.memory_space<vmem>>, vector<16x563xf32>,
    %c0_29 = arith.constant 0 : index
    %c0_30 = arith.constant 0 : index
    %90 = vector.load %arg27[%c0_29, %c0_30] : memref<16x563xf32, #tpu.memory_space<vmem>>, vector<16x512xf32>
    tpu.vector_store %arg27[%c0_29, %c0_30], %87 {strides = array<i32>} : memref<16x563xf32, #tpu.memory_space<vmem>>, vector<16x512xf32>,
    %c0_31 = arith.constant 0 : index
    %c0_32 = arith.constant 0 : index
    %91 = vector.load %arg5[%c0_31, %c0_32] : memref<256x16xbf16, #tpu.memory_space<vmem>>, vector<256x16xbf16>
    %cst_33 = arith.constant 0.000000e+00 : f32
    %92 = vector.broadcast %cst_33 : f32 to vector<16x512xf32>
    %c0_34 = arith.constant 0 : index
    %c0_35 = arith.constant 0 : index
    %93 = vector.load %arg27[%c0_34, %c0_35] : memref<16x563xf32, #tpu.memory_space<vmem>>, vector<16x512xf32>
    %94 = arith.truncf %93 : vector<16x512xf32> to vector<16x512xbf16>
    %95 = vector.extract_strided_slice %91 {offsets = [0, 0], sizes = [16, 16], strides = [1, 1]} : vector<256x16xbf16> to vector<16x16xbf16>
    %cst_36 = arith.constant dense<0.000000e+00> : vector<16x512xf32>
    %96 = tpu.matmul %95, %94, %cst_36 {dimension_numbers = #tpu.dot_dimension_numbers<[1], [0], [0], [1], [0, 0, 1, 1], [], []>} : vector<16x16xbf16>, vector<16x512xbf16>, vector<16x512xf32> -> vector<16x512xf32>
    %97 = arith.addf %92, %96 : vector<16x512xf32>
    %c0_37 = arith.constant 0 : index
    %c1_38 = arith.constant 1 : index
    %98 = vector.load %arg27[%c0_37, %c1_38] : memref<16x563xf32, #tpu.memory_space<vmem>>, vector<16x512xf32>
    %99 = arith.truncf %98 : vector<16x512xf32> to vector<16x512xbf16>
    %100 = vector.extract_strided_slice %91 {offsets = [16, 0], sizes = [16, 16], strides = [1, 1]} : vector<256x16xbf16> to vector<16x16xbf16>
    %cst_39 = arith.constant dense<0.000000e+00> : vector<16x512xf32>
    %101 = tpu.matmul %100, %99, %cst_39 {dimension_numbers = #tpu.dot_dimension_numbers<[1], [0], [0], [1], [0, 0, 1, 1], [], []>} : vector<16x16xbf16>, vector<16x512xbf16>, vector<16x512xf32> -> vector<16x512xf32>
    %102 = arith.addf %97, %101 : vector<16x512xf32>
    %c0_40 = arith.constant 0 : index
    %c2_41 = arith.constant 2 : index
    %103 = vector.load %arg27[%c0_40, %c2_41] : memref<16x563xf32, #tpu.memory_space<vmem>>, vector<16x512xf32>
    %104 = arith.truncf %103 : vector<16x512xf32> to vector<16x512xbf16>
    %105 = vector.extract_strided_slice %91 {offsets = [32, 0], sizes = [16, 16], strides = [1, 1]} : vector<256x16xbf16> to vector<16x16xbf16>
    %cst_42 = arith.constant dense<0.000000e+00> : vector<16x512xf32>
    %106 = tpu.matmul %105, %104, %cst_42 {dimension_numbers = #tpu.dot_dimension_numbers<[1], [0], [0], [1], [0, 0, 1, 1], [], []>} : vector<16x16xbf16>, vector<16x512xbf16>, vector<16x512xf32> -> vector<16x512xf32>
    %107 = arith.addf %102, %106 : vector<16x512xf32>
    %c0_43 = arith.constant 0 : index
    %c3 = arith.constant 3 : index
    %108 = vector.load %arg27[%c0_43, %c3] : memref<16x563xf32, #tpu.memory_space<vmem>>, vector<16x512xf32>
    %109 = arith.truncf %108 : vector<16x512xf32> to vector<16x512xbf16>
    %110 = vector.extract_strided_slice %91 {offsets = [48, 0], sizes = [16, 16], strides = [1, 1]} : vector<256x16xbf16> to vector<16x16xbf16>
    %cst_44 = arith.constant dense<0.000000e+00> : vector<16x512xf32>
    %111 = tpu.matmul %110, %109, %cst_44 {dimension_numbers = #tpu.dot_dimension_numbers<[1], [0], [0], [1], [0, 0, 1, 1], [], []>} : vector<16x16xbf16>, vector<16x512xbf16>, vector<16x512xf32> -> vector<16x512xf32>
    %112 = arith.addf %107, %111 : vector<16x512xf32>
    %c0_45 = arith.constant 0 : index
    %c16_46 = arith.constant 16 : index
    %113 = vector.load %arg27[%c0_45, %c16_46] : memref<16x563xf32, #tpu.memory_space<vmem>>, vector<16x512xf32>
    %114 = arith.truncf %113 : vector<16x512xf32> to vector<16x512xbf16>
    %115 = vector.extract_strided_slice %91 {offsets = [64, 0], sizes = [16, 16], strides = [1, 1]} : vector<256x16xbf16> to vector<16x16xbf16>
    %cst_47 = arith.constant dense<0.000000e+00> : vector<16x512xf32>
    %116 = tpu.matmul %115, %114, %cst_47 {dimension_numbers = #tpu.dot_dimension_numbers<[1], [0], [0], [1], [0, 0, 1, 1], [], []>} : vector<16x16xbf16>, vector<16x512xbf16>, vector<16x512xf32> -> vector<16x512xf32>
    %117 = arith.addf %112, %116 : vector<16x512xf32>
    %c0_48 = arith.constant 0 : index
    %c17_49 = arith.constant 17 : index
    %118 = vector.load %arg27[%c0_48, %c17_49] : memref<16x563xf32, #tpu.memory_space<vmem>>, vector<16x512xf32>
    %119 = arith.truncf %118 : vector<16x512xf32> to vector<16x512xbf16>
    %120 = vector.extract_strided_slice %91 {offsets = [80, 0], sizes = [16, 16], strides = [1, 1]} : vector<256x16xbf16> to vector<16x16xbf16>
    %cst_50 = arith.constant dense<0.000000e+00> : vector<16x512xf32>
    %121 = tpu.matmul %120, %119, %cst_50 {dimension_numbers = #tpu.dot_dimension_numbers<[1], [0], [0], [1], [0, 0, 1, 1], [], []>} : vector<16x16xbf16>, vector<16x512xbf16>, vector<16x512xf32> -> vector<16x512xf32>
    %122 = arith.addf %117, %121 : vector<16x512xf32>
    %c0_51 = arith.constant 0 : index
    %c18_52 = arith.constant 18 : index
    %123 = vector.load %arg27[%c0_51, %c18_52] : memref<16x563xf32, #tpu.memory_space<vmem>>, vector<16x512xf32>
    %124 = arith.truncf %123 : vector<16x512xf32> to vector<16x512xbf16>
    %125 = vector.extract_strided_slice %91 {offsets = [96, 0], sizes = [16, 16], strides = [1, 1]} : vector<256x16xbf16> to vector<16x16xbf16>
    %cst_53 = arith.constant dense<0.000000e+00> : vector<16x512xf32>
    %126 = tpu.matmul %125, %124, %cst_53 {dimension_numbers = #tpu.dot_dimension_numbers<[1], [0], [0], [1], [0, 0, 1, 1], [], []>} : vector<16x16xbf16>, vector<16x512xbf16>, vector<16x512xf32> -> vector<16x512xf32>
    %127 = arith.addf %122, %126 : vector<16x512xf32>
    %c0_54 = arith.constant 0 : index
    %c19 = arith.constant 19 : index
    %128 = vector.load %arg27[%c0_54, %c19] : memref<16x563xf32, #tpu.memory_space<vmem>>, vector<16x512xf32>
    %129 = arith.truncf %128 : vector<16x512xf32> to vector<16x512xbf16>
    %130 = vector.extract_strided_slice %91 {offsets = [112, 0], sizes = [16, 16], strides = [1, 1]} : vector<256x16xbf16> to vector<16x16xbf16>
    %cst_55 = arith.constant dense<0.000000e+00> : vector<16x512xf32>
    %131 = tpu.matmul %130, %129, %cst_55 {dimension_numbers = #tpu.dot_dimension_numbers<[1], [0], [0], [1], [0, 0, 1, 1], [], []>} : vector<16x16xbf16>, vector<16x512xbf16>, vector<16x512xf32> -> vector<16x512xf32>
    %132 = arith.addf %127, %131 : vector<16x512xf32>
    %c0_56 = arith.constant 0 : index
    %c32_57 = arith.constant 32 : index
    %133 = vector.load %arg27[%c0_56, %c32_57] : memref<16x563xf32, #tpu.memory_space<vmem>>, vector<16x512xf32>
    %134 = arith.truncf %133 : vector<16x512xf32> to vector<16x512xbf16>
    %135 = vector.extract_strided_slice %91 {offsets = [128, 0], sizes = [16, 16], strides = [1, 1]} : vector<256x16xbf16> to vector<16x16xbf16>
    %cst_58 = arith.constant dense<0.000000e+00> : vector<16x512xf32>
    %136 = tpu.matmul %135, %134, %cst_58 {dimension_numbers = #tpu.dot_dimension_numbers<[1], [0], [0], [1], [0, 0, 1, 1], [], []>} : vector<16x16xbf16>, vector<16x512xbf16>, vector<16x512xf32> -> vector<16x512xf32>
    %137 = arith.addf %132, %136 : vector<16x512xf32>
    %c0_59 = arith.constant 0 : index
    %c33_60 = arith.constant 33 : index
    %138 = vector.load %arg27[%c0_59, %c33_60] : memref<16x563xf32, #tpu.memory_space<vmem>>, vector<16x512xf32>
    %139 = arith.truncf %138 : vector<16x512xf32> to vector<16x512xbf16>
    %140 = vector.extract_strided_slice %91 {offsets = [144, 0], sizes = [16, 16], strides = [1, 1]} : vector<256x16xbf16> to vector<16x16xbf16>
    %cst_61 = arith.constant dense<0.000000e+00> : vector<16x512xf32>
    %141 = tpu.matmul %140, %139, %cst_61 {dimension_numbers = #tpu.dot_dimension_numbers<[1], [0], [0], [1], [0, 0, 1, 1], [], []>} : vector<16x16xbf16>, vector<16x512xbf16>, vector<16x512xf32> -> vector<16x512xf32>
    %142 = arith.addf %137, %141 : vector<16x512xf32>
    %c0_62 = arith.constant 0 : index
    %c34_63 = arith.constant 34 : index
    %143 = vector.load %arg27[%c0_62, %c34_63] : memref<16x563xf32, #tpu.memory_space<vmem>>, vector<16x512xf32>
    %144 = arith.truncf %143 : vector<16x512xf32> to vector<16x512xbf16>
    %145 = vector.extract_strided_slice %91 {offsets = [160, 0], sizes = [16, 16], strides = [1, 1]} : vector<256x16xbf16> to vector<16x16xbf16>
    %cst_64 = arith.constant dense<0.000000e+00> : vector<16x512xf32>
    %146 = tpu.matmul %145, %144, %cst_64 {dimension_numbers = #tpu.dot_dimension_numbers<[1], [0], [0], [1], [0, 0, 1, 1], [], []>} : vector<16x16xbf16>, vector<16x512xbf16>, vector<16x512xf32> -> vector<16x512xf32>
    %147 = arith.addf %142, %146 : vector<16x512xf32>
    %c0_65 = arith.constant 0 : index
    %c35 = arith.constant 35 : index
    %148 = vector.load %arg27[%c0_65, %c35] : memref<16x563xf32, #tpu.memory_space<vmem>>, vector<16x512xf32>
    %149 = arith.truncf %148 : vector<16x512xf32> to vector<16x512xbf16>
    %150 = vector.extract_strided_slice %91 {offsets = [176, 0], sizes = [16, 16], strides = [1, 1]} : vector<256x16xbf16> to vector<16x16xbf16>
    %cst_66 = arith.constant dense<0.000000e+00> : vector<16x512xf32>
    %151 = tpu.matmul %150, %149, %cst_66 {dimension_numbers = #tpu.dot_dimension_numbers<[1], [0], [0], [1], [0, 0, 1, 1], [], []>} : vector<16x16xbf16>, vector<16x512xbf16>, vector<16x512xf32> -> vector<16x512xf32>
    %152 = arith.addf %147, %151 : vector<16x512xf32>
    %c0_67 = arith.constant 0 : index
    %c48 = arith.constant 48 : index
    %153 = vector.load %arg27[%c0_67, %c48] : memref<16x563xf32, #tpu.memory_space<vmem>>, vector<16x512xf32>
    %154 = arith.truncf %153 : vector<16x512xf32> to vector<16x512xbf16>
    %155 = vector.extract_strided_slice %91 {offsets = [192, 0], sizes = [16, 16], strides = [1, 1]} : vector<256x16xbf16> to vector<16x16xbf16>
    %cst_68 = arith.constant dense<0.000000e+00> : vector<16x512xf32>
    %156 = tpu.matmul %155, %154, %cst_68 {dimension_numbers = #tpu.dot_dimension_numbers<[1], [0], [0], [1], [0, 0, 1, 1], [], []>} : vector<16x16xbf16>, vector<16x512xbf16>, vector<16x512xf32> -> vector<16x512xf32>
    %157 = arith.addf %152, %156 : vector<16x512xf32>
    %c0_69 = arith.constant 0 : index
    %c49 = arith.constant 49 : index
    %158 = vector.load %arg27[%c0_69, %c49] : memref<16x563xf32, #tpu.memory_space<vmem>>, vector<16x512xf32>
    %159 = arith.truncf %158 : vector<16x512xf32> to vector<16x512xbf16>
    %160 = vector.extract_strided_slice %91 {offsets = [208, 0], sizes = [16, 16], strides = [1, 1]} : vector<256x16xbf16> to vector<16x16xbf16>
    %cst_70 = arith.constant dense<0.000000e+00> : vector<16x512xf32>
    %161 = tpu.matmul %160, %159, %cst_70 {dimension_numbers = #tpu.dot_dimension_numbers<[1], [0], [0], [1], [0, 0, 1, 1], [], []>} : vector<16x16xbf16>, vector<16x512xbf16>, vector<16x512xf32> -> vector<16x512xf32>
    %162 = arith.addf %157, %161 : vector<16x512xf32>
    %c0_71 = arith.constant 0 : index
    %c50 = arith.constant 50 : index
    %163 = vector.load %arg27[%c0_71, %c50] : memref<16x563xf32, #tpu.memory_space<vmem>>, vector<16x512xf32>
    %164 = arith.truncf %163 : vector<16x512xf32> to vector<16x512xbf16>
    %165 = vector.extract_strided_slice %91 {offsets = [224, 0], sizes = [16, 16], strides = [1, 1]} : vector<256x16xbf16> to vector<16x16xbf16>
    %cst_72 = arith.constant dense<0.000000e+00> : vector<16x512xf32>
    %166 = tpu.matmul %165, %164, %cst_72 {dimension_numbers = #tpu.dot_dimension_numbers<[1], [0], [0], [1], [0, 0, 1, 1], [], []>} : vector<16x16xbf16>, vector<16x512xbf16>, vector<16x512xf32> -> vector<16x512xf32>
    %167 = arith.addf %162, %166 : vector<16x512xf32>
    %c0_73 = arith.constant 0 : index
    %c51 = arith.constant 51 : index
    %168 = vector.load %arg27[%c0_73, %c51] : memref<16x563xf32, #tpu.memory_space<vmem>>, vector<16x512xf32>
    %169 = arith.truncf %168 : vector<16x512xf32> to vector<16x512xbf16>
    %170 = vector.extract_strided_slice %91 {offsets = [240, 0], sizes = [16, 16], strides = [1, 1]} : vector<256x16xbf16> to vector<16x16xbf16>
    %cst_74 = arith.constant dense<0.000000e+00> : vector<16x512xf32>
    %171 = tpu.matmul %170, %169, %cst_74 {dimension_numbers = #tpu.dot_dimension_numbers<[1], [0], [0], [1], [0, 0, 1, 1], [], []>} : vector<16x16xbf16>, vector<16x512xbf16>, vector<16x512xf32> -> vector<16x512xf32>
    %172 = arith.addf %167, %171 : vector<16x512xf32>
    %c0_75 = arith.constant 0 : index
    %c0_76 = arith.constant 0 : index
    %173 = vector.load %arg6[%c0_75, %c0_76] : memref<16x1xf32, #tpu.memory_space<vmem>>, vector<16x1xf32>
    %c0_77 = arith.constant 0 : index
    %c0_78 = arith.constant 0 : index
    %174 = vector.load %arg7[%c0_77, %c0_78] : memref<16x1xf32, #tpu.memory_space<vmem>>, vector<16x1xf32>
    %c0_79 = arith.constant 0 : index
    %c0_80 = arith.constant 0 : index
    %175 = vector.load %arg23[%c0_79, %c0_80] : memref<1x512xf32, #tpu.memory_space<vmem>>, vector<1x512xf32>
    %176 = vector.broadcast %175 : vector<1x512xf32> to vector<16x512xf32>
    %177 = arith.mulf %172, %176 : vector<16x512xf32>
    %cst_81 = arith.constant dense<0.000000e+00> : vector<16xf32>
    %178 = vector.multi_reduction <add>, %177, %cst_81 [1] : vector<16x512xf32> to vector<16xf32>
    %179 = vector.shape_cast %178 : vector<16xf32> to vector<16x1xf32>
    %cst_82 = arith.constant 0.0102040814 : f32
    %180 = vector.broadcast %cst_82 : f32 to vector<16x1xf32>
    %181 = arith.mulf %179, %180 : vector<16x1xf32>
    %182 = vector.broadcast %181 : vector<16x1xf32> to vector<16x512xf32>
    %183 = arith.subf %172, %182 : vector<16x512xf32>
    %184 = vector.broadcast %175 : vector<1x512xf32> to vector<16x512xf32>
    %185 = arith.mulf %183, %184 : vector<16x512xf32>
    %186 = arith.mulf %185, %185 : vector<16x512xf32>
    %cst_83 = arith.constant dense<0.000000e+00> : vector<16xf32>
    %187 = vector.multi_reduction <add>, %186, %cst_83 [1] : vector<16x512xf32> to vector<16xf32>
    %188 = vector.shape_cast %187 : vector<16xf32> to vector<16x1xf32>
    %cst_84 = arith.constant 0.0102040814 : f32
    %189 = vector.broadcast %cst_84 : f32 to vector<16x1xf32>
    %190 = arith.mulf %188, %189 : vector<16x1xf32>
    %191 = vector.broadcast %181 : vector<16x1xf32> to vector<16x512xf32>
    %192 = arith.subf %172, %191 : vector<16x512xf32>
    %cst_85 = arith.constant 9.99999974E-6 : f32
    %193 = vector.broadcast %cst_85 : f32 to vector<16x1xf32>
    %194 = arith.addf %190, %193 : vector<16x1xf32>
    %195 = math.rsqrt %194 : vector<16x1xf32>
    %196 = arith.mulf %173, %195 : vector<16x1xf32>
    %197 = vector.broadcast %196 : vector<16x1xf32> to vector<16x512xf32>
    %198 = arith.mulf %192, %197 : vector<16x512xf32>
    %199 = vector.broadcast %174 : vector<16x1xf32> to vector<16x512xf32>
    %200 = arith.addf %198, %199 : vector<16x512xf32>
    %cst_86 = arith.constant 0.000000e+00 : f32
    %201 = vector.broadcast %cst_86 : f32 to vector<16x512xf32>
    %202 = arith.maximumf %200, %201 : vector<16x512xf32>
    %c0_87 = arith.constant 0 : index
    %c0_88 = arith.constant 0 : index
    %203 = vector.load %arg8[%c0_87, %c0_88] : memref<512x162xf32, #tpu.memory_space<vmem>>, vector<512x162xf32>
    %cst_89 = arith.constant dense<0.000000e+00> : vector<16x162xf32>
    %204 = tpu.matmul %202, %203, %cst_89 {dimension_numbers = #tpu.dot_dimension_numbers<[1], [0], [0], [1], [0, 0, 1, 1], [], []>} : vector<16x512xf32>, vector<512x162xf32>, vector<16x162xf32> -> vector<16x162xf32>
    %cst_90 = arith.constant 0.000000e+00 : f32
    %205 = vector.broadcast %cst_90 : f32 to vector<16x192xf32>
    %c0_91 = arith.constant 0 : index
    %c0_92 = arith.constant 0 : index
    %206 = vector.load %arg28[%c0_91, %c0_92] : memref<16x192xf32, #tpu.memory_space<vmem>>, vector<16x192xf32>
    tpu.vector_store %arg28[%c0_91, %c0_92], %205 {strides = array<i32>} : memref<16x192xf32, #tpu.memory_space<vmem>>, vector<16x192xf32>,
    %c0_93 = arith.constant 0 : index
    %c0_94 = arith.constant 0 : index
    %207 = vector.load %arg28[%c0_93, %c0_94] : memref<16x192xf32, #tpu.memory_space<vmem>>, vector<16x162xf32>
    tpu.vector_store %arg28[%c0_93, %c0_94], %204 {strides = array<i32>} : memref<16x192xf32, #tpu.memory_space<vmem>>, vector<16x162xf32>,
    %c0_95 = arith.constant 0 : index
    %c0_96 = arith.constant 0 : index
    %208 = vector.load %arg9[%c0_95, %c0_96] : memref<256x16xbf16, #tpu.memory_space<vmem>>, vector<256x16xbf16>
    %cst_97 = arith.constant 0.000000e+00 : f32
    %209 = vector.broadcast %cst_97 : f32 to vector<16x162xf32>
    %c0_98 = arith.constant 0 : index
    %c0_99 = arith.constant 0 : index
    %210 = vector.load %arg28[%c0_98, %c0_99] : memref<16x192xf32, #tpu.memory_space<vmem>>, vector<16x162xf32>
    %211 = arith.truncf %210 : vector<16x162xf32> to vector<16x162xbf16>
    %212 = vector.extract_strided_slice %208 {offsets = [0, 0], sizes = [16, 16], strides = [1, 1]} : vector<256x16xbf16> to vector<16x16xbf16>
    %cst_100 = arith.constant dense<0.000000e+00> : vector<16x162xf32>
    %213 = tpu.matmul %212, %211, %cst_100 {dimension_numbers = #tpu.dot_dimension_numbers<[1], [0], [0], [1], [0, 0, 1, 1], [], []>} : vector<16x16xbf16>, vector<16x162xbf16>, vector<16x162xf32> -> vector<16x162xf32>
    %214 = arith.addf %209, %213 : vector<16x162xf32>
    %c0_101 = arith.constant 0 : index
    %c1_102 = arith.constant 1 : index
    %215 = vector.load %arg28[%c0_101, %c1_102] : memref<16x192xf32, #tpu.memory_space<vmem>>, vector<16x162xf32>
    %216 = arith.truncf %215 : vector<16x162xf32> to vector<16x162xbf16>
    %217 = vector.extract_strided_slice %208 {offsets = [16, 0], sizes = [16, 16], strides = [1, 1]} : vector<256x16xbf16> to vector<16x16xbf16>
    %cst_103 = arith.constant dense<0.000000e+00> : vector<16x162xf32>
    %218 = tpu.matmul %217, %216, %cst_103 {dimension_numbers = #tpu.dot_dimension_numbers<[1], [0], [0], [1], [0, 0, 1, 1], [], []>} : vector<16x16xbf16>, vector<16x162xbf16>, vector<16x162xf32> -> vector<16x162xf32>
    %219 = arith.addf %214, %218 : vector<16x162xf32>
    %c0_104 = arith.constant 0 : index
    %c2_105 = arith.constant 2 : index
    %220 = vector.load %arg28[%c0_104, %c2_105] : memref<16x192xf32, #tpu.memory_space<vmem>>, vector<16x162xf32>
    %221 = arith.truncf %220 : vector<16x162xf32> to vector<16x162xbf16>
    %222 = vector.extract_strided_slice %208 {offsets = [32, 0], sizes = [16, 16], strides = [1, 1]} : vector<256x16xbf16> to vector<16x16xbf16>
    %cst_106 = arith.constant dense<0.000000e+00> : vector<16x162xf32>
    %223 = tpu.matmul %222, %221, %cst_106 {dimension_numbers = #tpu.dot_dimension_numbers<[1], [0], [0], [1], [0, 0, 1, 1], [], []>} : vector<16x16xbf16>, vector<16x162xbf16>, vector<16x162xf32> -> vector<16x162xf32>
    %224 = arith.addf %219, %223 : vector<16x162xf32>
    %c0_107 = arith.constant 0 : index
    %c3_108 = arith.constant 3 : index
    %225 = vector.load %arg28[%c0_107, %c3_108] : memref<16x192xf32, #tpu.memory_space<vmem>>, vector<16x162xf32>
    %226 = arith.truncf %225 : vector<16x162xf32> to vector<16x162xbf16>
    %227 = vector.extract_strided_slice %208 {offsets = [48, 0], sizes = [16, 16], strides = [1, 1]} : vector<256x16xbf16> to vector<16x16xbf16>
    %cst_109 = arith.constant dense<0.000000e+00> : vector<16x162xf32>
    %228 = tpu.matmul %227, %226, %cst_109 {dimension_numbers = #tpu.dot_dimension_numbers<[1], [0], [0], [1], [0, 0, 1, 1], [], []>} : vector<16x16xbf16>, vector<16x162xbf16>, vector<16x162xf32> -> vector<16x162xf32>
    %229 = arith.addf %224, %228 : vector<16x162xf32>
    %c0_110 = arith.constant 0 : index
    %c9 = arith.constant 9 : index
    %230 = vector.load %arg28[%c0_110, %c9] : memref<16x192xf32, #tpu.memory_space<vmem>>, vector<16x162xf32>
    %231 = arith.truncf %230 : vector<16x162xf32> to vector<16x162xbf16>
    %232 = vector.extract_strided_slice %208 {offsets = [64, 0], sizes = [16, 16], strides = [1, 1]} : vector<256x16xbf16> to vector<16x16xbf16>
    %cst_111 = arith.constant dense<0.000000e+00> : vector<16x162xf32>
    %233 = tpu.matmul %232, %231, %cst_111 {dimension_numbers = #tpu.dot_dimension_numbers<[1], [0], [0], [1], [0, 0, 1, 1], [], []>} : vector<16x16xbf16>, vector<16x162xbf16>, vector<16x162xf32> -> vector<16x162xf32>
    %234 = arith.addf %229, %233 : vector<16x162xf32>
    %c0_112 = arith.constant 0 : index
    %c10 = arith.constant 10 : index
    %235 = vector.load %arg28[%c0_112, %c10] : memref<16x192xf32, #tpu.memory_space<vmem>>, vector<16x162xf32>
    %236 = arith.truncf %235 : vector<16x162xf32> to vector<16x162xbf16>
    %237 = vector.extract_strided_slice %208 {offsets = [80, 0], sizes = [16, 16], strides = [1, 1]} : vector<256x16xbf16> to vector<16x16xbf16>
    %cst_113 = arith.constant dense<0.000000e+00> : vector<16x162xf32>
    %238 = tpu.matmul %237, %236, %cst_113 {dimension_numbers = #tpu.dot_dimension_numbers<[1], [0], [0], [1], [0, 0, 1, 1], [], []>} : vector<16x16xbf16>, vector<16x162xbf16>, vector<16x162xf32> -> vector<16x162xf32>
    %239 = arith.addf %234, %238 : vector<16x162xf32>
    %c0_114 = arith.constant 0 : index
    %c11 = arith.constant 11 : index
    %240 = vector.load %arg28[%c0_114, %c11] : memref<16x192xf32, #tpu.memory_space<vmem>>, vector<16x162xf32>
    %241 = arith.truncf %240 : vector<16x162xf32> to vector<16x162xbf16>
    %242 = vector.extract_strided_slice %208 {offsets = [96, 0], sizes = [16, 16], strides = [1, 1]} : vector<256x16xbf16> to vector<16x16xbf16>
    %cst_115 = arith.constant dense<0.000000e+00> : vector<16x162xf32>
    %243 = tpu.matmul %242, %241, %cst_115 {dimension_numbers = #tpu.dot_dimension_numbers<[1], [0], [0], [1], [0, 0, 1, 1], [], []>} : vector<16x16xbf16>, vector<16x162xbf16>, vector<16x162xf32> -> vector<16x162xf32>
    %244 = arith.addf %239, %243 : vector<16x162xf32>
    %c0_116 = arith.constant 0 : index
    %c12 = arith.constant 12 : index
    %245 = vector.load %arg28[%c0_116, %c12] : memref<16x192xf32, #tpu.memory_space<vmem>>, vector<16x162xf32>
    %246 = arith.truncf %245 : vector<16x162xf32> to vector<16x162xbf16>
    %247 = vector.extract_strided_slice %208 {offsets = [112, 0], sizes = [16, 16], strides = [1, 1]} : vector<256x16xbf16> to vector<16x16xbf16>
    %cst_117 = arith.constant dense<0.000000e+00> : vector<16x162xf32>
    %248 = tpu.matmul %247, %246, %cst_117 {dimension_numbers = #tpu.dot_dimension_numbers<[1], [0], [0], [1], [0, 0, 1, 1], [], []>} : vector<16x16xbf16>, vector<16x162xbf16>, vector<16x162xf32> -> vector<16x162xf32>
    %249 = arith.addf %244, %248 : vector<16x162xf32>
    %c0_118 = arith.constant 0 : index
    %c18_119 = arith.constant 18 : index
    %250 = vector.load %arg28[%c0_118, %c18_119] : memref<16x192xf32, #tpu.memory_space<vmem>>, vector<16x162xf32>
    %251 = arith.truncf %250 : vector<16x162xf32> to vector<16x162xbf16>
    %252 = vector.extract_strided_slice %208 {offsets = [128, 0], sizes = [16, 16], strides = [1, 1]} : vector<256x16xbf16> to vector<16x16xbf16>
    %cst_120 = arith.constant dense<0.000000e+00> : vector<16x162xf32>
    %253 = tpu.matmul %252, %251, %cst_120 {dimension_numbers = #tpu.dot_dimension_numbers<[1], [0], [0], [1], [0, 0, 1, 1], [], []>} : vector<16x16xbf16>, vector<16x162xbf16>, vector<16x162xf32> -> vector<16x162xf32>
    %254 = arith.addf %249, %253 : vector<16x162xf32>
    %c0_121 = arith.constant 0 : index
    %c19_122 = arith.constant 19 : index
    %255 = vector.load %arg28[%c0_121, %c19_122] : memref<16x192xf32, #tpu.memory_space<vmem>>, vector<16x162xf32>
    %256 = arith.truncf %255 : vector<16x162xf32> to vector<16x162xbf16>
    %257 = vector.extract_strided_slice %208 {offsets = [144, 0], sizes = [16, 16], strides = [1, 1]} : vector<256x16xbf16> to vector<16x16xbf16>
    %cst_123 = arith.constant dense<0.000000e+00> : vector<16x162xf32>
    %258 = tpu.matmul %257, %256, %cst_123 {dimension_numbers = #tpu.dot_dimension_numbers<[1], [0], [0], [1], [0, 0, 1, 1], [], []>} : vector<16x16xbf16>, vector<16x162xbf16>, vector<16x162xf32> -> vector<16x162xf32>
    %259 = arith.addf %254, %258 : vector<16x162xf32>
    %c0_124 = arith.constant 0 : index
    %c20 = arith.constant 20 : index
    %260 = vector.load %arg28[%c0_124, %c20] : memref<16x192xf32, #tpu.memory_space<vmem>>, vector<16x162xf32>
    %261 = arith.truncf %260 : vector<16x162xf32> to vector<16x162xbf16>
    %262 = vector.extract_strided_slice %208 {offsets = [160, 0], sizes = [16, 16], strides = [1, 1]} : vector<256x16xbf16> to vector<16x16xbf16>
    %cst_125 = arith.constant dense<0.000000e+00> : vector<16x162xf32>
    %263 = tpu.matmul %262, %261, %cst_125 {dimension_numbers = #tpu.dot_dimension_numbers<[1], [0], [0], [1], [0, 0, 1, 1], [], []>} : vector<16x16xbf16>, vector<16x162xbf16>, vector<16x162xf32> -> vector<16x162xf32>
    %264 = arith.addf %259, %263 : vector<16x162xf32>
    %c0_126 = arith.constant 0 : index
    %c21 = arith.constant 21 : index
    %265 = vector.load %arg28[%c0_126, %c21] : memref<16x192xf32, #tpu.memory_space<vmem>>, vector<16x162xf32>
    %266 = arith.truncf %265 : vector<16x162xf32> to vector<16x162xbf16>
    %267 = vector.extract_strided_slice %208 {offsets = [176, 0], sizes = [16, 16], strides = [1, 1]} : vector<256x16xbf16> to vector<16x16xbf16>
    %cst_127 = arith.constant dense<0.000000e+00> : vector<16x162xf32>
    %268 = tpu.matmul %267, %266, %cst_127 {dimension_numbers = #tpu.dot_dimension_numbers<[1], [0], [0], [1], [0, 0, 1, 1], [], []>} : vector<16x16xbf16>, vector<16x162xbf16>, vector<16x162xf32> -> vector<16x162xf32>
    %269 = arith.addf %264, %268 : vector<16x162xf32>
    %c0_128 = arith.constant 0 : index
    %c27 = arith.constant 27 : index
    %270 = vector.load %arg28[%c0_128, %c27] : memref<16x192xf32, #tpu.memory_space<vmem>>, vector<16x162xf32>
    %271 = arith.truncf %270 : vector<16x162xf32> to vector<16x162xbf16>
    %272 = vector.extract_strided_slice %208 {offsets = [192, 0], sizes = [16, 16], strides = [1, 1]} : vector<256x16xbf16> to vector<16x16xbf16>
    %cst_129 = arith.constant dense<0.000000e+00> : vector<16x162xf32>
    %273 = tpu.matmul %272, %271, %cst_129 {dimension_numbers = #tpu.dot_dimension_numbers<[1], [0], [0], [1], [0, 0, 1, 1], [], []>} : vector<16x16xbf16>, vector<16x162xbf16>, vector<16x162xf32> -> vector<16x162xf32>
    %274 = arith.addf %269, %273 : vector<16x162xf32>
    %c0_130 = arith.constant 0 : index
    %c28 = arith.constant 28 : index
    %275 = vector.load %arg28[%c0_130, %c28] : memref<16x192xf32, #tpu.memory_space<vmem>>, vector<16x162xf32>
    %276 = arith.truncf %275 : vector<16x162xf32> to vector<16x162xbf16>
    %277 = vector.extract_strided_slice %208 {offsets = [208, 0], sizes = [16, 16], strides = [1, 1]} : vector<256x16xbf16> to vector<16x16xbf16>
    %cst_131 = arith.constant dense<0.000000e+00> : vector<16x162xf32>
    %278 = tpu.matmul %277, %276, %cst_131 {dimension_numbers = #tpu.dot_dimension_numbers<[1], [0], [0], [1], [0, 0, 1, 1], [], []>} : vector<16x16xbf16>, vector<16x162xbf16>, vector<16x162xf32> -> vector<16x162xf32>
    %279 = arith.addf %274, %278 : vector<16x162xf32>
    %c0_132 = arith.constant 0 : index
    %c29 = arith.constant 29 : index
    %280 = vector.load %arg28[%c0_132, %c29] : memref<16x192xf32, #tpu.memory_space<vmem>>, vector<16x162xf32>
    %281 = arith.truncf %280 : vector<16x162xf32> to vector<16x162xbf16>
    %282 = vector.extract_strided_slice %208 {offsets = [224, 0], sizes = [16, 16], strides = [1, 1]} : vector<256x16xbf16> to vector<16x16xbf16>
    %cst_133 = arith.constant dense<0.000000e+00> : vector<16x162xf32>
    %283 = tpu.matmul %282, %281, %cst_133 {dimension_numbers = #tpu.dot_dimension_numbers<[1], [0], [0], [1], [0, 0, 1, 1], [], []>} : vector<16x16xbf16>, vector<16x162xbf16>, vector<16x162xf32> -> vector<16x162xf32>
    %284 = arith.addf %279, %283 : vector<16x162xf32>
    %c0_134 = arith.constant 0 : index
    %c30 = arith.constant 30 : index
    %285 = vector.load %arg28[%c0_134, %c30] : memref<16x192xf32, #tpu.memory_space<vmem>>, vector<16x162xf32>
    %286 = arith.truncf %285 : vector<16x162xf32> to vector<16x162xbf16>
    %287 = vector.extract_strided_slice %208 {offsets = [240, 0], sizes = [16, 16], strides = [1, 1]} : vector<256x16xbf16> to vector<16x16xbf16>
    %cst_135 = arith.constant dense<0.000000e+00> : vector<16x162xf32>
    %288 = tpu.matmul %287, %286, %cst_135 {dimension_numbers = #tpu.dot_dimension_numbers<[1], [0], [0], [1], [0, 0, 1, 1], [], []>} : vector<16x16xbf16>, vector<16x162xbf16>, vector<16x162xf32> -> vector<16x162xf32>
    %289 = arith.addf %284, %288 : vector<16x162xf32>
    %c0_136 = arith.constant 0 : index
    %c0_137 = arith.constant 0 : index
    %290 = vector.load %arg10[%c0_136, %c0_137] : memref<16x1xf32, #tpu.memory_space<vmem>>, vector<16x1xf32>
    %291 = vector.broadcast %290 : vector<16x1xf32> to vector<16x162xf32>
    %292 = arith.addf %289, %291 : vector<16x162xf32>
    %c0_138 = arith.constant 0 : index
    %c0_139 = arith.constant 0 : index
    %293 = vector.load %arg11[%c0_138, %c0_139] : memref<162x50xf32, #tpu.memory_space<vmem>>, vector<162x50xf32>
    %cst_140 = arith.constant dense<0.000000e+00> : vector<16x50xf32>
    %294 = tpu.matmul %292, %293, %cst_140 {dimension_numbers = #tpu.dot_dimension_numbers<[1], [0], [0], [1], [0, 0, 1, 1], [], []>} : vector<16x162xf32>, vector<162x50xf32>, vector<16x50xf32> -> vector<16x50xf32>
    %c0_141 = arith.constant 0 : index
    %c0_142 = arith.constant 0 : index
    %295 = vector.load %arg24[%c0_141, %c0_142] : memref<1x50xf32, #tpu.memory_space<vmem>>, vector<1x50xf32>
    %cst_143 = arith.constant 0.000000e+00 : f32
    %296 = vector.broadcast %cst_143 : f32 to vector<16x62xf32>
    %c0_144 = arith.constant 0 : index
    %c0_145 = arith.constant 0 : index
    %297 = vector.load %arg29[%c0_144, %c0_145] : memref<16x62xf32, #tpu.memory_space<vmem>>, vector<16x62xf32>
    tpu.vector_store %arg29[%c0_144, %c0_145], %296 {strides = array<i32>} : memref<16x62xf32, #tpu.memory_space<vmem>>, vector<16x62xf32>,
    %c0_146 = arith.constant 0 : index
    %c6 = arith.constant 6 : index
    %298 = vector.load %arg29[%c0_146, %c6] : memref<16x62xf32, #tpu.memory_space<vmem>>, vector<16x50xf32>
    tpu.vector_store %arg29[%c0_146, %c6], %294 {strides = array<i32>} : memref<16x62xf32, #tpu.memory_space<vmem>>, vector<16x50xf32>,
    %c0_147 = arith.constant 0 : index
    %c0_148 = arith.constant 0 : index
    %299 = vector.load %arg12[%c0_147, %c0_148] : memref<144x16xbf16, #tpu.memory_space<vmem>>, vector<144x16xbf16>
    %cst_149 = arith.constant 0.000000e+00 : f32
    %300 = vector.broadcast %cst_149 : f32 to vector<16x50xf32>
    %c0_150 = arith.constant 0 : index
    %c0_151 = arith.constant 0 : index
    %301 = vector.load %arg29[%c0_150, %c0_151] : memref<16x62xf32, #tpu.memory_space<vmem>>, vector<16x50xf32>
    %302 = arith.truncf %301 : vector<16x50xf32> to vector<16x50xbf16>
    %303 = vector.extract_strided_slice %299 {offsets = [0, 0], sizes = [16, 16], strides = [1, 1]} : vector<144x16xbf16> to vector<16x16xbf16>
    %cst_152 = arith.constant dense<0.000000e+00> : vector<16x50xf32>
    %304 = tpu.matmul %303, %302, %cst_152 {dimension_numbers = #tpu.dot_dimension_numbers<[1], [0], [0], [1], [0, 0, 1, 1], [], []>} : vector<16x16xbf16>, vector<16x50xbf16>, vector<16x50xf32> -> vector<16x50xf32>
    %305 = arith.addf %300, %304 : vector<16x50xf32>
    %c0_153 = arith.constant 0 : index
    %c1_154 = arith.constant 1 : index
    %306 = vector.load %arg29[%c0_153, %c1_154] : memref<16x62xf32, #tpu.memory_space<vmem>>, vector<16x50xf32>
    %307 = arith.truncf %306 : vector<16x50xf32> to vector<16x50xbf16>
    %308 = vector.extract_strided_slice %299 {offsets = [16, 0], sizes = [16, 16], strides = [1, 1]} : vector<144x16xbf16> to vector<16x16xbf16>
    %cst_155 = arith.constant dense<0.000000e+00> : vector<16x50xf32>
    %309 = tpu.matmul %308, %307, %cst_155 {dimension_numbers = #tpu.dot_dimension_numbers<[1], [0], [0], [1], [0, 0, 1, 1], [], []>} : vector<16x16xbf16>, vector<16x50xbf16>, vector<16x50xf32> -> vector<16x50xf32>
    %310 = arith.addf %305, %309 : vector<16x50xf32>
    %c0_156 = arith.constant 0 : index
    %c2_157 = arith.constant 2 : index
    %311 = vector.load %arg29[%c0_156, %c2_157] : memref<16x62xf32, #tpu.memory_space<vmem>>, vector<16x50xf32>
    %312 = arith.truncf %311 : vector<16x50xf32> to vector<16x50xbf16>
    %313 = vector.extract_strided_slice %299 {offsets = [32, 0], sizes = [16, 16], strides = [1, 1]} : vector<144x16xbf16> to vector<16x16xbf16>
    %cst_158 = arith.constant dense<0.000000e+00> : vector<16x50xf32>
    %314 = tpu.matmul %313, %312, %cst_158 {dimension_numbers = #tpu.dot_dimension_numbers<[1], [0], [0], [1], [0, 0, 1, 1], [], []>} : vector<16x16xbf16>, vector<16x50xbf16>, vector<16x50xf32> -> vector<16x50xf32>
    %315 = arith.addf %310, %314 : vector<16x50xf32>
    %c0_159 = arith.constant 0 : index
    %c5 = arith.constant 5 : index
    %316 = vector.load %arg29[%c0_159, %c5] : memref<16x62xf32, #tpu.memory_space<vmem>>, vector<16x50xf32>
    %317 = arith.truncf %316 : vector<16x50xf32> to vector<16x50xbf16>
    %318 = vector.extract_strided_slice %299 {offsets = [48, 0], sizes = [16, 16], strides = [1, 1]} : vector<144x16xbf16> to vector<16x16xbf16>
    %cst_160 = arith.constant dense<0.000000e+00> : vector<16x50xf32>
    %319 = tpu.matmul %318, %317, %cst_160 {dimension_numbers = #tpu.dot_dimension_numbers<[1], [0], [0], [1], [0, 0, 1, 1], [], []>} : vector<16x16xbf16>, vector<16x50xbf16>, vector<16x50xf32> -> vector<16x50xf32>
    %320 = arith.addf %315, %319 : vector<16x50xf32>
    %c0_161 = arith.constant 0 : index
    %c6_162 = arith.constant 6 : index
    %321 = vector.load %arg29[%c0_161, %c6_162] : memref<16x62xf32, #tpu.memory_space<vmem>>, vector<16x50xf32>
    %322 = arith.truncf %321 : vector<16x50xf32> to vector<16x50xbf16>
    %323 = vector.extract_strided_slice %299 {offsets = [64, 0], sizes = [16, 16], strides = [1, 1]} : vector<144x16xbf16> to vector<16x16xbf16>
    %cst_163 = arith.constant dense<0.000000e+00> : vector<16x50xf32>
    %324 = tpu.matmul %323, %322, %cst_163 {dimension_numbers = #tpu.dot_dimension_numbers<[1], [0], [0], [1], [0, 0, 1, 1], [], []>} : vector<16x16xbf16>, vector<16x50xbf16>, vector<16x50xf32> -> vector<16x50xf32>
    %325 = arith.addf %320, %324 : vector<16x50xf32>
    %c0_164 = arith.constant 0 : index
    %c7 = arith.constant 7 : index
    %326 = vector.load %arg29[%c0_164, %c7] : memref<16x62xf32, #tpu.memory_space<vmem>>, vector<16x50xf32>
    %327 = arith.truncf %326 : vector<16x50xf32> to vector<16x50xbf16>
    %328 = vector.extract_strided_slice %299 {offsets = [80, 0], sizes = [16, 16], strides = [1, 1]} : vector<144x16xbf16> to vector<16x16xbf16>
    %cst_165 = arith.constant dense<0.000000e+00> : vector<16x50xf32>
    %329 = tpu.matmul %328, %327, %cst_165 {dimension_numbers = #tpu.dot_dimension_numbers<[1], [0], [0], [1], [0, 0, 1, 1], [], []>} : vector<16x16xbf16>, vector<16x50xbf16>, vector<16x50xf32> -> vector<16x50xf32>
    %330 = arith.addf %325, %329 : vector<16x50xf32>
    %c0_166 = arith.constant 0 : index
    %c10_167 = arith.constant 10 : index
    %331 = vector.load %arg29[%c0_166, %c10_167] : memref<16x62xf32, #tpu.memory_space<vmem>>, vector<16x50xf32>
    %332 = arith.truncf %331 : vector<16x50xf32> to vector<16x50xbf16>
    %333 = vector.extract_strided_slice %299 {offsets = [96, 0], sizes = [16, 16], strides = [1, 1]} : vector<144x16xbf16> to vector<16x16xbf16>
    %cst_168 = arith.constant dense<0.000000e+00> : vector<16x50xf32>
    %334 = tpu.matmul %333, %332, %cst_168 {dimension_numbers = #tpu.dot_dimension_numbers<[1], [0], [0], [1], [0, 0, 1, 1], [], []>} : vector<16x16xbf16>, vector<16x50xbf16>, vector<16x50xf32> -> vector<16x50xf32>
    %335 = arith.addf %330, %334 : vector<16x50xf32>
    %c0_169 = arith.constant 0 : index
    %c11_170 = arith.constant 11 : index
    %336 = vector.load %arg29[%c0_169, %c11_170] : memref<16x62xf32, #tpu.memory_space<vmem>>, vector<16x50xf32>
    %337 = arith.truncf %336 : vector<16x50xf32> to vector<16x50xbf16>
    %338 = vector.extract_strided_slice %299 {offsets = [112, 0], sizes = [16, 16], strides = [1, 1]} : vector<144x16xbf16> to vector<16x16xbf16>
    %cst_171 = arith.constant dense<0.000000e+00> : vector<16x50xf32>
    %339 = tpu.matmul %338, %337, %cst_171 {dimension_numbers = #tpu.dot_dimension_numbers<[1], [0], [0], [1], [0, 0, 1, 1], [], []>} : vector<16x16xbf16>, vector<16x50xbf16>, vector<16x50xf32> -> vector<16x50xf32>
    %340 = arith.addf %335, %339 : vector<16x50xf32>
    %c0_172 = arith.constant 0 : index
    %c12_173 = arith.constant 12 : index
    %341 = vector.load %arg29[%c0_172, %c12_173] : memref<16x62xf32, #tpu.memory_space<vmem>>, vector<16x50xf32>
    %342 = arith.truncf %341 : vector<16x50xf32> to vector<16x50xbf16>
    %343 = vector.extract_strided_slice %299 {offsets = [128, 0], sizes = [16, 16], strides = [1, 1]} : vector<144x16xbf16> to vector<16x16xbf16>
    %cst_174 = arith.constant dense<0.000000e+00> : vector<16x50xf32>
    %344 = tpu.matmul %343, %342, %cst_174 {dimension_numbers = #tpu.dot_dimension_numbers<[1], [0], [0], [1], [0, 0, 1, 1], [], []>} : vector<16x16xbf16>, vector<16x50xbf16>, vector<16x50xf32> -> vector<16x50xf32>
    %345 = arith.addf %340, %344 : vector<16x50xf32>
    %c0_175 = arith.constant 0 : index
    %c0_176 = arith.constant 0 : index
    %346 = vector.load %arg13[%c0_175, %c0_176] : memref<16x1xf32, #tpu.memory_space<vmem>>, vector<16x1xf32>
    %c0_177 = arith.constant 0 : index
    %c0_178 = arith.constant 0 : index
    %347 = vector.load %arg14[%c0_177, %c0_178] : memref<16x1xf32, #tpu.memory_space<vmem>>, vector<16x1xf32>
    %348 = vector.broadcast %295 : vector<1x50xf32> to vector<16x50xf32>
    %349 = arith.mulf %345, %348 : vector<16x50xf32>
    %cst_179 = arith.constant dense<0.000000e+00> : vector<16xf32>
    %350 = vector.multi_reduction <add>, %349, %cst_179 [1] : vector<16x50xf32> to vector<16xf32>
    %351 = vector.shape_cast %350 : vector<16xf32> to vector<16x1xf32>
    %cst_180 = arith.constant 0.055555556 : f32
    %352 = vector.broadcast %cst_180 : f32 to vector<16x1xf32>
    %353 = arith.mulf %351, %352 : vector<16x1xf32>
    %354 = vector.broadcast %353 : vector<16x1xf32> to vector<16x50xf32>
    %355 = arith.subf %345, %354 : vector<16x50xf32>
    %356 = vector.broadcast %295 : vector<1x50xf32> to vector<16x50xf32>
    %357 = arith.mulf %355, %356 : vector<16x50xf32>
    %358 = arith.mulf %357, %357 : vector<16x50xf32>
    %cst_181 = arith.constant dense<0.000000e+00> : vector<16xf32>
    %359 = vector.multi_reduction <add>, %358, %cst_181 [1] : vector<16x50xf32> to vector<16xf32>
    %360 = vector.shape_cast %359 : vector<16xf32> to vector<16x1xf32>
    %cst_182 = arith.constant 0.055555556 : f32
    %361 = vector.broadcast %cst_182 : f32 to vector<16x1xf32>
    %362 = arith.mulf %360, %361 : vector<16x1xf32>
    %363 = vector.broadcast %353 : vector<16x1xf32> to vector<16x50xf32>
    %364 = arith.subf %345, %363 : vector<16x50xf32>
    %cst_183 = arith.constant 9.99999974E-6 : f32
    %365 = vector.broadcast %cst_183 : f32 to vector<16x1xf32>
    %366 = arith.addf %362, %365 : vector<16x1xf32>
    %367 = math.rsqrt %366 : vector<16x1xf32>
    %368 = arith.mulf %346, %367 : vector<16x1xf32>
    %369 = vector.broadcast %368 : vector<16x1xf32> to vector<16x50xf32>
    %370 = arith.mulf %364, %369 : vector<16x50xf32>
    %371 = vector.broadcast %347 : vector<16x1xf32> to vector<16x50xf32>
    %372 = arith.addf %370, %371 : vector<16x50xf32>
    %cst_184 = arith.constant 0.000000e+00 : f32
    %373 = vector.broadcast %cst_184 : f32 to vector<16x50xf32>
    %374 = arith.maximumf %372, %373 : vector<16x50xf32>
    %375 = vector.broadcast %295 : vector<1x50xf32> to vector<16x50xf32>
    %376 = arith.mulf %374, %375 : vector<16x50xf32>
    %cst_185 = arith.constant 0.000000e+00 : f32
    %377 = vector.broadcast %cst_185 : f32 to vector<16x62xf32>
    %c0_186 = arith.constant 0 : index
    %c0_187 = arith.constant 0 : index
    %378 = vector.load %arg29[%c0_186, %c0_187] : memref<16x62xf32, #tpu.memory_space<vmem>>, vector<16x62xf32>
    tpu.vector_store %arg29[%c0_186, %c0_187], %377 {strides = array<i32>} : memref<16x62xf32, #tpu.memory_space<vmem>>, vector<16x62xf32>,
    %c0_188 = arith.constant 0 : index
    %c6_189 = arith.constant 6 : index
    %379 = vector.load %arg29[%c0_188, %c6_189] : memref<16x62xf32, #tpu.memory_space<vmem>>, vector<16x50xf32>
    tpu.vector_store %arg29[%c0_188, %c6_189], %376 {strides = array<i32>} : memref<16x62xf32, #tpu.memory_space<vmem>>, vector<16x50xf32>,
    %c0_190 = arith.constant 0 : index
    %c0_191 = arith.constant 0 : index
    %380 = vector.load %arg15[%c0_190, %c0_191] : memref<144x16xbf16, #tpu.memory_space<vmem>>, vector<144x16xbf16>
    %cst_192 = arith.constant 0.000000e+00 : f32
    %381 = vector.broadcast %cst_192 : f32 to vector<16x50xf32>
    %c0_193 = arith.constant 0 : index
    %c0_194 = arith.constant 0 : index
    %382 = vector.load %arg29[%c0_193, %c0_194] : memref<16x62xf32, #tpu.memory_space<vmem>>, vector<16x50xf32>
    %383 = arith.truncf %382 : vector<16x50xf32> to vector<16x50xbf16>
    %384 = vector.extract_strided_slice %380 {offsets = [0, 0], sizes = [16, 16], strides = [1, 1]} : vector<144x16xbf16> to vector<16x16xbf16>
    %cst_195 = arith.constant dense<0.000000e+00> : vector<16x50xf32>
    %385 = tpu.matmul %384, %383, %cst_195 {dimension_numbers = #tpu.dot_dimension_numbers<[1], [0], [0], [1], [0, 0, 1, 1], [], []>} : vector<16x16xbf16>, vector<16x50xbf16>, vector<16x50xf32> -> vector<16x50xf32>
    %386 = arith.addf %381, %385 : vector<16x50xf32>
    %c0_196 = arith.constant 0 : index
    %c1_197 = arith.constant 1 : index
    %387 = vector.load %arg29[%c0_196, %c1_197] : memref<16x62xf32, #tpu.memory_space<vmem>>, vector<16x50xf32>
    %388 = arith.truncf %387 : vector<16x50xf32> to vector<16x50xbf16>
    %389 = vector.extract_strided_slice %380 {offsets = [16, 0], sizes = [16, 16], strides = [1, 1]} : vector<144x16xbf16> to vector<16x16xbf16>
    %cst_198 = arith.constant dense<0.000000e+00> : vector<16x50xf32>
    %390 = tpu.matmul %389, %388, %cst_198 {dimension_numbers = #tpu.dot_dimension_numbers<[1], [0], [0], [1], [0, 0, 1, 1], [], []>} : vector<16x16xbf16>, vector<16x50xbf16>, vector<16x50xf32> -> vector<16x50xf32>
    %391 = arith.addf %386, %390 : vector<16x50xf32>
    %c0_199 = arith.constant 0 : index
    %c2_200 = arith.constant 2 : index
    %392 = vector.load %arg29[%c0_199, %c2_200] : memref<16x62xf32, #tpu.memory_space<vmem>>, vector<16x50xf32>
    %393 = arith.truncf %392 : vector<16x50xf32> to vector<16x50xbf16>
    %394 = vector.extract_strided_slice %380 {offsets = [32, 0], sizes = [16, 16], strides = [1, 1]} : vector<144x16xbf16> to vector<16x16xbf16>
    %cst_201 = arith.constant dense<0.000000e+00> : vector<16x50xf32>
    %395 = tpu.matmul %394, %393, %cst_201 {dimension_numbers = #tpu.dot_dimension_numbers<[1], [0], [0], [1], [0, 0, 1, 1], [], []>} : vector<16x16xbf16>, vector<16x50xbf16>, vector<16x50xf32> -> vector<16x50xf32>
    %396 = arith.addf %391, %395 : vector<16x50xf32>
    %c0_202 = arith.constant 0 : index
    %c5_203 = arith.constant 5 : index
    %397 = vector.load %arg29[%c0_202, %c5_203] : memref<16x62xf32, #tpu.memory_space<vmem>>, vector<16x50xf32>
    %398 = arith.truncf %397 : vector<16x50xf32> to vector<16x50xbf16>
    %399 = vector.extract_strided_slice %380 {offsets = [48, 0], sizes = [16, 16], strides = [1, 1]} : vector<144x16xbf16> to vector<16x16xbf16>
    %cst_204 = arith.constant dense<0.000000e+00> : vector<16x50xf32>
    %400 = tpu.matmul %399, %398, %cst_204 {dimension_numbers = #tpu.dot_dimension_numbers<[1], [0], [0], [1], [0, 0, 1, 1], [], []>} : vector<16x16xbf16>, vector<16x50xbf16>, vector<16x50xf32> -> vector<16x50xf32>
    %401 = arith.addf %396, %400 : vector<16x50xf32>
    %c0_205 = arith.constant 0 : index
    %c6_206 = arith.constant 6 : index
    %402 = vector.load %arg29[%c0_205, %c6_206] : memref<16x62xf32, #tpu.memory_space<vmem>>, vector<16x50xf32>
    %403 = arith.truncf %402 : vector<16x50xf32> to vector<16x50xbf16>
    %404 = vector.extract_strided_slice %380 {offsets = [64, 0], sizes = [16, 16], strides = [1, 1]} : vector<144x16xbf16> to vector<16x16xbf16>
    %cst_207 = arith.constant dense<0.000000e+00> : vector<16x50xf32>
    %405 = tpu.matmul %404, %403, %cst_207 {dimension_numbers = #tpu.dot_dimension_numbers<[1], [0], [0], [1], [0, 0, 1, 1], [], []>} : vector<16x16xbf16>, vector<16x50xbf16>, vector<16x50xf32> -> vector<16x50xf32>
    %406 = arith.addf %401, %405 : vector<16x50xf32>
    %c0_208 = arith.constant 0 : index
    %c7_209 = arith.constant 7 : index
    %407 = vector.load %arg29[%c0_208, %c7_209] : memref<16x62xf32, #tpu.memory_space<vmem>>, vector<16x50xf32>
    %408 = arith.truncf %407 : vector<16x50xf32> to vector<16x50xbf16>
    %409 = vector.extract_strided_slice %380 {offsets = [80, 0], sizes = [16, 16], strides = [1, 1]} : vector<144x16xbf16> to vector<16x16xbf16>
    %cst_210 = arith.constant dense<0.000000e+00> : vector<16x50xf32>
    %410 = tpu.matmul %409, %408, %cst_210 {dimension_numbers = #tpu.dot_dimension_numbers<[1], [0], [0], [1], [0, 0, 1, 1], [], []>} : vector<16x16xbf16>, vector<16x50xbf16>, vector<16x50xf32> -> vector<16x50xf32>
    %411 = arith.addf %406, %410 : vector<16x50xf32>
    %c0_211 = arith.constant 0 : index
    %c10_212 = arith.constant 10 : index
    %412 = vector.load %arg29[%c0_211, %c10_212] : memref<16x62xf32, #tpu.memory_space<vmem>>, vector<16x50xf32>
    %413 = arith.truncf %412 : vector<16x50xf32> to vector<16x50xbf16>
    %414 = vector.extract_strided_slice %380 {offsets = [96, 0], sizes = [16, 16], strides = [1, 1]} : vector<144x16xbf16> to vector<16x16xbf16>
    %cst_213 = arith.constant dense<0.000000e+00> : vector<16x50xf32>
    %415 = tpu.matmul %414, %413, %cst_213 {dimension_numbers = #tpu.dot_dimension_numbers<[1], [0], [0], [1], [0, 0, 1, 1], [], []>} : vector<16x16xbf16>, vector<16x50xbf16>, vector<16x50xf32> -> vector<16x50xf32>
    %416 = arith.addf %411, %415 : vector<16x50xf32>
    %c0_214 = arith.constant 0 : index
    %c11_215 = arith.constant 11 : index
    %417 = vector.load %arg29[%c0_214, %c11_215] : memref<16x62xf32, #tpu.memory_space<vmem>>, vector<16x50xf32>
    %418 = arith.truncf %417 : vector<16x50xf32> to vector<16x50xbf16>
    %419 = vector.extract_strided_slice %380 {offsets = [112, 0], sizes = [16, 16], strides = [1, 1]} : vector<144x16xbf16> to vector<16x16xbf16>
    %cst_216 = arith.constant dense<0.000000e+00> : vector<16x50xf32>
    %420 = tpu.matmul %419, %418, %cst_216 {dimension_numbers = #tpu.dot_dimension_numbers<[1], [0], [0], [1], [0, 0, 1, 1], [], []>} : vector<16x16xbf16>, vector<16x50xbf16>, vector<16x50xf32> -> vector<16x50xf32>
    %421 = arith.addf %416, %420 : vector<16x50xf32>
    %c0_217 = arith.constant 0 : index
    %c12_218 = arith.constant 12 : index
    %422 = vector.load %arg29[%c0_217, %c12_218] : memref<16x62xf32, #tpu.memory_space<vmem>>, vector<16x50xf32>
    %423 = arith.truncf %422 : vector<16x50xf32> to vector<16x50xbf16>
    %424 = vector.extract_strided_slice %380 {offsets = [128, 0], sizes = [16, 16], strides = [1, 1]} : vector<144x16xbf16> to vector<16x16xbf16>
    %cst_219 = arith.constant dense<0.000000e+00> : vector<16x50xf32>
    %425 = tpu.matmul %424, %423, %cst_219 {dimension_numbers = #tpu.dot_dimension_numbers<[1], [0], [0], [1], [0, 0, 1, 1], [], []>} : vector<16x16xbf16>, vector<16x50xbf16>, vector<16x50xf32> -> vector<16x50xf32>
    %426 = arith.addf %421, %425 : vector<16x50xf32>
    %c0_220 = arith.constant 0 : index
    %c0_221 = arith.constant 0 : index
    %427 = vector.load %arg16[%c0_220, %c0_221] : memref<16x1xf32, #tpu.memory_space<vmem>>, vector<16x1xf32>
    %c0_222 = arith.constant 0 : index
    %c0_223 = arith.constant 0 : index
    %428 = vector.load %arg17[%c0_222, %c0_223] : memref<16x1xf32, #tpu.memory_space<vmem>>, vector<16x1xf32>
    %429 = vector.broadcast %295 : vector<1x50xf32> to vector<16x50xf32>
    %430 = arith.mulf %426, %429 : vector<16x50xf32>
    %cst_224 = arith.constant dense<0.000000e+00> : vector<16xf32>
    %431 = vector.multi_reduction <add>, %430, %cst_224 [1] : vector<16x50xf32> to vector<16xf32>
    %432 = vector.shape_cast %431 : vector<16xf32> to vector<16x1xf32>
    %cst_225 = arith.constant 0.055555556 : f32
    %433 = vector.broadcast %cst_225 : f32 to vector<16x1xf32>
    %434 = arith.mulf %432, %433 : vector<16x1xf32>
    %435 = vector.broadcast %434 : vector<16x1xf32> to vector<16x50xf32>
    %436 = arith.subf %426, %435 : vector<16x50xf32>
    %437 = vector.broadcast %295 : vector<1x50xf32> to vector<16x50xf32>
    %438 = arith.mulf %436, %437 : vector<16x50xf32>
    %439 = arith.mulf %438, %438 : vector<16x50xf32>
    %cst_226 = arith.constant dense<0.000000e+00> : vector<16xf32>
    %440 = vector.multi_reduction <add>, %439, %cst_226 [1] : vector<16x50xf32> to vector<16xf32>
    %441 = vector.shape_cast %440 : vector<16xf32> to vector<16x1xf32>
    %cst_227 = arith.constant 0.055555556 : f32
    %442 = vector.broadcast %cst_227 : f32 to vector<16x1xf32>
    %443 = arith.mulf %441, %442 : vector<16x1xf32>
    %444 = vector.broadcast %434 : vector<16x1xf32> to vector<16x50xf32>
    %445 = arith.subf %426, %444 : vector<16x50xf32>
    %cst_228 = arith.constant 9.99999974E-6 : f32
    %446 = vector.broadcast %cst_228 : f32 to vector<16x1xf32>
    %447 = arith.addf %443, %446 : vector<16x1xf32>
    %448 = math.rsqrt %447 : vector<16x1xf32>
    %449 = arith.mulf %427, %448 : vector<16x1xf32>
    %450 = vector.broadcast %449 : vector<16x1xf32> to vector<16x50xf32>
    %451 = arith.mulf %445, %450 : vector<16x50xf32>
    %452 = vector.broadcast %428 : vector<16x1xf32> to vector<16x50xf32>
    %453 = arith.addf %451, %452 : vector<16x50xf32>
    %cst_229 = arith.constant 1.000000e+00 : f32
    %454 = vector.broadcast %cst_229 : f32 to vector<16x50xf32>
    %455 = arith.mulf %454, %453 : vector<16x50xf32>
    %456 = arith.addf %455, %294 : vector<16x50xf32>
    %cst_230 = arith.constant 0.000000e+00 : f32
    %457 = vector.broadcast %cst_230 : f32 to vector<16x50xf32>
    %458 = arith.maximumf %456, %457 : vector<16x50xf32>
    %459 = vector.broadcast %295 : vector<1x50xf32> to vector<16x50xf32>
    %460 = arith.mulf %458, %459 : vector<16x50xf32>
    %c0_231 = arith.constant 0 : index
    %c0_232 = arith.constant 0 : index
    %461 = vector.load %arg18[%c0_231, %c0_232] : memref<16x1xf32, #tpu.memory_space<vmem>>, vector<16x1xf32>
    %c0_233 = arith.constant 0 : index
    %c0_234 = arith.constant 0 : index
    %462 = vector.load %arg19[%c0_233, %c0_234] : memref<16x1xf32, #tpu.memory_space<vmem>>, vector<16x1xf32>
    %463 = vector.broadcast %295 : vector<1x50xf32> to vector<16x50xf32>
    %464 = arith.mulf %460, %463 : vector<16x50xf32>
    %cst_235 = arith.constant dense<0.000000e+00> : vector<16xf32>
    %465 = vector.multi_reduction <add>, %464, %cst_235 [1] : vector<16x50xf32> to vector<16xf32>
    %466 = vector.shape_cast %465 : vector<16xf32> to vector<16x1xf32>
    %cst_236 = arith.constant 0.055555556 : f32
    %467 = vector.broadcast %cst_236 : f32 to vector<16x1xf32>
    %468 = arith.mulf %466, %467 : vector<16x1xf32>
    %469 = vector.broadcast %468 : vector<16x1xf32> to vector<16x50xf32>
    %470 = arith.subf %460, %469 : vector<16x50xf32>
    %471 = vector.broadcast %295 : vector<1x50xf32> to vector<16x50xf32>
    %472 = arith.mulf %470, %471 : vector<16x50xf32>
    %473 = arith.mulf %472, %472 : vector<16x50xf32>
    %cst_237 = arith.constant dense<0.000000e+00> : vector<16xf32>
    %474 = vector.multi_reduction <add>, %473, %cst_237 [1] : vector<16x50xf32> to vector<16xf32>
    %475 = vector.shape_cast %474 : vector<16xf32> to vector<16x1xf32>
    %cst_238 = arith.constant 0.055555556 : f32
    %476 = vector.broadcast %cst_238 : f32 to vector<16x1xf32>
    %477 = arith.mulf %475, %476 : vector<16x1xf32>
    %478 = vector.broadcast %468 : vector<16x1xf32> to vector<16x50xf32>
    %479 = arith.subf %460, %478 : vector<16x50xf32>
    %cst_239 = arith.constant 9.99999974E-6 : f32
    %480 = vector.broadcast %cst_239 : f32 to vector<16x1xf32>
    %481 = arith.addf %477, %480 : vector<16x1xf32>
    %482 = math.rsqrt %481 : vector<16x1xf32>
    %483 = arith.mulf %461, %482 : vector<16x1xf32>
    %484 = vector.broadcast %483 : vector<16x1xf32> to vector<16x50xf32>
    %485 = arith.mulf %479, %484 : vector<16x50xf32>
    %486 = vector.broadcast %462 : vector<16x1xf32> to vector<16x50xf32>
    %487 = arith.addf %485, %486 : vector<16x50xf32>
    %cst_240 = arith.constant 0.000000e+00 : f32
    %488 = vector.broadcast %cst_240 : f32 to vector<16x50xf32>
    %489 = arith.maximumf %487, %488 : vector<16x50xf32>
    %c0_241 = arith.constant 0 : index
    %c0_242 = arith.constant 0 : index
    %490 = vector.load %arg25[%c0_241, %c0_242] : memref<2x50xf32, #tpu.memory_space<vmem>>, vector<2x50xf32>
    %cst_243 = arith.constant dense<0.000000e+00> : vector<2x16xf32>
    %491 = tpu.matmul %490, %489, %cst_243 {dimension_numbers = #tpu.dot_dimension_numbers<[1], [1], [0], [0], [0, 0, 1, 0], [], []>} : vector<2x50xf32>, vector<16x50xf32>, vector<2x16xf32> -> vector<2x16xf32>
    %c0_244 = arith.constant 0 : index
    %c0_245 = arith.constant 0 : index
    %492 = vector.load %arg20[%c0_244, %c0_245] : memref<16x128xf32, #tpu.memory_space<vmem>>, vector<16x128xf32>
    %cst_246 = arith.constant dense<0.000000e+00> : vector<2x128xf32>
    %493 = tpu.matmul %491, %492, %cst_246 {dimension_numbers = #tpu.dot_dimension_numbers<[1], [0], [0], [1], [0, 0, 1, 1], [], []>} : vector<2x16xf32>, vector<16x128xf32>, vector<2x128xf32> -> vector<2x128xf32>
    %c0_247 = arith.constant 0 : index
    %c0_248 = arith.constant 0 : index
    %494 = vector.load %arg21[%c0_247, %c0_248] : memref<1x128xf32, #tpu.memory_space<vmem>>, vector<1x128xf32>
    %495 = vector.broadcast %494 : vector<1x128xf32> to vector<2x128xf32>
    %496 = arith.addf %493, %495 : vector<2x128xf32>
    %c0_249 = arith.constant 0 : index
    %c0_250 = arith.constant 0 : index
    %497 = vector.load %arg26[%c0_249, %c0_250] : memref<2x128xf32, #tpu.memory_space<vmem>>, vector<2x128xf32>
    tpu.vector_store %arg26[%c0_249, %c0_250], %496 {strides = array<i32>} : memref<2x128xf32, #tpu.memory_space<vmem>>, vector<2x128xf32>,
    return
  }
}

</mosaic_0001>

<bundles_post_ra>
// kernel: squeeze.1
= control target key start
LH: loop header
LB: loop body
LE: loop exit
PB: predicated region body
PF: predicated region fallthrough
CT: control target
= control target key end

     0   :  { %vm16_vm0 = vcmask 130048   ;;  %s61_s0 = inlined_call_operand.vmem [shape: f32[3,3,16], index: 0, kind: input, shape index: {}]   ;;  %s62_s1 = inlined_call_operand.vmem [shape: f32[9,16], index: 1, kind: output, shape index: {}]  }
   0x1   :  { %v29_v0 = vld [vmem:[%s61_s0 + $0x8] sm:$0xf]  ;;  %v30_v1 = vld [vmem:[%s61_s0 + $0x4] sm:$0xf]  ;;  %v13_v2 = vld [vmem:[%s61_s0] sm:$0xf] }
   0x2   :  { %8 = vst [vmem:[#allocation0 + $0x10] sm:$0xf] %v29_v0  ;;  %12 = vst [vmem:[#allocation0 + $0x8] sm:$0xf] %v30_v1 }
   0x3   :  { %14 = vst [vmem:[#allocation0] sm:$0xf] %v13_v2 }
   0x9   :  { %v19_v4 = vld [vmem:[#allocation0 + $0x8] sm:$0x7]   ;;  %v24_v5 = vld [vmem:[#allocation0 + $0x10] sm:$0x7]  }
   0xa   :  { %v15_v3 = vld [vmem:[#allocation0] sm:$0x7]   ;;  %31 = vst.msk [vmem:[%s62_s1 + $0x3] sm:$0x7] %vm16_vm0, %v19_v4   ;;  %32 = vst.msk [vmem:[%s62_s1 + $0x6] sm:$0x7] %vm16_vm0, %v24_v5  }
   0xb   :  { %17 = vst.msk [vmem:[%s62_s1] sm:$0x7] %vm16_vm0, %v15_v3  }

// kernel: mnist_forward.1
= control target key start
LH: loop header
LB: loop body
LE: loop exit
PB: predicated region body
PF: predicated region fallthrough
CT: control target
= control target key end

     0   :  { %s9921_s0 = inlined_call_operand.vmem [shape: f32[1,546], index: 0, kind: input, shape index: {}]   ;;  %s9922_s1 = inlined_call_operand.vmem [shape: f32[16,9], index: 1, kind: input, shape index: {}]   ;;  %s9923_s2 = inlined_call_operand.vmem [shape: f32[16,1], index: 2, kind: input, shape index: {}]   ;;  %s9924_s3 = inlined_call_operand.vmem [shape: f32[16,1], index: 3, kind: input, shape index: {}]   ;;  %s9925_s4 = inlined_call_operand.vmem [shape: f32[512,512], index: 4, kind: input, shape index: {}]   ;;  %s9926_s5 = inlined_call_operand.vmem [shape: bf16[256,16], index: 5, kind: input, shape index: {}]   ;;  %s9927_s6 = inlined_call_operand.vmem [shape: f32[16,1], index: 6, kind: input, shape index: {}]   ;;  %s9928_s7 = inlined_call_operand.vmem [shape: f32[16,1], index: 7, kind: input, shape index: {}]   ;;  %s9929_s8 = inlined_call_operand.hbm [shape: f32[512,162], index: 8, kind: input, shape index: {}]   ;;  %s9930_s9 = inlined_call_operand.vmem [shape: bf16[256,16], index: 9, kind: input, shape index: {}]   ;;  %s9931_s10 = inlined_call_operand.vmem [shape: f32[16,1], index: 10, kind: input, shape index: {}]   ;;  %s9932_s11 = inlined_call_operand.vmem [shape: f32[162,50], index: 11, kind: input, shape index: {}]   ;;  %s9933_s12 = inlined_call_operand.vmem [shape: bf16[144,16], index: 12, kind: input, shape index: {}]   ;;  %s9934_s13 = inlined_call_operand.vmem [shape: f32[16,1], index: 13, kind: input, shape index: {}]   ;;  %s9935_s14 = inlined_call_operand.vmem [shape: f32[16,1], index: 14, kind: input, shape index: {}]   ;;  %s9936_s15 = inlined_call_operand.vmem [shape: bf16[144,16], index: 15, kind: input, shape index: {}]   ;;  %s9937_s16 = inlined_call_operand.vmem [shape: f32[16,1], index: 16, kind: input, shape index: {}]   ;;  %s9938_s17 = inlined_call_operand.vmem [shape: f32[16,1], index: 17, kind: input, shape index: {}]   ;;  %s9939_s18 = inlined_call_operand.vmem [shape: f32[16,1], index: 18, kind: input, shape index: {}]   ;;  %s9940_s19 = inlined_call_operand.vmem [shape: f32[16,1], index: 19, kind: input, shape index: {}]   ;;  %s9941_s20 = inlined_call_operand.vmem [shape: f32[16,128], index: 20, kind: input, shape index: {}]   ;;  %s9942_s21 = inlined_call_operand.vmem [shape: f32[1,128], index: 21, kind: input, shape index: {}]   ;;  %s9943_s22 = inlined_call_operand.vmem [shape: f32[1,512], index: 22, kind: input, shape index: {}]   ;;  %s9944_s23 = inlined_call_operand.vmem [shape: f32[1,512], index: 23, kind: input, shape index: {}]   ;;  %s9945_s24 = inlined_call_operand.vmem [shape: f32[1,50], index: 24, kind: input, shape index: {}]   ;;  %s9946_s25 = inlined_call_operand.vmem [shape: f32[2,50], index: 25, kind: input, shape index: {}]   ;;  %s9947_s26 = inlined_call_operand.hbm [shape: f32[2,128], index: 26, kind: output, shape index: {}]  }
   0x1   :  { %9971 = sst [smem:[#allocation11_spill]] %s9921_s0 }
   0x2   :  { %9972 = sst [smem:[#allocation12_spill]] %s9922_s1 }
   0x3   :  { %9973 = sst [smem:[#allocation13_spill]] %s9923_s2 }
   0x4   :  { %9974 = sst [smem:[#allocation14_spill]] %s9924_s3 }
   0x5   :  { %9975 = sst [smem:[#allocation15_spill]] %s9925_s4 }
   0x6   :  { %9976 = sst [smem:[#allocation16_spill]] %s9926_s5 }
   0x7   :  { %9977 = sst [smem:[#allocation17_spill]] %s9927_s6 }
   0x8   :  { %9978 = sst [smem:[#allocation18_spill]] %s9928_s7 }
   0x9   :  { %9979 = sst [smem:[#allocation19_spill]] %s9929_s8 }
   0xa   :  { %9980 = sst [smem:[#allocation20_spill]] %s9930_s9 }
   0xb   :  { %9981 = sst [smem:[#allocation21_spill]] %s9931_s10 }
   0xc   :  { %31 = vsyncpa [#allocation6], 0 }
   0xd   :  { %32 = vsyncpa [#allocation7], 0  ;;  %s7548_s27 = smov [#allocation5]   ;;  %s9982_s8 = sld [smem:[#allocation19_spill]] }
   0xe   :  { %s54_s3 = sshll.u32 %s7548_s27, 4  ;;  %s55_s3 = int_to_ptr.vmem [resolvable:$true] %s54_s3 }
  0x13   :  { %s7500_s4 = scalar_lea.hbm %s9982_s8, 16384 }
  0x14   :  { %p7501_p0 = scmp.ne.s32.totalorder %s9982_s8, %s7500_s4  ;;  %p7504_p1 = scmp.lt.u32.totalorder %s7500_s4, %s9982_s8 }
  0x16   :  { %p7506_p2 = pnand %p7504_p1, %p7501_p0 }
  0x18   :  { %7509 = shalt.err (!%p7506_p2)
}
  0x19   :  { %s7510_s2 = scalar_lea.vmem %s55_s3, 16384  ;;  %p7515_p4 = scmp.lt.s32.totalorder %s55_s3, %s55_s3 }
  0x1a   :  { %p7511_p3 = scmp.ne.s32.totalorder %s55_s3, %s7510_s2  ;;  %p7516_p5 = scmp.lt.s32.totalorder %s7510_s2, %s7510_s2 }
  0x1c   :  { %p7517_p6 = por %p7516_p5, %p7515_p4 }
  0x1e   :  { %p7518_p7 = pnand %p7517_p6, %p7511_p3 }
  0x20   :  { %7521 = shalt.err (!%p7518_p7)
}
  0x21   :  { %s7549_s5 = smov 256   ;;  %s7550_s10 = smov 16  }
  0x22   :  { %60 = dma.hbm_to_vmem [thread:$0]  %s9982_s8, 16384, %s55_s3, [#allocation6], %s7549_s5, %s7549_s5, %s7550_s10  }
  0x23   :  { %7544 = dma.done.wait [#allocation6], 16384  }
  0x24   :  { %7545 = vsyncadd [#allocation6], 4294950912  ;;  %v7551_v0 = vmov 1   ;;  %v7552_v1 = vmov 3   ;;  %s9983_s28 = sld [smem:[#allocation12_spill]]  ;;  %v7553_v3 = vmov 2   ;;  %v113_v11 = vlaneseq }
  0x25   :  { %7413 = vset.pattern.permute.xlu0 %v7551_v0  ;;  %7415 = vset.pattern.permute.xlu1 %v7552_v1  ;;  %v7554_v4 = vmov 4   ;;  %v7555_v6 = vmov 5   ;;  %v7556_v7 = vmov 7   ;;  %v7557_v8 = vmov 6   ;;  %s9984_s0 = sld [smem:[#allocation11_spill]]  ;;  %s7560_s9 = smov 127  }
  0x26   :  { %v7558_v9 = vmov 8   ;;  %v7559_v10 = vmov 0   ;;  %v114_v12 = vshrl.u32 %v113_v11, 7  ;;  %s7561_s30 = smov 126   ;;  %s9969_s2 = smov 112   ;;  %vm224_vm0 = vcmask 1039360  }
  0x27   :  { %s9967_s5 = smov 111   ;;  %s9965_s10 = smov 110   ;;  %vm297_vm1 = vcmask 1031168   ;;  %vm370_vm2 = vcmask 916480   ;;  %vm443_vm3 = vcmask 908288   ;;  %vm516_vm4 = vcmask 900096  }
  0x28   :  { %v7748_v13 = vsub.s32 1, %v114_v12  ;;  %v7750_v14 = vsub.s32 0, %v114_v12  ;;  %v7761_v18 = vsub.s32 2, %v114_v12  ;;  %v7768_v23 = vsub.s32 3, %v114_v12  ;;  %s9963_s6 = smov 96   ;;  %s9961_s1 = smov 95  }
  0x29   :  { %v177_v32 = vsub.s32 4, %v114_v12  ;;  %s9959_s27 = smov 94   ;;  %vm589_vm5 = vcmask 785408   ;;  %vm662_vm6 = vcmask 777216   ;;  %vm735_vm7 = vcmask 769024   ;;  %s9985_s29 = sld [smem:[#allocation14_spill]] }
  0x2a   :  { %v99_v2 = vld [vmem:[%s9983_s28] sm:$0xff]  ;;  %v100_v5 = vld [vmem:[%s9983_s28 + $0x8] sm:$0xff]  ;;  %s9986_s28 = sld [smem:[#allocation15_spill]]  ;;  %vm1460_vm8 = vcmask 416768   ;;  %s9990_s7 = smov 110   ;;  %vm1551_vm9 = vcmask 130048  }
  0x2b   :  { %151 = vperm.xlu0 %7413, %v99_v2   ;;  %323 = vperm.xlu1 %7415, %v99_v2   ;;  %v149_v15 = vld [vmem:[%s9984_s0] sm:$0x1f]  ;;  %s9991_s4 = smov 96   ;;  %s9992_s3 = smov 95   ;;  %vm1871_vm10 = vcmask 1022976   ;;  %vm2355_vm11 = vcmask 891904  }
  0x2c   :  { %v7756_v16 = vrot.slane %v149_v15, %v7748_v13  ;;  %v7759_v17 = vrot.slane %v149_v15, %v7750_v14  ;;  %v7766_v22 = vrot.slane %v149_v15, %v7761_v18  ;;  %v7774_v27 = vrot.slane %v149_v15, %v7768_v23 }
  0x2d   :  { %v7787_v34 = vrot.slane %v149_v15, %v177_v32  ;;  %vm2839_vm12 = vcmask 760832   ;;  %vm2960_vm13 = vcmask 654336   ;;  %vm3081_vm14 = vcmask 646144  }
  0x2e   :  { %vm3202_vm15 = vcmask 637952  }
  0x2f   :  { %7414 = vset.pattern.permute.xlu0 %v7553_v3  ;;  %7416 = vset.pattern.permute.xlu1 %v7554_v4 }
  0x30   :  { %250 = vperm.xlu0 %7414, %v99_v2   ;;  %396 = vperm.xlu1 %7416, %v99_v2  }
  0x34   :  { %7417 = vset.pattern.permute.xlu1 %v7555_v6  ;;  %7422 = vset.pattern.permute.xlu0 %v7552_v1 }
  0x35   :  { %469 = vperm.xlu1 %7417, %v99_v2   ;;  %327 = vperm.xlu0 %7422, %v100_v5  }
  0x39   :  { %7424 = vset.pattern.permute.xlu0 %v7555_v6  ;;  %7418 = vset.pattern.permute.xlu1 %v7556_v7 }
  0x3a   :  { %473 = vperm.xlu0 %7424, %v100_v5   ;;  %615 = vperm.xlu1 %7418, %v99_v2  }
  0x3e   :  { %7425 = vset.pattern.permute.xlu0 %v7557_v8  ;;  %7419 = vset.pattern.permute.xlu1 %v7558_v9 }
  0x3f   :  { %542 = vperm.xlu0 %7425, %v99_v2   ;;  %688 = vperm.xlu1 %7419, %v99_v2  }
  0x43   :  { %546 = vperm.xlu0 %7425, %v100_v5   ;;  %7420 = vset.pattern.permute.xlu1 %v7551_v0 }
  0x44   :  { %155 = vperm.xlu1 %7420, %v100_v5  }
  0x47   :  { %7426 = vset.pattern.permute.xlu0 %v7559_v10 }
  0x48   :  { %7421 = vset.pattern.permute.xlu1 %v7553_v3  ;;  %104 = vperm.xlu0 %7426, %v99_v2  }
  0x49   :  { %254 = vperm.xlu1 %7421, %v100_v5  }
  0x4d   :  { %7423 = vset.pattern.permute.xlu1 %v7554_v4 }
  0x4e   :  { %400 = vperm.xlu1 %7423, %v100_v5  }
  0x52   :  { %7427 = vset.pattern.permute.xlu1 %v7556_v7 }
  0x53   :  { %619 = vperm.xlu1 %7427, %v100_v5  }
  0x57   :  { %7428 = vset.pattern.permute.xlu1 %v7558_v9 }
  0x58   :  { %692 = vperm.xlu1 %7428, %v100_v5  }
  0x5c   :  { %7429 = vset.pattern.permute.xlu1 %v7559_v10 }
  0x5d   :  { %109 = vperm.xlu1 %7429, %v100_v5  }
  0xaa   :  { %v152_v19 = vpop.permute.xlu0 %151  ;;  %v324_v26 = vpop.permute.xlu1 %323 }
  0xab   :  { %v185_v20 = vmul.f32 %v7756_v16, %v152_v19  ;;  %v184_v21 = vmul.f32 %v7759_v17, %v152_v19  ;;  %v186_v25 = vmul.f32 %v7766_v22, %v152_v19  ;;  %v330_v29 = vmul.f32 %v324_v26, %v7759_v17 }
  0xac   :  { %v187_v30 = vmul.f32 %v7774_v27, %v152_v19  ;;  %v332_v31 = vmul.f32 %v324_v26, %v7766_v22  ;;  %v188_v39 = vmul.f32 %v7787_v34, %v152_v19  ;;  %v331_v42 = vmul.f32 %v324_v26, %v7756_v16 }
  0xad   :  { %206 = vrot.lane.b32.xlu0 %v185_v20, %s7560_s9  ;;  %204 = vrot.lane.b32.xlu1 %v184_v21, %s7560_s9  ;;  %v334_v45 = vmul.f32 %v324_v26, %v7787_v34  ;;  %v333_v47 = vmul.f32 %v324_v26, %v7774_v27 }
  0xaf   :  { %v251_v24 = vpop.permute.xlu0 %250  ;;  %v397_v36 = vpop.permute.xlu1 %396 }
  0xb0   :  { %v258_v28 = vmul.f32 %v251_v24, %v7756_v16  ;;  %v257_v33 = vmul.f32 %v251_v24, %v7759_v17  ;;  %v259_v35 = vmul.f32 %v251_v24, %v7766_v22  ;;  %v261_v37 = vmul.f32 %v251_v24, %v7787_v34 }
  0xb1   :  { %208 = vrot.lane.b32.xlu1 %v186_v25, %s7560_s9  ;;  %v403_v38 = vmul.f32 %v397_v36, %v7759_v17  ;;  %v405_v40 = vmul.f32 %v397_v36, %v7766_v22  ;;  %v260_v41 = vmul.f32 %v251_v24, %v7774_v27  ;;  %v404_v50 = vmul.f32 %v397_v36, %v7756_v16 }
  0xb2   :  { %279 = vrot.lane.b32.xlu0 %v258_v28, %s7561_s30  ;;  %v406_v51 = vmul.f32 %v397_v36, %v7774_v27  ;;  %v407_v56 = vmul.f32 %v397_v36, %v7787_v34 }
  0xb4   :  { %v470_v43 = vpop.permute.xlu1 %469  ;;  %v7802_v44 = vpop.permute.xlu0 %327 }
  0xb5   :  { %210 = vrot.lane.b32.xlu1 %v187_v30, %s7560_s9  ;;  %v476_v46 = vmul.f32 %v470_v43, %v7759_v17  ;;  %v478_v49 = vmul.f32 %v470_v43, %v7766_v22  ;;  %v479_v53 = vmul.f32 %v470_v43, %v7774_v27  ;;  %v477_v55 = vmul.f32 %v470_v43, %v7756_v16 }
  0xb6   :  { %350 = vrot.lane.b32.xlu0 %v330_v29, %s9969_s2  ;;  %v480_v58 = vmul.f32 %v470_v43, %v7787_v34  ;;  %v337_v36 = vmul.f32 %v7802_v44, %v7766_v22 }
  0xb9   :  { %277 = vrot.lane.b32.xlu1 %v257_v33, %s7561_s30  ;;  %v7810_v48 = vpop.permute.xlu0 %473  ;;  %v616_v57 = vpop.permute.xlu1 %615  ;;  %v335_v33 = vmul.f32 %v7802_v44, %v7759_v17 }
  0xba   :  { %354 = vrot.lane.b32.xlu0 %v332_v31, %s9969_s2  ;;  %v622_v59 = vmul.f32 %v616_v57, %v7759_v17  ;;  %v624_v61 = vmul.f32 %v616_v57, %v7766_v22  ;;  %v625_v1 = vmul.f32 %v616_v57, %v7774_v27  ;;  %v623_v3 = vmul.f32 %v616_v57, %v7756_v16 }
  0xbb   :  { %v626_v5 = vmul.f32 %v616_v57, %v7787_v34  ;;  %v336_v31 = vmul.f32 %v7802_v44, %v7756_v16 }
  0xbd   :  { %281 = vrot.lane.b32.xlu1 %v259_v35, %s7561_s30 }
  0xbe   :  { %285 = vrot.lane.b32.xlu0 %v261_v37, %s7561_s30  ;;  %v543_v52 = vpop.permute.xlu0 %542  ;;  %v689_v0 = vpop.permute.xlu1 %688 }
  0xbf   :  { %v550_v54 = vmul.f32 %v543_v52, %v7756_v16  ;;  %v549_v60 = vmul.f32 %v543_v52, %v7759_v17  ;;  %v551_v62 = vmul.f32 %v543_v52, %v7766_v22  ;;  %v552_v63 = vmul.f32 %v543_v52, %v7774_v27 }
  0xc0   :  { %v696_v2 = vmul.f32 %v689_v0, %v7756_v16  ;;  %v553_v4 = vmul.f32 %v543_v52, %v7787_v34  ;;  %v695_v6 = vmul.f32 %v689_v0, %v7759_v17  ;;  %v699_v8 = vmul.f32 %v689_v0, %v7787_v34 }
  0xc1   :  { %212 = vrot.lane.b32.xlu1 %v188_v39, %s7560_s9  ;;  %v697_v11 = vmul.f32 %v689_v0, %v7766_v22  ;;  %v698_v15 = vmul.f32 %v689_v0, %v7774_v27 }
  0xc2   :  { %423 = vrot.lane.b32.xlu0 %v403_v38, %s9967_s5  ;;  %v547_v39 = vpop.permute.xlu0 %546 }
  0xc3   :  { %v156_v7 = vpop.permute.xlu1 %155  ;;  %v555_v0 = vmul.f32 %v547_v39, %v7756_v16 }
  0xc4   :  { %v189_v9 = vmul.f32 %v7759_v17, %v156_v7  ;;  %v191_v12 = vmul.f32 %v7766_v22, %v156_v7  ;;  %v190_v21 = vmul.f32 %v7756_v16, %v156_v7  ;;  %v192_v25 = vmul.f32 %v7774_v27, %v156_v7 }
  0xc5   :  { %283 = vrot.lane.b32.xlu1 %v260_v41, %s7561_s30  ;;  %v193_v30 = vmul.f32 %v7787_v34, %v156_v7 }
  0xc6   :  { %427 = vrot.lane.b32.xlu0 %v405_v40, %s9967_s5  ;;  %v338_v40 = vmul.f32 %v7802_v44, %v7774_v27 }
  0xc7   :  { %v7898_v43 = vpop.permute.xlu0 %104 }
  0xc8   :  { %v255_v19 = vpop.permute.xlu1 %254 }
  0xc9   :  { %352 = vrot.lane.b32.xlu1 %v331_v42, %s9969_s2  ;;  %v262_v20 = vmul.f32 %v255_v19, %v7759_v17  ;;  %v264_v24 = vmul.f32 %v255_v19, %v7766_v22  ;;  %v263_v26 = vmul.f32 %v255_v19, %v7756_v16  ;;  %v265_v29 = vmul.f32 %v255_v19, %v7774_v27 }
  0xca   :  { %358 = vrot.lane.b32.xlu0 %v334_v45, %s9969_s2  ;;  %v266_v35 = vmul.f32 %v255_v19, %v7787_v34 }
  0xcd   :  { %356 = vrot.lane.b32.xlu1 %v333_v47, %s9969_s2  ;;  %v401_v28 = vpop.permute.xlu1 %400 }
  0xce   :  { %496 = vrot.lane.b32.xlu0 %v476_v46, %s9965_s10  ;;  %v408_v38 = vmul.f32 %v401_v28, %v7759_v17  ;;  %v410_v41 = vmul.f32 %v401_v28, %v7766_v22  ;;  %v409_v45 = vmul.f32 %v401_v28, %v7756_v16  ;;  %v411_v46 = vmul.f32 %v401_v28, %v7774_v27 }
  0xd1   :  { %425 = vrot.lane.b32.xlu1 %v404_v50, %s9967_s5  ;;  %v339_v50 = vmul.f32 %v7802_v44, %v7787_v34 }
  0xd2   :  { %500 = vrot.lane.b32.xlu0 %v478_v49, %s9965_s10  ;;  %v7877_v32 = vpop.permute.xlu1 %619 }
  0xd5   :  { %429 = vrot.lane.b32.xlu1 %v406_v51, %s9967_s5  ;;  %v482_v51 = vmul.f32 %v7810_v48, %v7756_v16 }
  0xd6   :  { %502 = vrot.lane.b32.xlu0 %v479_v53, %s9965_s10  ;;  %v481_v53 = vmul.f32 %v7810_v48, %v7759_v17 }
  0xd7   :  { %v7887_v37 = vpop.permute.xlu1 %692 }
  0xd8   :  { %v700_v19 = vmul.f32 %v7887_v37, %v7759_v17 }
  0xd9   :  { %498 = vrot.lane.b32.xlu1 %v477_v55, %s9965_s10  ;;  %v412_v55 = vmul.f32 %v401_v28, %v7787_v34 }
  0xda   :  { %571 = vrot.lane.b32.xlu0 %v550_v54, %s9963_s6 }
  0xdc   :  { %v7896_v42 = vpop.permute.xlu1 %109 }
  0xdd   :  { %431 = vrot.lane.b32.xlu1 %v407_v56, %s9967_s5  ;;  %v483_v56 = vmul.f32 %v7810_v48, %v7766_v22 }
  0xde   :  { %504 = vrot.lane.b32.xlu0 %v480_v58, %s9965_s10  ;;  %v554_v58 = vmul.f32 %v547_v39, %v7759_v17 }
  0xe1   :  { %569 = vrot.lane.b32.xlu1 %v549_v60, %s9963_s6  ;;  %v484_v60 = vmul.f32 %v7810_v48, %v7774_v27 }
  0xe2   :  { %642 = vrot.lane.b32.xlu0 %v622_v59, %s9961_s1 }
  0xe5   :  { %573 = vrot.lane.b32.xlu1 %v551_v62, %s9963_s6  ;;  %v556_v62 = vmul.f32 %v547_v39, %v7766_v22 }
  0xe6   :  { %646 = vrot.lane.b32.xlu0 %v624_v61, %s9961_s1 }
  0xe9   :  { %575 = vrot.lane.b32.xlu1 %v552_v63, %s9963_s6 }
  0xea   :  { %648 = vrot.lane.b32.xlu0 %v625_v1, %s9961_s1 }
  0xed   :  { %644 = vrot.lane.b32.xlu1 %v623_v3, %s9961_s1 }
  0xee   :  { %717 = vrot.lane.b32.xlu0 %v696_v2, %s9959_s27  ;;  %v557_v2 = vmul.f32 %v547_v39, %v7774_v27 }
  0xf1   :  { %577 = vrot.lane.b32.xlu1 %v553_v4, %s9963_s6  ;;  %v485_v4 = vmul.f32 %v7810_v48, %v7787_v34 }
  0xf2   :  { %650 = vrot.lane.b32.xlu0 %v626_v5, %s9961_s1 }
  0xf5   :  { %715 = vrot.lane.b32.xlu1 %v695_v6, %s9959_s27  ;;  %v628_v6 = vmul.f32 %v7877_v32, %v7756_v16 }
  0xf6   :  { %723 = vrot.lane.b32.xlu0 %v699_v8, %s9959_s27  ;;  %v627_v8 = vmul.f32 %v7877_v32, %v7759_v17  ;;  %v701_v17 = vmul.f32 %v7887_v37, %v7756_v16  ;;  %v704_v16 = vmul.f32 %v7887_v37, %v7787_v34 }
  0xf9   :  { %719 = vrot.lane.b32.xlu1 %v697_v11, %s9959_s27  ;;  %v558_v11 = vmul.f32 %v547_v39, %v7787_v34 }
  0xfa   :  { %214 = vrot.lane.b32.xlu0 %v189_v9, %s7560_s9 }
  0xfd   :  { %721 = vrot.lane.b32.xlu1 %v698_v15, %s9959_s27 }
  0xfe   :  { %218 = vrot.lane.b32.xlu0 %v191_v12, %s7560_s9  ;;  %v629_v12 = vmul.f32 %v7877_v32, %v7766_v22 }
 0x101   :  { %216 = vrot.lane.b32.xlu1 %v190_v21, %s7560_s9  ;;  %v630_v21 = vmul.f32 %v7877_v32, %v7774_v27 }
 0x102   :  { %287 = vrot.lane.b32.xlu0 %v262_v20, %s7561_s30 }
 0x105   :  { %220 = vrot.lane.b32.xlu1 %v192_v25, %s7560_s9  ;;  %v702_v25 = vmul.f32 %v7887_v37, %v7766_v22  ;;  %v631_v22 = vmul.f32 %v7877_v32, %v7787_v34  ;;  %v101_v32 = vld [vmem:[%s9984_s0] sm:$0xf]  ;;  %s9988_s0 = smov 112  }
 0x106   :  { %291 = vrot.lane.b32.xlu0 %v264_v24, %s7561_s30  ;;  %v8016_v34 = vrot.slane %v101_v32, %v7748_v13 }
 0x109   :  { %289 = vrot.lane.b32.xlu1 %v263_v26, %s7561_s30 }
 0x10a   :  { %293 = vrot.lane.b32.xlu0 %v265_v29, %s7561_s30  ;;  %v703_v29 = vmul.f32 %v7887_v37, %v7774_v27  ;;  %v8019_v37 = vrot.slane %v101_v32, %v7761_v18 }
 0x10d   :  { %222 = vrot.lane.b32.xlu1 %v193_v30, %s7560_s9 }
 0x10e   :  { %362 = vrot.lane.b32.xlu0 %v336_v31, %s9969_s2 }
 0x111   :  { %360 = vrot.lane.b32.xlu1 %v335_v33, %s9969_s2 }
 0x112   :  { %295 = vrot.lane.b32.xlu0 %v266_v35, %s7561_s30 }
 0x115   :  { %364 = vrot.lane.b32.xlu1 %v337_v36, %s9969_s2 }
 0x116   :  { %433 = vrot.lane.b32.xlu0 %v408_v38, %s9967_s5 }
 0x119   :  { %366 = vrot.lane.b32.xlu1 %v338_v40, %s9969_s2 }
 0x11a   :  { %437 = vrot.lane.b32.xlu0 %v410_v41, %s9967_s5 }
 0x11d   :  { %435 = vrot.lane.b32.xlu1 %v409_v45, %s9967_s5  ;;  %v8013_v45 = vrot.slane %v101_v32, %v7750_v14 }
 0x11e   :  { %439 = vrot.lane.b32.xlu0 %v411_v46, %s9967_s5  ;;  %v8022_v46 = vrot.slane %v101_v32, %v7768_v23 }
 0x11f   :  { %v7905_v47 = vpop.permute.xlu1 %204  ;;  %v7907_v49 = vpop.permute.xlu0 %206 }
 0x121   :  { %368 = vrot.lane.b32.xlu1 %v339_v50, %s9969_s2  ;;  %v133_v50 = vmul.f32 %v8013_v45, %v7898_v43  ;;  %s9987_s2 = sld [smem:[#allocation13_spill]] }
 0x122   :  { %508 = vrot.lane.b32.xlu0 %v482_v51, %s9965_s10  ;;  %v134_v51 = vmul.f32 %v8016_v34, %v7898_v43 }
 0x123   :  { %v7915_v52 = vpop.permute.xlu1 %208 }
 0x124   :  { %v7919_v54 = vpop.permute.xlu0 %279 }
 0x125   :  { %506 = vrot.lane.b32.xlu1 %v481_v53, %s9965_s10 }
 0x126   :  { %441 = vrot.lane.b32.xlu0 %v412_v55, %s9967_s5  ;;  %v225_v55 = vsel %vm224_vm0, %v7905_v47, %v7907_v49 }
 0x127   :  { %v7924_v44 = vpop.permute.xlu1 %210 }
 0x128   :  { %v7928_v57 = vpop.permute.xlu0 %350 }
 0x129   :  { %510 = vrot.lane.b32.xlu1 %v483_v56, %s9965_s10  ;;  %v226_v56 = vsel %vm224_vm0, %v7907_v49, %v7915_v52 }
 0x12a   :  { %579 = vrot.lane.b32.xlu0 %v554_v58, %s9963_s6  ;;  %v227_v58 = vsel %vm224_vm0, %v7915_v52, %v7924_v44 }
 0x12b   :  { %v7933_v59 = vpop.permute.xlu1 %277 }
 0x12c   :  { %v7937_v61 = vpop.permute.xlu0 %354  ;;  %v298_v47 = vsel %vm297_vm1, %v7933_v59, %v7919_v54 }
 0x12d   :  { %512 = vrot.lane.b32.xlu1 %v484_v60, %s9965_s10 }
 0x12e   :  { %583 = vrot.lane.b32.xlu0 %v556_v62, %s9963_s6 }
 0x12f   :  { %v7942_v63 = vpop.permute.xlu1 %281 }
 0x130   :  { %v7945_v1 = vpop.permute.xlu0 %285  ;;  %v299_v49 = vsel %vm297_vm1, %v7919_v54, %v7942_v63 }
 0x131   :  { %581 = vrot.lane.b32.xlu1 %v555_v0, %s9963_s6  ;;  %v135_v0 = vmul.f32 %v8019_v37, %v7898_v43 }
 0x132   :  { %585 = vrot.lane.b32.xlu0 %v557_v2, %s9963_s6  ;;  %v136_v2 = vmul.f32 %v8022_v46, %v7898_v43  ;;  %v242_v43 = vadd.f32 %v226_v56, %v134_v51 }
 0x133   :  { %v213_v3 = vpop.permute.xlu1 %212 }
 0x134   :  { %v7952_v5 = vpop.permute.xlu0 %423  ;;  %v228_v60 = vsel %vm224_vm0, %v7924_v44, %v213_v3  ;;  %v241_v3 = vadd.f32 %v225_v55, %v133_v50 }
 0x135   :  { %514 = vrot.lane.b32.xlu1 %v485_v4, %s9965_s10  ;;  %v243_v4 = vadd.f32 %v227_v58, %v135_v0  ;;  %s7572_s10 = smov 80  }
 0x136   :  { %654 = vrot.lane.b32.xlu0 %v628_v6, %s9961_s1  ;;  %v244_v6 = vadd.f32 %v228_v60, %v136_v2 }
 0x137   :  { %v7958_v7 = vpop.permute.xlu1 %283 }
 0x138   :  { %v7962_v9 = vpop.permute.xlu0 %427  ;;  %v300_v52 = vsel %vm297_vm1, %v7942_v63, %v7958_v7  ;;  %v301_v44 = vsel %vm297_vm1, %v7958_v7, %v7945_v1  ;;  %v314_v7 = vadd.f32 %v298_v47, %v241_v3 }
 0x139   :  { %652 = vrot.lane.b32.xlu1 %v627_v8, %s9961_s1 }
 0x13a   :  { %587 = vrot.lane.b32.xlu0 %v558_v11, %s9963_s6  ;;  %s7573_s6 = smov 79  }
 0x13b   :  { %v7967_v48 = vpop.permute.xlu1 %352 }
 0x13c   :  { %v7971_v15 = vpop.permute.xlu0 %358  ;;  %v371_v59 = vsel %vm370_vm2, %v7928_v57, %v7967_v48  ;;  %v372_v54 = vsel %vm370_vm2, %v7967_v48, %v7937_v61 }
 0x13d   :  { %656 = vrot.lane.b32.xlu1 %v629_v12, %s9961_s1  ;;  %v315_v12 = vadd.f32 %v299_v49, %v242_v43  ;;  %v764_v49 = vld [vmem:[%s9943_s22] sm:$0xf]  ;;  %s7574_s22 = smov 78  }
 0x13e   :  { %725 = vrot.lane.b32.xlu0 %v700_v19, %s9959_s27  ;;  %v316_v19 = vadd.f32 %v300_v52, %v243_v4 }
 0x13f   :  { %v357_v20 = vpop.permute.xlu1 %356 }
 0x140   :  { %v7979_v24 = vpop.permute.xlu0 %496  ;;  %v373_v63 = vsel %vm370_vm2, %v7937_v61, %v357_v20  ;;  %v374_v11 = vsel %vm370_vm2, %v357_v20, %v7971_v15  ;;  %v387_v61 = vadd.f32 %v371_v59, %v314_v7 }
 0x141   :  { %658 = vrot.lane.b32.xlu1 %v630_v21, %s9961_s1  ;;  %v317_v21 = vadd.f32 %v301_v44, %v244_v6 }
 0x142   :  { %729 = vrot.lane.b32.xlu0 %v702_v25, %s9959_s27 }
 0x143   :  { %v426_v26 = vpop.permute.xlu1 %425  ;;  %v390_v15 = vadd.f32 %v374_v11, %v317_v21 }
 0x144   :  { %v7987_v28 = vpop.permute.xlu0 %500  ;;  %v444_v25 = vsel %vm443_vm3, %v7952_v5, %v426_v26  ;;  %v445_v57 = vsel %vm443_vm3, %v426_v26, %v7962_v9 }
 0x145   :  { %727 = vrot.lane.b32.xlu1 %v701_v17, %s9959_s27  ;;  %v460_v50 = vadd.f32 %v444_v25, %v387_v61  ;;  %v8129_v61 = vrot.slane %v764_v49, %v7768_v23 }
 0x146   :  { %731 = vrot.lane.b32.xlu0 %v703_v29, %s9959_s27  ;;  %v388_v29 = vadd.f32 %v372_v54, %v315_v12  ;;  %v8109_v54 = vrot.slane %v764_v49, %v7750_v14 }
 0x147   :  { %v430_v30 = vpop.permute.xlu1 %429 }
 0x148   :  { %v7995_v31 = vpop.permute.xlu0 %502  ;;  %v446_v48 = vsel %vm443_vm3, %v7962_v9, %v430_v30  ;;  %v461_v51 = vadd.f32 %v445_v57, %v388_v29 }
 0x149   :  { %660 = vrot.lane.b32.xlu1 %v631_v22, %s9961_s1  ;;  %v389_v22 = vadd.f32 %v373_v63, %v316_v19  ;;  %v519_v9 = vsel %vm516_vm4, %v7987_v28, %v7995_v31  ;;  %s9993_s1 = smov 94  }
 0x14b   :  { %v499_v33 = vpop.permute.xlu1 %498  ;;  %v462_v26 = vadd.f32 %v446_v48, %v389_v22 }
 0x14c   :  { %v8000_v35 = vpop.permute.xlu0 %571  ;;  %v518_v32 = vsel %vm516_vm4, %v499_v33, %v7987_v28 }
 0x14d   :  { %733 = vrot.lane.b32.xlu1 %v704_v16, %s9959_s27  ;;  %v517_v16 = vsel %vm516_vm4, %v7979_v24, %v499_v33  ;;  %v534_v56 = vadd.f32 %v518_v32, %v461_v51  ;;  %v535_v0 = vadd.f32 %v519_v9, %v462_v26  ;;  %s7571_s27 = smov 93  }
 0x14e   :  { %v533_v33 = vadd.f32 %v517_v16, %v460_v50 }
 0x14f   :  { %v432_v27 = vpop.permute.xlu1 %431 }
 0x150   :  { %v505_v36 = vpop.permute.xlu0 %504  ;;  %v447_v17 = vsel %vm443_vm3, %v430_v30, %v432_v27 }
 0x151   :  { %v463_v55 = vadd.f32 %v447_v17, %v390_v15  ;;  %v520_v30 = vsel %vm516_vm4, %v7995_v31, %v505_v36 }
 0x153   :  { %v570_v38 = vpop.permute.xlu1 %569  ;;  %v536_v2 = vadd.f32 %v520_v30, %v463_v55 }
 0x154   :  { %v8003_v39 = vpop.permute.xlu0 %642  ;;  %v590_v27 = vsel %vm589_vm5, %v570_v38, %v8000_v35 }
 0x157   :  { %v8008_v40 = vpop.permute.xlu1 %573 }
 0x158   :  { %v8010_v41 = vpop.permute.xlu0 %646  ;;  %v591_v24 = vsel %vm589_vm5, %v8000_v35, %v8008_v40  ;;  %v606_v35 = vadd.f32 %v590_v27, %v533_v33 }
 0x159   :  { %v607_v47 = vadd.f32 %v591_v24, %v534_v56 }
 0x15b   :  { %v576_v53 = vpop.permute.xlu1 %575 }
 0x15c   :  { %v8039_v62 = vpop.permute.xlu0 %648  ;;  %v592_v60 = vsel %vm589_vm5, %v8008_v40, %v576_v53  ;;  %v8100_v40 = vrot.slane %v764_v49, %v7748_v13 }
 0x15f   :  { %v645_v8 = vpop.permute.xlu1 %644 }
 0x160   :  { %v718_v1 = vpop.permute.xlu0 %717  ;;  %v663_v28 = vsel %vm662_vm6, %v8003_v39, %v645_v8  ;;  %v664_v31 = vsel %vm662_vm6, %v645_v8, %v8010_v41  ;;  %v608_v39 = vadd.f32 %v592_v60, %v535_v0 }
 0x161   :  { %v679_v44 = vadd.f32 %v663_v28, %v606_v35  ;;  %v680_v3 = vadd.f32 %v664_v31, %v607_v47 }
 0x163   :  { %v578_v20 = vpop.permute.xlu1 %577 }
 0x164   :  { %v651_v5 = vpop.permute.xlu0 %650  ;;  %v593_v36 = vsel %vm589_vm5, %v576_v53, %v578_v20  ;;  %v665_v53 = vsel %vm662_vm6, %v8010_v41, %v8039_v62  ;;  %v8118_v41 = vrot.slane %v764_v49, %v7761_v18 }
 0x165   :  { %v609_v43 = vadd.f32 %v593_v36, %v536_v2  ;;  %v666_v6 = vsel %vm662_vm6, %v8039_v62, %v651_v5  ;;  %v681_v7 = vadd.f32 %v665_v53, %v608_v39 }
 0x167   :  { %v716_v58 = vpop.permute.xlu1 %715  ;;  %v682_v12 = vadd.f32 %v666_v6, %v609_v43  ;;  %v137_v6 = vmul.f32 %v8013_v45, %v7896_v42 }
 0x168   :  { %v724_v38 = vpop.permute.xlu0 %723  ;;  %v736_v52 = vsel %vm735_vm7, %v716_v58, %v718_v1 }
 0x169   :  { %v8111_v63 = vadd.f32 %v736_v52, %v679_v44 }
 0x16b   :  { %v720_v4 = vpop.permute.xlu1 %719  ;;  %v786_v57 = vmul.f32 %v8109_v54, %v8111_v63 }
 0x16c   :  { %v737_v8 = vsel %vm735_vm7, %v718_v1, %v720_v4  ;;  %v215_v59 = vpop.permute.xlu0 %214 }
 0x16d   :  { %v8113_v11 = vadd.f32 %v737_v8, %v680_v3  ;;  %v138_v8 = vmul.f32 %v8016_v34, %v7896_v42 }
 0x16f   :  { %v787_v19 = vmul.f32 %v8100_v40, %v8113_v11  ;;  %v722_v21 = vpop.permute.xlu1 %721 }
 0x170   :  { %v738_v62 = vsel %vm735_vm7, %v720_v4, %v722_v21  ;;  %v739_v1 = vsel %vm735_vm7, %v722_v21, %v724_v38  ;;  %v219_v25 = vpop.permute.xlu0 %218 }
 0x171   :  { %v8124_v48 = vadd.f32 %v738_v62, %v681_v7  ;;  %v8126_v17 = vadd.f32 %v739_v1, %v682_v12  ;;  %v794_v15 = vadd.f32 %v787_v19, %v786_v57 }
 0x173   :  { %v217_v29 = vpop.permute.xlu1 %216  ;;  %v788_v22 = vmul.f32 %v8118_v41, %v8124_v48  ;;  %v789_v16 = vmul.f32 %v8129_v61, %v8126_v17 }
 0x174   :  { %v288_v20 = vpop.permute.xlu0 %287  ;;  %v229_v43 = vsel %vm224_vm0, %v215_v59, %v217_v29  ;;  %v230_v4 = vsel %vm224_vm0, %v217_v29, %v219_v25  ;;  %v139_v59 = vmul.f32 %v8019_v37, %v7896_v42 }
 0x175   :  { %v795_v32 = vadd.f32 %v794_v15, %v788_v22  ;;  %v245_v21 = vadd.f32 %v229_v43, %v137_v6  ;;  %v246_v62 = vadd.f32 %v230_v4, %v138_v8 }
 0x177   :  { %v221_v5 = vpop.permute.xlu1 %220  ;;  %v796_v50 = vadd.f32 %v795_v32, %v789_v16 }
 0x178   :  { %v292_v51 = vpop.permute.xlu0 %291  ;;  %v231_v7 = vsel %vm224_vm0, %v219_v25, %v221_v5 }
 0x179   :  { %797 = vadd.xlane.f32.xlu0 %v796_v50  ;;  %v247_v34 = vadd.f32 %v231_v7, %v139_v59 }
 0x17b   :  { %v290_v26 = vpop.permute.xlu1 %289 }
 0x17c   :  { %v294_v55 = vpop.permute.xlu0 %293  ;;  %v302_v12 = vsel %vm297_vm1, %v288_v20, %v290_v26  ;;  %v303_v19 = vsel %vm297_vm1, %v290_v26, %v292_v51 }
 0x17d   :  { %v304_v57 = vsel %vm297_vm1, %v292_v51, %v294_v55  ;;  %v318_v15 = vadd.f32 %v302_v12, %v245_v21  ;;  %v319_v25 = vadd.f32 %v303_v19, %v246_v62 }
 0x17e   :  { %v320_v50 = vadd.f32 %v304_v57, %v247_v34 }
 0x17f   :  { %v223_v9 = vpop.permute.xlu1 %222 }
 0x180   :  { %v363_v30 = vpop.permute.xlu0 %362  ;;  %v232_v37 = vsel %vm224_vm0, %v221_v5, %v223_v9 }
 0x183   :  { %v361_v27 = vpop.permute.xlu1 %360 }
 0x184   :  { %v296_v24 = vpop.permute.xlu0 %295  ;;  %v375_v29 = vsel %vm370_vm2, %v361_v27, %v363_v30  ;;  %v140_v27 = vmul.f32 %v8022_v46, %v7896_v42 }
 0x185   :  { %v391_v26 = vadd.f32 %v375_v29, %v318_v15 }
 0x186   :  { %v248_v5 = vadd.f32 %v232_v37, %v140_v27 }
 0x187   :  { %v365_v33 = vpop.permute.xlu1 %364 }
 0x188   :  { %v434_v56 = vpop.permute.xlu0 %433  ;;  %v376_v45 = vsel %vm370_vm2, %v363_v30, %v365_v33 }
 0x189   :  { %v392_v43 = vadd.f32 %v376_v45, %v319_v25 }
 0x18b   :  { %v367_v58 = vpop.permute.xlu1 %366 }
 0x18c   :  { %v438_v60 = vpop.permute.xlu0 %437  ;;  %v377_v20 = vsel %vm370_vm2, %v365_v33, %v367_v58 }
 0x18f   :  { %v436_v28 = vpop.permute.xlu1 %435 }
 0x190   :  { %v8135_v31 = vpop.permute.xlu0 %439  ;;  %v448_v16 = vsel %vm443_vm3, %v434_v56, %v436_v28  ;;  %v449_v32 = vsel %vm443_vm3, %v436_v28, %v438_v60  ;;  %v305_v56 = vsel %vm297_vm1, %v294_v55, %v296_v24  ;;  %v393_v28 = vadd.f32 %v377_v20, %v320_v50 }
 0x191   :  { %v450_v30 = vsel %vm443_vm3, %v438_v60, %v8135_v31  ;;  %v464_v8 = vadd.f32 %v448_v16, %v391_v26  ;;  %v465_v7 = vadd.f32 %v449_v32, %v392_v43  ;;  %v321_v21 = vadd.f32 %v305_v56, %v248_v5 }
 0x192   :  { %v466_v46 = vadd.f32 %v450_v30, %v393_v28 }
 0x193   :  { %v369_v36 = vpop.permute.xlu1 %368 }
 0x194   :  { %v509_v38 = vpop.permute.xlu0 %508  ;;  %v378_v60 = vsel %vm370_vm2, %v367_v58, %v369_v36 }
 0x195   :  { %v394_v29 = vadd.f32 %v378_v60, %v321_v21 }
 0x197   :  { %v507_v0 = vpop.permute.xlu1 %506 }
 0x198   :  { %v442_v2 = vpop.permute.xlu0 %441  ;;  %v521_v4 = vsel %vm516_vm4, %v507_v0, %v509_v38 }
 0x199   :  { %v537_v0 = vadd.f32 %v521_v4, %v464_v8 }
 0x19b   :  { %v511_v35 = vpop.permute.xlu1 %510 }
 0x19c   :  { %v580_v47 = vpop.permute.xlu0 %579  ;;  %v522_v33 = vsel %vm516_vm4, %v509_v38, %v511_v35 }
 0x19d   :  { %v538_v19 = vadd.f32 %v522_v33, %v465_v7 }
 0x19f   :  { %v8137_v49 = vpop.permute.xlu1 %512 }
 0x1a0   :  { %v584_v52 = vpop.permute.xlu0 %583  ;;  %v523_v9 = vsel %vm516_vm4, %v511_v35, %v8137_v49  ;;  %v451_v35 = vsel %vm443_vm3, %v8135_v31, %v442_v2 }
 0x1a1   :  { %v467_v25 = vadd.f32 %v451_v35, %v394_v29 }
 0x1a3   :  { %v582_v39 = vpop.permute.xlu1 %581 }
 0x1a4   :  { %v8139_v44 = vpop.permute.xlu0 %585  ;;  %v594_v12 = vsel %vm589_vm5, %v580_v47, %v582_v39  ;;  %v595_v42 = vsel %vm589_vm5, %v582_v39, %v584_v52  ;;  %v539_v47 = vadd.f32 %v523_v9, %v466_v46 }
 0x1a5   :  { %v596_v55 = vsel %vm589_vm5, %v584_v52, %v8139_v44  ;;  %v610_v39 = vadd.f32 %v594_v12, %v537_v0  ;;  %v611_v57 = vadd.f32 %v595_v42, %v538_v19 }
 0x1a6   :  { %v612_v36 = vadd.f32 %v596_v55, %v539_v47 }
 0x1a7   :  { %v8141_v3 = vpop.permute.xlu1 %514 }
 0x1a8   :  { %v655_v53 = vpop.permute.xlu0 %654  ;;  %v524_v52 = vsel %vm516_vm4, %v8137_v49, %v8141_v3 }
 0x1a9   :  { %v540_v37 = vadd.f32 %v524_v52, %v467_v25 }
 0x1ab   :  { %v653_v1 = vpop.permute.xlu1 %652 }
 0x1ac   :  { %v588_v22 = vpop.permute.xlu0 %587  ;;  %v667_v24 = vsel %vm662_vm6, %v653_v1, %v655_v53 }
 0x1ad   :  { %v683_v45 = vadd.f32 %v667_v24, %v610_v39  ;;  %v597_v50 = vsel %vm589_vm5, %v8139_v44, %v588_v22 }
 0x1ae   :  { %v613_v27 = vadd.f32 %v597_v50, %v540_v37 }
 0x1af   :  { %v657_v51 = vpop.permute.xlu1 %656 }
 0x1b0   :  { %v726_v6 = vpop.permute.xlu0 %725  ;;  %v668_v62 = vsel %vm662_vm6, %v655_v53, %v657_v51 }
 0x1b1   :  { %v684_v34 = vadd.f32 %v668_v62, %v611_v57 }
 0x1b3   :  { %v659_v38 = vpop.permute.xlu1 %658 }
 0x1b4   :  { %v730_v59 = vpop.permute.xlu0 %729  ;;  %v669_v58 = vsel %vm662_vm6, %v657_v51, %v659_v38 }
 0x1b5   :  { %v685_v2 = vadd.f32 %v669_v58, %v612_v36 }
 0x1b7   :  { %v728_v15 = vpop.permute.xlu1 %727 }
 0x1b8   :  { %v740_v53 = vsel %vm735_vm7, %v726_v6, %v728_v15  ;;  %v741_v1 = vsel %vm735_vm7, %v728_v15, %v730_v59  ;;  %v732_v31 = vpop.permute.xlu0 %731 }
 0x1b9   :  { %v756_v20 = vadd.f32 %v740_v53, %v683_v45  ;;  %v757_v16 = vadd.f32 %v741_v1, %v684_v34  ;;  %v742_v32 = vsel %vm735_vm7, %v730_v59, %v732_v31 }
 0x1ba   :  { %v758_v51 = vadd.f32 %v742_v32, %v685_v2  ;;  %v896_v32 = vld [vmem:[%s9986_s28 + $0x20] sm:$0xff] }
 0x1bb   :  { %v790_v26 = vmul.f32 %v8109_v54, %v756_v20  ;;  %v791_v43 = vmul.f32 %v8100_v40, %v757_v16  ;;  %v661_v49 = vpop.permute.xlu1 %660 }
 0x1bc   :  { %v670_v3 = vsel %vm662_vm6, %v659_v38, %v661_v49  ;;  %v792_v30 = vmul.f32 %v8118_v41, %v758_v51 }
 0x1bd   :  { %v686_v4 = vadd.f32 %v670_v3, %v613_v27  ;;  %v799_v6 = vadd.f32 %v791_v43, %v790_v26  ;;  %v894_v26 = vld [vmem:[%s9986_s28 + $0x10] sm:$0xff]  ;;  %v905_v3 = vld [vmem:[%s9986_s28 + $0x68] sm:$0xff]  ;;  %v903_v27 = vld [vmem:[%s9986_s28 + $0x58] sm:$0xff] }
 0x1be   :  { %v898_v43 = vld [vmem:[%s9986_s28 + $0x30] sm:$0xff] }
 0x1bf   :  { %v734_v33 = vpop.permute.xlu1 %733  ;;  %v800_v22 = vadd.f32 %v799_v6, %v792_v30  ;;  %v6821_v49 = vpack.c.bf16 %v898_v43, %v894_v26  ;;  %v907_v30 = vld [vmem:[%s9986_s28 + $0x78] sm:$0xff]  ;;  %v900_v6 = vld [vmem:[%s9986_s28 + $0x40] sm:$0xff]  ;;  %v937_v26 = vld [vmem:[%s9986_s28 + $0x168] sm:$0xff] }
 0x1c0   :  { %v743_v56 = vsel %vm735_vm7, %v732_v31, %v734_v33  ;;  %v6823_v33 = vpack.c.bf16 %v907_v30, %v903_v27  ;;  %v932_v27 = vld [vmem:[%s9986_s28 + $0x140] sm:$0xff] }
 0x1c1   :  { %v759_v28 = vadd.f32 %v743_v56, %v686_v4  ;;  %v904_v56 = vld [vmem:[%s9986_s28 + $0x60] sm:$0xff] }
 0x1c3   :  { %v793_v44 = vmul.f32 %v8129_v61, %v759_v28 }
 0x1c5   :  { %v801_v8 = vadd.f32 %v800_v22, %v793_v44  ;;  %v6697_v44 = vpack.c.bf16 %v904_v56, %v900_v6  ;;  %v906_v22 = vld [vmem:[%s9986_s28 + $0x70] sm:$0xff] }
 0x1c6   :  { %v938_v6 = vld [vmem:[%s9986_s28 + $0x170] sm:$0xff] }
 0x1c7   :  { %802 = vadd.xlane.f32.xlu1 %v801_v8 }
 0x206   :  { %v798_v7 = vpop.xlane.xlu0 %797 }
 0x207   :  { %v804_v5 = vmul.f32 0.0025510204, %v798_v7  ;;  %v909_v7 = vld [vmem:[%s9986_s28 + $0x88] sm:$0xff] }
 0x209   :  { %v8195_v9 = vsub.f32 %v8111_v63, %v804_v5  ;;  %v8198_v12 = vsub.f32 %v8113_v11, %v804_v5  ;;  %v8201_v42 = vsub.f32 %v8124_v48, %v804_v5  ;;  %v8204_v46 = vsub.f32 %v8126_v17, %v804_v5  ;;  %v913_v5 = vld [vmem:[%s9986_s28 + $0xa8] sm:$0xff] }
 0x20b   :  { %v814_v60 = vmul.f32 %v8195_v9, %v8109_v54  ;;  %v815_v0 = vmul.f32 %v8198_v12, %v8100_v40  ;;  %v816_v19 = vmul.f32 %v8201_v42, %v8118_v41  ;;  %v817_v63 = vmul.f32 %v8204_v46, %v8129_v61 }
 0x20d   :  { %v822_v11 = vmul.f32 %v814_v60, %v814_v60  ;;  %v823_v38 = vmul.f32 %v815_v0, %v815_v0  ;;  %v824_v21 = vmul.f32 %v816_v19, %v816_v19  ;;  %v825_v55 = vmul.f32 %v817_v63, %v817_v63  ;;  %v911_v60 = vld [vmem:[%s9986_s28 + $0x98] sm:$0xff]  ;;  %v908_v63 = vld [vmem:[%s9986_s28 + $0x80] sm:$0xff] }
 0x20e   :  { %v6699_v0 = vpack.c.bf16 %v913_v5, %v909_v7  ;;  %v915_v19 = vld [vmem:[%s9986_s28 + $0xb8] sm:$0xff] }
 0x20f   :  { %v830_v48 = vadd.f32 %v823_v38, %v822_v11  ;;  %v912_v11 = vld [vmem:[%s9986_s28 + $0xa0] sm:$0xff]  ;;  %v6827_v38 = vpack.c.bf16 %v915_v19, %v911_v60  ;;  %v947_v5 = vld [vmem:[%s9986_s28 + $0x1b8] sm:$0xff] }
 0x210   :  { %v940_v60 = vld [vmem:[%s9986_s28 + $0x180] sm:$0xff] }
 0x211   :  { %v831_v24 = vadd.f32 %v830_v48, %v824_v21  ;;  %v6701_v21 = vpack.c.bf16 %v912_v11, %v908_v63  ;;  %v910_v48 = vld [vmem:[%s9986_s28 + $0x90] sm:$0xff] }
 0x212   :  { %v942_v63 = vld [vmem:[%s9986_s28 + $0x190] sm:$0xff] }
 0x213   :  { %v832_v17 = vadd.f32 %v831_v24, %v825_v55  ;;  %v914_v55 = vld [vmem:[%s9986_s28 + $0xb0] sm:$0xff] }
 0x214   :  { %v6829_v24 = vpack.c.bf16 %v914_v55, %v910_v48  ;;  %v946_v11 = vld [vmem:[%s9986_s28 + $0x1b0] sm:$0xff]  ;;  %v951_v48 = vld [vmem:[%s9986_s28 + $0x1d8] sm:$0xff] }
 0x215   :  { %833 = vadd.xlane.f32.xlu0 %v832_v17  ;;  %v917_v17 = vld [vmem:[%s9986_s28 + $0xc8] sm:$0xff]  ;;  %v955_v55 = vld [vmem:[%s9986_s28 + $0x1f8] sm:$0xff] }
 0x254   :  { %v803_v62 = vpop.xlane.xlu1 %802 }
 0x255   :  { %v805_v59 = vmul.f32 0.0025510204, %v803_v62  ;;  %v921_v62 = vld [vmem:[%s9986_s28 + $0xe8] sm:$0xff] }
 0x257   :  { %v8214_v35 = vsub.f32 %v756_v20, %v805_v59  ;;  %v8216_v47 = vsub.f32 %v757_v16, %v805_v59  ;;  %v8218_v39 = vsub.f32 %v758_v51, %v805_v59  ;;  %v8220_v57 = vsub.f32 %v759_v28, %v805_v59  ;;  %v899_v20 = vld [vmem:[%s9986_s28 + $0x38] sm:$0xff]  ;;  %v892_v16 = vld [vmem:[%s9986_s28] sm:$0xff]  ;;  %v901_v51 = vld [vmem:[%s9986_s28 + $0x48] sm:$0xff] }
 0x258   :  { %v6693_v37 = vpack.c.bf16 %v896_v32, %v892_v16  ;;  %v6695_v4 = vpack.c.bf16 %v905_v3, %v901_v51  ;;  %v902_v28 = vld [vmem:[%s9986_s28 + $0x50] sm:$0xff]  ;;  %v919_v59 = vld [vmem:[%s9986_s28 + $0xd8] sm:$0xff] }
 0x259   :  { %v818_v29 = vmul.f32 %v8214_v35, %v8109_v54  ;;  %v819_v58 = vmul.f32 %v8216_v47, %v8100_v40  ;;  %v820_v36 = vmul.f32 %v8218_v39, %v8118_v41  ;;  %v821_v45 = vmul.f32 %v8220_v57, %v8129_v61  ;;  %v762_v54 = vld [vmem:[%s9985_s29] sm:$0xff]  ;;  %v893_v40 = vld [vmem:[%s9986_s28 + $0x8] sm:$0xff]  ;;  %v895_v61 = vld [vmem:[%s9986_s28 + $0x18] sm:$0xff] }
 0x25a   :  { %v897_v41 = vld [vmem:[%s9986_s28 + $0x28] sm:$0xff]  ;;  %v6819_v50 = vpack.c.bf16 %v899_v20, %v895_v61  ;;  %v6825_v8 = vpack.c.bf16 %v906_v22, %v902_v28  ;;  %v928_v20 = vld [vmem:[%s9986_s28 + $0x120] sm:$0xff]  ;;  %v926_v16 = vld [vmem:[%s9986_s28 + $0x110] sm:$0xff] }
 0x25b   :  { %v826_v34 = vmul.f32 %v818_v29, %v818_v29  ;;  %v827_v15 = vmul.f32 %v819_v58, %v819_v58  ;;  %v828_v25 = vmul.f32 %v820_v36, %v820_v36  ;;  %v829_v53 = vmul.f32 %v821_v45, %v821_v45  ;;  %v923_v58 = vld [vmem:[%s9986_s28 + $0xf8] sm:$0xff]  ;;  %v916_v36 = vld [vmem:[%s9986_s28 + $0xc0] sm:$0xff]  ;;  %v941_v28 = vld [vmem:[%s9986_s28 + $0x188] sm:$0xff] }
 0x25c   :  { %v6691_v2 = vpack.c.bf16 %v897_v41, %v893_v40  ;;  %6820 = vmatprep.subr.bf16.mxu1 %v6819_v50  ;;  %v6703_v29 = vpack.c.bf16 %v921_v62, %v917_v17  ;;  %v920_v45 = vld [vmem:[%s9986_s28 + $0xe0] sm:$0xff]  ;;  %v931_v40 = vld [vmem:[%s9986_s28 + $0x138] sm:$0xff]  ;;  %v930_v50 = vld [vmem:[%s9986_s28 + $0x130] sm:$0xff]  ;;  %v6845_v17 = vpack.c.bf16 %v946_v11, %v942_v63 }
 0x25d   :  { %v835_v52 = vadd.f32 %v827_v15, %v826_v34  ;;  %6822 = vmatpush1.bf16.msra.mxu1 %v6821_v49  ;;  %v6831_v34 = vpack.c.bf16 %v923_v58, %v919_v59  ;;  %v6705_v15 = vpack.c.bf16 %v920_v45, %v916_v36  ;;  %v6837_v43 = vpack.c.bf16 %v930_v50, %v926_v16  ;;  %v935_v49 = vld [vmem:[%s9986_s28 + $0x158] sm:$0xff]  ;;  %v948_v59 = vld [vmem:[%s9986_s28 + $0x1c0] sm:$0xff]  ;;  %v950_v58 = vld [vmem:[%s9986_s28 + $0x1d0] sm:$0xff] }
 0x25e   :  { %6692 = vmatprep.subr.bf16.mxu0 %v6691_v2  ;;  %6824 = vmatprep.subr.bf16.mxu1 %v6823_v33  ;;  %v924_v2 = vld [vmem:[%s9986_s28 + $0x100] sm:$0xff]  ;;  %v939_v3 = vld [vmem:[%s9986_s28 + $0x178] sm:$0xff]  ;;  %v934_v33 = vld [vmem:[%s9986_s28 + $0x150] sm:$0xff]  ;;  %v6847_v36 = vpack.c.bf16 %v955_v55, %v951_v48 }
 0x25f   :  { %v836_v1 = vadd.f32 %v835_v52, %v828_v25  ;;  %6694 = vmatpush1.bf16.msra.mxu0 %v6693_v37  ;;  %v918_v25 = vld [vmem:[%s9986_s28 + $0xd0] sm:$0xff]  ;;  %v6709_v32 = vpack.c.bf16 %v928_v20, %v924_v2  ;;  %v933_v37 = vld [vmem:[%s9986_s28 + $0x148] sm:$0xff]  ;;  %v6839_v30 = vpack.c.bf16 %v939_v3, %v935_v49  ;;  %v943_v22 = vld [vmem:[%s9986_s28 + $0x198] sm:$0xff] }
 0x260   :  { %6696 = vmatprep.subr.bf16.mxu0 %v6695_v4  ;;  %v922_v52 = vld [vmem:[%s9986_s28 + $0xf0] sm:$0xff]  ;;  %v6711_v51 = vpack.c.bf16 %v937_v26, %v933_v37  ;;  %v936_v4 = vld [vmem:[%s9986_s28 + $0x160] sm:$0xff]  ;;  %v6843_v19 = vpack.c.bf16 %v947_v5, %v943_v22  ;;  %v965_v20 = vld [vmem:[%s9986_s28 + $0x248] sm:$0xff] }
 0x261   :  { %v837_v31 = vadd.f32 %v836_v1, %v829_v53  ;;  %6826 = vmatpush1.bf16.msra.mxu1 %v6825_v8  ;;  %v925_v53 = vld [vmem:[%s9986_s28 + $0x108] sm:$0xff]  ;;  %v6833_v1 = vpack.c.bf16 %v922_v52, %v918_v25  ;;  %v6713_v56 = vpack.c.bf16 %v936_v4, %v932_v27  ;;  %v6841_v8 = vpack.c.bf16 %v938_v6, %v934_v33  ;;  %v954_v45 = vld [vmem:[%s9986_s28 + $0x1f0] sm:$0xff]  ;;  %v959_v25 = vld [vmem:[%s9986_s28 + $0x218] sm:$0xff] }
 0x262   :  { %6828 = vmatprep.subr.bf16.mxu1 %v6827_v38  ;;  %v949_v38 = vld [vmem:[%s9986_s28 + $0x1c8] sm:$0xff]  ;;  %v963_v52 = vld [vmem:[%s9986_s28 + $0x238] sm:$0xff]  ;;  %v962_v2 = vld [vmem:[%s9986_s28 + $0x230] sm:$0xff] }
 0x263   :  { %838 = vadd.xlane.f32.xlu0 %v837_v31  ;;  %6698 = vmatpush1.bf16.msra.mxu0 %v6697_v44  ;;  %v929_v31 = vld [vmem:[%s9986_s28 + $0x128] sm:$0xff]  ;;  %v971_v50 = vld [vmem:[%s9986_s28 + $0x278] sm:$0xff]  ;;  %v968_v49 = vld [vmem:[%s9986_s28 + $0x260] sm:$0xff] }
 0x264   :  { %6700 = vmatprep.subr.bf16.mxu0 %v6699_v0  ;;  %v6707_v41 = vpack.c.bf16 %v929_v31, %v925_v53  ;;  %v945_v44 = vld [vmem:[%s9986_s28 + $0x1a8] sm:$0xff]  ;;  %v944_v0 = vld [vmem:[%s9986_s28 + $0x1a0] sm:$0xff]  ;;  %v966_v3 = vld [vmem:[%s9986_s28 + $0x250] sm:$0xff] }
 0x265   :  { %6830 = vmatpush1.bf16.msra.mxu1 %v6829_v24  ;;  %v6715_v7 = vpack.c.bf16 %v945_v44, %v941_v28  ;;  %v6717_v24 = vpack.c.bf16 %v944_v0, %v940_v60  ;;  %v969_v16 = vld [vmem:[%s9986_s28 + $0x268] sm:$0xff]  ;;  %v975_v6 = vld [vmem:[%s9986_s28 + $0x298] sm:$0xff]  ;;  %v974_v5 = vld [vmem:[%s9986_s28 + $0x290] sm:$0xff] }
 0x266   :  { %6832 = vmatprep.subr.bf16.mxu1 %v6831_v34  ;;  %v957_v34 = vld [vmem:[%s9986_s28 + $0x208] sm:$0xff]  ;;  %v978_v0 = vld [vmem:[%s9986_s28 + $0x2b0] sm:$0xff]  ;;  %v983_v11 = vld [vmem:[%s9986_s28 + $0x2d8] sm:$0xff] }
 0x267   :  { %6702 = vmatpush1.bf16.msra.mxu0 %v6701_v21  ;;  %v953_v21 = vld [vmem:[%s9986_s28 + $0x1e8] sm:$0xff]  ;;  %v6861_v55 = vpack.c.bf16 %v978_v0, %v974_v5  ;;  %v1004_v0 = vld [vmem:[%s9986_s28 + $0x380] sm:$0xff] }
 0x268   :  { %6704 = vmatprep.subr.bf16.mxu0 %v6703_v29  ;;  %v6719_v62 = vpack.c.bf16 %v953_v21, %v949_v38  ;;  %v952_v29 = vld [vmem:[%s9986_s28 + $0x1e0] sm:$0xff]  ;;  %v973_v4 = vld [vmem:[%s9986_s28 + $0x288] sm:$0xff]  ;;  %v987_v38 = vld [vmem:[%s9986_s28 + $0x2f8] sm:$0xff] }
 0x269   :  { %6834 = vmatpush1.bf16.msra.mxu1 %v6833_v1  ;;  %v6721_v53 = vpack.c.bf16 %v952_v29, %v948_v59  ;;  %v6849_v1 = vpack.c.bf16 %v954_v45, %v950_v58  ;;  %v977_v33 = vld [vmem:[%s9986_s28 + $0x2a8] sm:$0xff]  ;;  %v982_v59 = vld [vmem:[%s9986_s28 + $0x2d0] sm:$0xff]  ;;  %v6863_v58 = vpack.c.bf16 %v987_v38, %v983_v11 }
 0x26a   :  { %v6731_v22 = vpack.c.bf16 %v977_v33, %v973_v4  ;;  %v985_v63 = vld [vmem:[%s9986_s28 + $0x2e8] sm:$0xff]  ;;  %v1010_v38 = vld [vmem:[%s9986_s28 + $0x3b0] sm:$0xff] }
 0x26b   :  { %6706 = vmatpush1.bf16.msra.mxu0 %v6705_v15  ;;  %v961_v15 = vld [vmem:[%s9986_s28 + $0x228] sm:$0xff] }
 0x26c   :  { %6708 = vmatprep.subr.bf16.mxu0 %v6707_v41  ;;  %v6723_v31 = vpack.c.bf16 %v961_v15, %v957_v34  ;;  %v958_v41 = vld [vmem:[%s9986_s28 + $0x210] sm:$0xff]  ;;  %v989_v45 = vld [vmem:[%s9986_s28 + $0x308] sm:$0xff]  ;;  %v991_v15 = vld [vmem:[%s9986_s28 + $0x318] sm:$0xff] }
 0x26d   :  { %v6853_v26 = vpack.c.bf16 %v962_v2, %v958_v41  ;;  %v993_v34 = vld [vmem:[%s9986_s28 + $0x328] sm:$0xff]  ;;  %v990_v41 = vld [vmem:[%s9986_s28 + $0x310] sm:$0xff] }
 0x26e   :  { %v994_v2 = vld [vmem:[%s9986_s28 + $0x330] sm:$0xff]  ;;  %v1005_v4 = vld [vmem:[%s9986_s28 + $0x388] sm:$0xff] }
 0x26f   :  { %6710 = vmatpush1.bf16.msra.mxu0 %v6709_v32  ;;  %v967_v32 = vld [vmem:[%s9986_s28 + $0x258] sm:$0xff]  ;;  %v1009_v33 = vld [vmem:[%s9986_s28 + $0x3a8] sm:$0xff] }
 0x270   :  { %6712 = vmatprep.subr.bf16.mxu0 %v6711_v51  ;;  %v964_v51 = vld [vmem:[%s9986_s28 + $0x240] sm:$0xff]  ;;  %v6855_v27 = vpack.c.bf16 %v971_v50, %v967_v32  ;;  %v999_v32 = vld [vmem:[%s9986_s28 + $0x358] sm:$0xff] }
 0x271   :  { %v6729_v28 = vpack.c.bf16 %v968_v49, %v964_v51  ;;  %v1003_v50 = vld [vmem:[%s9986_s28 + $0x378] sm:$0xff]  ;;  %v996_v51 = vld [vmem:[%s9986_s28 + $0x340] sm:$0xff] }
 0x272   :  { %v1000_v49 = vld [vmem:[%s9986_s28 + $0x360] sm:$0xff] }
 0x273   :  { %6714 = vmatpush1.bf16.msra.mxu0 %v6713_v56  ;;  %v979_v56 = vld [vmem:[%s9986_s28 + $0x2b8] sm:$0xff] }
 0x274   :  { %6716 = vmatprep.subr.bf16.mxu0 %v6715_v7  ;;  %v976_v7 = vld [vmem:[%s9986_s28 + $0x2a0] sm:$0xff]  ;;  %v6859_v60 = vpack.c.bf16 %v979_v56, %v975_v6  ;;  %v1007_v6 = vld [vmem:[%s9986_s28 + $0x398] sm:$0xff] }
 0x275   :  { %v1011_v56 = vld [vmem:[%s9986_s28 + $0x3b8] sm:$0xff] }
 0x277   :  { %6718 = vmatpush1.bf16.msra.mxu0 %v6717_v24 }
 0x278   :  { %6720 = vmatprep.subr.bf16.mxu0 %v6719_v62  ;;  %v984_v62 = vld [vmem:[%s9986_s28 + $0x2e0] sm:$0xff] }
 0x279   :  { %868 = vperm.xlu0 %7426, %v762_v54   ;;  %v927_v54 = vld [vmem:[%s9986_s28 + $0x118] sm:$0xff] }
 0x27a   :  { %v6835_v61 = vpack.c.bf16 %v931_v40, %v927_v54  ;;  %v956_v54 = vld [vmem:[%s9986_s28 + $0x200] sm:$0xff] }
 0x27b   :  { %v960_v40 = vld [vmem:[%s9986_s28 + $0x220] sm:$0xff]  ;;  %6722 = vmatpush1.bf16.msra.mxu0 %v6721_v53 }
 0x27c   :  { %6836 = vmatprep.subr.bf16.mxu1 %v6835_v61  ;;  %v6851_v61 = vpack.c.bf16 %v963_v52, %v959_v25  ;;  %v6725_v37 = vpack.c.bf16 %v960_v40, %v956_v54  ;;  %6724 = vmatprep.subr.bf16.mxu0 %v6723_v31  ;;  %v995_v25 = vld [vmem:[%s9986_s28 + $0x338] sm:$0xff]  ;;  %v6739_v31 = vpack.c.bf16 %v993_v34, %v989_v45  ;;  %v988_v54 = vld [vmem:[%s9986_s28 + $0x300] sm:$0xff]  ;;  %v1014_v45 = vld [vmem:[%s9986_s28 + $0x3d0] sm:$0xff] }
 0x27d   :  { %6838 = vmatpush1.bf16.msra.mxu1 %v6837_v43  ;;  %v6727_v43 = vpack.c.bf16 %v969_v16, %v965_v20  ;;  %v992_v40 = vld [vmem:[%s9986_s28 + $0x320] sm:$0xff]  ;;  %v997_v20 = vld [vmem:[%s9986_s28 + $0x348] sm:$0xff]  ;;  %v1018_v34 = vld [vmem:[%s9986_s28 + $0x3f0] sm:$0xff] }
 0x27e   :  { %6840 = vmatprep.subr.bf16.mxu1 %v6839_v30  ;;  %v970_v30 = vld [vmem:[%s9986_s28 + $0x270] sm:$0xff]  ;;  %v1001_v16 = vld [vmem:[%s9986_s28 + $0x368] sm:$0xff] }
 0x27f   :  { %6726 = vmatpush1.bf16.msra.mxu0 %v6725_v37  ;;  %v6857_v44 = vpack.c.bf16 %v970_v30, %v966_v3  ;;  %v6741_v37 = vpack.c.bf16 %v992_v40, %v988_v54  ;;  %v998_v3 = vld [vmem:[%s9986_s28 + $0x350] sm:$0xff] }
 0x280   :  { %6728 = vmatprep.subr.bf16.mxu0 %v6727_v43  ;;  %v6743_v43 = vpack.c.bf16 %v1001_v16, %v997_v20  ;;  %v1002_v30 = vld [vmem:[%s9986_s28 + $0x370] sm:$0xff] }
 0x281   :  { %6842 = vmatpush1.bf16.msra.mxu1 %v6841_v8  ;;  %v972_v8 = vld [vmem:[%s9986_s28 + $0x280] sm:$0xff] }
 0x282   :  { %6844 = vmatprep.subr.bf16.mxu1 %v6843_v19  ;;  %v981_v19 = vld [vmem:[%s9986_s28 + $0x2c8] sm:$0xff]  ;;  %v6733_v21 = vpack.c.bf16 %v976_v7, %v972_v8  ;;  %v760_v8 = vld [vmem:[%s9987_s2] sm:$0xff]  ;;  %v6875_v7 = vpack.c.bf16 %v1011_v56, %v1007_v6  ;;  %v1035_v6 = vld [vmem:[%s9986_s28 + $0x478] sm:$0xff] }
 0x283   :  { %6730 = vmatpush1.bf16.msra.mxu0 %v6729_v28  ;;  %v6735_v24 = vpack.c.bf16 %v985_v63, %v981_v19  ;;  %v6745_v28 = vpack.c.bf16 %v1000_v49, %v996_v51  ;;  %v1008_v19 = vld [vmem:[%s9986_s28 + $0x3a0] sm:$0xff]  ;;  %v1006_v63 = vld [vmem:[%s9986_s28 + $0x390] sm:$0xff] }
 0x284   :  { %6732 = vmatprep.subr.bf16.mxu0 %v6731_v22  ;;  %v6747_v22 = vpack.c.bf16 %v1009_v33, %v1005_v4  ;;  %v6749_v11 = vpack.c.bf16 %v1008_v19, %v1004_v0  ;;  %v1024_v51 = vld [vmem:[%s9986_s28 + $0x420] sm:$0xff]  ;;  %v1033_v4 = vld [vmem:[%s9986_s28 + $0x468] sm:$0xff]  ;;  %v1031_v33 = vld [vmem:[%s9986_s28 + $0x458] sm:$0xff] }
 0x285   :  { %6846 = vmatpush1.bf16.msra.mxu1 %v6845_v17  ;;  %v980_v17 = vld [vmem:[%s9986_s28 + $0x2c0] sm:$0xff]  ;;  %v1030_v0 = vld [vmem:[%s9986_s28 + $0x450] sm:$0xff] }
 0x286   :  { %6848 = vmatprep.subr.bf16.mxu1 %v6847_v36  ;;  %v986_v36 = vld [vmem:[%s9986_s28 + $0x2f0] sm:$0xff]  ;;  %v6737_v53 = vpack.c.bf16 %v984_v62, %v980_v17  ;;  %v1019_v62 = vld [vmem:[%s9986_s28 + $0x3f8] sm:$0xff] }
 0x287   :  { %6734 = vmatpush1.bf16.msra.mxu0 %v6733_v21  ;;  %v6877_v21 = vpack.c.bf16 %v1010_v38, %v1006_v63  ;;  %v1034_v19 = vld [vmem:[%s9986_s28 + $0x470] sm:$0xff]  ;;  %v1037_v63 = vld [vmem:[%s9986_s28 + $0x488] sm:$0xff]  ;;  %v1039_v38 = vld [vmem:[%s9986_s28 + $0x498] sm:$0xff] }
 0x288   :  { %6736 = vmatprep.subr.bf16.mxu0 %v6735_v24  ;;  %v1015_v24 = vld [vmem:[%s9986_s28 + $0x3d8] sm:$0xff] }
 0x289   :  { %6850 = vmatpush1.bf16.msra.mxu1 %v6849_v1  ;;  %v6865_v1 = vpack.c.bf16 %v986_v36, %v982_v59  ;;  %v1012_v59 = vld [vmem:[%s9986_s28 + $0x3c0] sm:$0xff] }
 0x28a   :  { %6852 = vmatprep.subr.bf16.mxu1 %v6851_v61  ;;  %v6867_v61 = vpack.c.bf16 %v995_v25, %v991_v15  ;;  %v6881_v15 = vpack.c.bf16 %v1018_v34, %v1014_v45  ;;  %v1021_v25 = vld [vmem:[%s9986_s28 + $0x408] sm:$0xff]  ;;  %v1047_v34 = vld [vmem:[%s9986_s28 + $0x4d8] sm:$0xff] }
 0x28b   :  { %6738 = vmatpush1.bf16.msra.mxu0 %v6737_v53  ;;  %v1023_v53 = vld [vmem:[%s9986_s28 + $0x418] sm:$0xff]  ;;  %v1049_v45 = vld [vmem:[%s9986_s28 + $0x4e8] sm:$0xff] }
 0x28c   :  { %6740 = vmatprep.subr.bf16.mxu0 %v6739_v31  ;;  %v1027_v31 = vld [vmem:[%s9986_s28 + $0x438] sm:$0xff] }
 0x28d   :  { %6854 = vmatpush1.bf16.msra.mxu1 %v6853_v26  ;;  %v6869_v26 = vpack.c.bf16 %v994_v2, %v990_v41  ;;  %v6883_v54 = vpack.c.bf16 %v1027_v31, %v1023_v53  ;;  %v761_v2 = vld [vmem:[%s9987_s2 + $0x8] sm:$0xff]  ;;  %v1044_v53 = vld [vmem:[%s9986_s28 + $0x4c0] sm:$0xff]  ;;  %s9989_s2 = smov 111  }
 0x28e   :  { %6856 = vmatprep.subr.bf16.mxu1 %v6855_v27  ;;  %v6871_v27 = vpack.c.bf16 %v1003_v50, %v999_v32  ;;  %v763_v32 = vld [vmem:[%s9985_s29 + $0x8] sm:$0xff]  ;;  %s7570_s29 = smov 109  }
 0x28f   :  { %6742 = vmatpush1.bf16.msra.mxu0 %v6741_v37 }
 0x290   :  { %6744 = vmatprep.subr.bf16.mxu0 %v6743_v43  ;;  %v1020_v43 = vld [vmem:[%s9986_s28 + $0x400] sm:$0xff] }
 0x291   :  { %6858 = vmatpush1.bf16.msra.mxu1 %v6857_v44  ;;  %v6873_v44 = vpack.c.bf16 %v1002_v30, %v998_v3  ;;  %v1022_v3 = vld [vmem:[%s9986_s28 + $0x410] sm:$0xff] }
 0x292   :  { %6860 = vmatprep.subr.bf16.mxu1 %v6859_v60 }
 0x293   :  { %6746 = vmatpush1.bf16.msra.mxu0 %v6745_v28 }
 0x294   :  { %6748 = vmatprep.subr.bf16.mxu0 %v6747_v22 }
 0x295   :  { %6862 = vmatpush1.bf16.msra.mxu1 %v6861_v55  ;;  %v1017_v55 = vld [vmem:[%s9986_s28 + $0x3e8] sm:$0xff] }
 0x296   :  { %6864 = vmatprep.subr.bf16.mxu1 %v6863_v58  ;;  %v6879_v58 = vpack.c.bf16 %v1019_v62, %v1015_v24  ;;  %v1036_v24 = vld [vmem:[%s9986_s28 + $0x480] sm:$0xff] }
 0x297   :  { %6750 = vmatpush1.bf16.msra.mxu0 %v6749_v11  ;;  %v1041_v11 = vld [vmem:[%s9986_s28 + $0x4a8] sm:$0xff] }
 0x298   :  { %v6763_v62 = vpack.c.bf16 %v1041_v11, %v1037_v63  ;;  %v1075_v63 = vld [vmem:[%s9986_s28 + $0x5b8] sm:$0xff] }
 0x299   :  { %6866 = vmatpush1.bf16.msra.mxu1 %v6865_v1 }
 0x29a   :  { %6868 = vmatprep.subr.bf16.mxu1 %v6867_v61 }
 0x29d   :  { %6870 = vmatpush1.bf16.msra.mxu1 %v6869_v26 }
 0x29e   :  { %6872 = vmatprep.subr.bf16.mxu1 %v6871_v27 }
 0x2a1   :  { %6874 = vmatpush1.bf16.msra.mxu1 %v6873_v44  ;;  %v6757_v44 = vpack.c.bf16 %v1024_v51, %v1020_v43  ;;  %v1056_v43 = vld [vmem:[%s9986_s28 + $0x520] sm:$0xff] }
 0x2a2   :  { %v834_v48 = vpop.xlane.xlu0 %833  ;;  %6876 = vmatprep.subr.bf16.mxu1 %v6875_v7  ;;  %v1032_v7 = vld [vmem:[%s9986_s28 + $0x460] sm:$0xff] }
 0x2a3   :  { %v840_v29 = vmul.f32 0.0025510204, %v834_v48  ;;  %v1013_v48 = vld [vmem:[%s9986_s28 + $0x3c8] sm:$0xff] }
 0x2a4   :  { %v6751_v17 = vpack.c.bf16 %v1017_v55, %v1013_v48  ;;  %v6889_v55 = vpack.c.bf16 %v1034_v19, %v1030_v0  ;;  %v1073_v0 = vld [vmem:[%s9986_s28 + $0x5a8] sm:$0xff]  ;;  %v1071_v19 = vld [vmem:[%s9986_s28 + $0x598] sm:$0xff] }
 0x2a5   :  { %v842_v52 = vadd.f32 1e-05, %v840_v29  ;;  %6878 = vmatpush1.bf16.msra.mxu1 %v6877_v21  ;;  %v1016_v29 = vld [vmem:[%s9986_s28 + $0x3e0] sm:$0xff]  ;;  %v1043_v21 = vld [vmem:[%s9986_s28 + $0x4b8] sm:$0xff] }
 0x2a6   :  { %v6753_v36 = vpack.c.bf16 %v1016_v29, %v1012_v59  ;;  %6752 = vmatprep.subr.bf16.mxu0 %v6751_v17  ;;  %6880 = vmatprep.subr.bf16.mxu1 %v6879_v58  ;;  %v1040_v17 = vld [vmem:[%s9986_s28 + $0x4a0] sm:$0xff]  ;;  %v6891_v59 = vpack.c.bf16 %v1043_v21, %v1039_v38  ;;  %v1038_v29 = vld [vmem:[%s9986_s28 + $0x490] sm:$0xff] }
 0x2a7   :  { %7480 = vrsqrt.f32 %v842_v52  ;;  %v1025_v52 = vld [vmem:[%s9986_s28 + $0x428] sm:$0xff]  ;;  %v1042_v58 = vld [vmem:[%s9986_s28 + $0x4b0] sm:$0xff]  ;;  %v1068_v21 = vld [vmem:[%s9986_s28 + $0x580] sm:$0xff] }
 0x2a8   :  { %6754 = vmatpush1.bf16.msra.mxu0 %v6753_v36  ;;  %v6755_v1 = vpack.c.bf16 %v1025_v52, %v1021_v25  ;;  %v1045_v36 = vld [vmem:[%s9986_s28 + $0x4c8] sm:$0xff]  ;;  %v6765_v25 = vpack.c.bf16 %v1040_v17, %v1036_v24  ;;  %v6893_v52 = vpack.c.bf16 %v1042_v58, %v1038_v29  ;;  %v6907_v24 = vpack.c.bf16 %v1075_v63, %v1071_v19  ;;  %v1070_v17 = vld [vmem:[%s9986_s28 + $0x590] sm:$0xff]  ;;  %v1079_v58 = vld [vmem:[%s9986_s28 + $0x5d8] sm:$0xff] }
 0x2a9   :  { %6882 = vmatpush1.bf16.msra.mxu1 %v6881_v15  ;;  %v1051_v15 = vld [vmem:[%s9986_s28 + $0x4f8] sm:$0xff]  ;;  %v6767_v31 = vpack.c.bf16 %v1049_v45, %v1045_v36  ;;  %v1081_v29 = vld [vmem:[%s9986_s28 + $0x5e8] sm:$0xff]  ;;  %v1100_v63 = vld [vmem:[%s9986_s28 + $0x680] sm:$0xff] }
 0x2aa   :  { %6756 = vmatprep.subr.bf16.mxu0 %v6755_v1  ;;  %6884 = vmatprep.subr.bf16.mxu1 %v6883_v54  ;;  %v1048_v1 = vld [vmem:[%s9986_s28 + $0x4e0] sm:$0xff]  ;;  %v6895_v54 = vpack.c.bf16 %v1051_v15, %v1047_v34  ;;  %v1083_v36 = vld [vmem:[%s9986_s28 + $0x5f8] sm:$0xff] }
 0x2ab   :  { %v1076_v15 = vld [vmem:[%s9986_s28 + $0x5c0] sm:$0xff] }
 0x2b1   :  { %v7481_v5 = vpop.eup %7480 }
 0x2b2   :  { %v846_v60 = vmul.f32 %v7481_v5, %v760_v8  ;;  %v1028_v8 = vld [vmem:[%s9986_s28 + $0x440] sm:$0xff] }
 0x2b3   :  { %v6761_v48 = vpack.c.bf16 %v1032_v7, %v1028_v8  ;;  %v1062_v7 = vld [vmem:[%s9986_s28 + $0x550] sm:$0xff] }
 0x2b4   :  { %850 = vperm.xlu1 %7429, %v846_v60   ;;  %v6887_v60 = vpack.c.bf16 %v1035_v6, %v1031_v33  ;;  %v1067_v33 = vld [vmem:[%s9986_s28 + $0x578] sm:$0xff] }
 0x2f0   :  { %v839_v40 = vpop.xlane.xlu0 %838 }
 0x2f1   :  { %v841_v41 = vmul.f32 0.0025510204, %v839_v40  ;;  %v1046_v40 = vld [vmem:[%s9986_s28 + $0x4d0] sm:$0xff] }
 0x2f3   :  { %v843_v61 = vadd.f32 1e-05, %v841_v41  ;;  %v1050_v41 = vld [vmem:[%s9986_s28 + $0x4f0] sm:$0xff] }
 0x2f5   :  { %7482 = vrsqrt.f32 %v843_v61  ;;  %v1053_v61 = vld [vmem:[%s9986_s28 + $0x508] sm:$0xff] }
 0x2f8   :  { %v8650_v49 = vpop.permute.xlu0 %868 }
 0x2ff   :  { %v7483_v20 = vpop.eup %7482 }
 0x300   :  { %v847_v16 = vmul.f32 %v7483_v20, %v761_v2  ;;  %v1057_v2 = vld [vmem:[%s9986_s28 + $0x528] sm:$0xff]  ;;  %v1055_v20 = vld [vmem:[%s9986_s28 + $0x518] sm:$0xff] }
 0x301   :  { %v6771_v51 = vpack.c.bf16 %v1057_v2, %v1053_v61  ;;  %v1091_v61 = vld [vmem:[%s9986_s28 + $0x638] sm:$0xff] }
 0x302   :  { %855 = vperm.xlu1 %7429, %v847_v16   ;;  %v1059_v16 = vld [vmem:[%s9986_s28 + $0x538] sm:$0xff] }
 0x306   :  { %873 = vperm.xlu1 %7429, %v763_v32   ;;  %v6769_v32 = vpack.c.bf16 %v1048_v1, %v1044_v53  ;;  %v6911_v53 = vpack.c.bf16 %v1083_v36, %v1079_v58  ;;  %v1078_v1 = vld [vmem:[%s9986_s28 + $0x5d0] sm:$0xff]  ;;  %v1108_v36 = vld [vmem:[%s9986_s28 + $0x6c0] sm:$0xff] }
 0x333   :  { %v8638_v50 = vpop.permute.xlu1 %850 }
 0x334   :  { %v859_v37 = vmul.f32 %v8638_v50, %v8198_v12  ;;  %v858_v26 = vmul.f32 %v8638_v50, %v8195_v9  ;;  %v1026_v12 = vld [vmem:[%s9986_s28 + $0x430] sm:$0xff]  ;;  %v1029_v9 = vld [vmem:[%s9986_s28 + $0x448] sm:$0xff] }
 0x335   :  { %v6885_v22 = vpack.c.bf16 %v1026_v12, %v1022_v3  ;;  %v6759_v5 = vpack.c.bf16 %v1033_v4, %v1029_v9  ;;  %v6899_v3 = vpack.c.bf16 %v1059_v16, %v1055_v20  ;;  %v1054_v12 = vld [vmem:[%s9986_s28 + $0x510] sm:$0xff]  ;;  %v1063_v4 = vld [vmem:[%s9986_s28 + $0x558] sm:$0xff]  ;;  %v1084_v16 = vld [vmem:[%s9986_s28 + $0x600] sm:$0xff] }
 0x336   :  { %v877_v27 = vadd.f32 %v8650_v49, %v859_v37  ;;  %v876_v30 = vadd.f32 %v8650_v49, %v858_v26  ;;  %v6897_v37 = vpack.c.bf16 %v1050_v41, %v1046_v40  ;;  %v1052_v26 = vld [vmem:[%s9986_s28 + $0x500] sm:$0xff]  ;;  %v1058_v9 = vld [vmem:[%s9986_s28 + $0x530] sm:$0xff]  ;;  %v6903_v8 = vpack.c.bf16 %v1067_v33, %v1063_v4  ;;  %v1089_v40 = vld [vmem:[%s9986_s28 + $0x628] sm:$0xff] }
 0x337   :  { %v6773_v6 = vpack.c.bf16 %v1056_v43, %v1052_v26  ;;  %v1087_v41 = vld [vmem:[%s9986_s28 + $0x618] sm:$0xff]  ;;  %v1086_v43 = vld [vmem:[%s9986_s28 + $0x610] sm:$0xff]  ;;  %v1092_v33 = vld [vmem:[%s9986_s28 + $0x640] sm:$0xff] }
 0x338   :  { %v885_v56 = vmax.f32 %v877_v27, 0.0  ;;  %v884_v28 = vmax.f32 %v876_v30, 0.0  ;;  %v1061_v27 = vld [vmem:[%s9986_s28 + $0x548] sm:$0xff]  ;;  %v6915_v26 = vpack.c.bf16 %v1091_v61, %v1087_v41  ;;  %v1116_v61 = vld [vmem:[%s9986_s28 + $0x700] sm:$0xff] }
 0x339   :  { %v1065_v30 = vld [vmem:[%s9986_s28 + $0x568] sm:$0xff] }
 0x33a   :  { %1212 = vmatprep.mubr.f32.mxu0 %v885_v56  ;;  %1366 = vmatprep.mubr.f32.mxu1 %v885_v56  ;;  %v6901_v56 = vpack.c.bf16 %v1058_v9, %v1054_v12  ;;  %v1097_v12 = vld [vmem:[%s9986_s28 + $0x668] sm:$0xff]  ;;  %v1095_v9 = vld [vmem:[%s9986_s28 + $0x658] sm:$0xff] }
 0x33b   :  { %1213 = vmatmul.mubr.f32.vlgmr.msra.gmra.mrb[0].mxu0 %v884_v28  ;;  %1367 = vmatmul.mubr.f32.vlgmr.msra.gmra.mrb[0].mxu1 %v884_v28  ;;  %v1060_v28 = vld [vmem:[%s9986_s28 + $0x540] sm:$0xff] }
 0x33c   :  { %6758 = vmatpush1.bf16.msra.mxu0 %v6757_v44  ;;  %6886 = vmatpush1.bf16.msra.mxu1 %v6885_v22  ;;  %v1064_v44 = vld [vmem:[%s9986_s28 + $0x560] sm:$0xff]  ;;  %v6775_v22 = vpack.c.bf16 %v1065_v30, %v1061_v27  ;;  %v1099_v27 = vld [vmem:[%s9986_s28 + $0x678] sm:$0xff] }
 0x33d   :  { %6760 = vmatprep.subr.bf16.mxu0 %v6759_v5  ;;  %6888 = vmatprep.subr.bf16.mxu1 %v6887_v60  ;;  %v1066_v5 = vld [vmem:[%s9986_s28 + $0x570] sm:$0xff]  ;;  %v1069_v60 = vld [vmem:[%s9986_s28 + $0x588] sm:$0xff]  ;;  %v6777_v11 = vpack.c.bf16 %v1064_v44, %v1060_v28  ;;  %v6919_v28 = vpack.c.bf16 %v1099_v27, %v1095_v9  ;;  %v1124_v27 = vld [vmem:[%s9986_s28 + $0x740] sm:$0xff] }
 0x33e   :  { %v6905_v38 = vpack.c.bf16 %v1066_v5, %v1062_v7  ;;  %v1094_v44 = vld [vmem:[%s9986_s28 + $0x650] sm:$0xff]  ;;  %v1105_v7 = vld [vmem:[%s9986_s28 + $0x6a8] sm:$0xff]  ;;  %v1103_v5 = vld [vmem:[%s9986_s28 + $0x698] sm:$0xff] }
 0x340   :  { %6762 = vmatpush1.bf16.msra.mxu0 %v6761_v48  ;;  %6890 = vmatpush1.bf16.msra.mxu1 %v6889_v55  ;;  %v1072_v48 = vld [vmem:[%s9986_s28 + $0x5a0] sm:$0xff]  ;;  %v6779_v55 = vpack.c.bf16 %v1073_v0, %v1069_v60  ;;  %v1107_v60 = vld [vmem:[%s9986_s28 + $0x6b8] sm:$0xff] }
 0x341   :  { %6764 = vmatprep.subr.bf16.mxu0 %v6763_v62  ;;  %6892 = vmatprep.subr.bf16.mxu1 %v6891_v59  ;;  %v1074_v62 = vld [vmem:[%s9986_s28 + $0x5b0] sm:$0xff]  ;;  %v1077_v59 = vld [vmem:[%s9986_s28 + $0x5c8] sm:$0xff]  ;;  %v6781_v45 = vpack.c.bf16 %v1072_v48, %v1068_v21  ;;  %v6923_v21 = vpack.c.bf16 %v1107_v60, %v1103_v5  ;;  %v1132_v60 = vld [vmem:[%s9986_s28 + $0x780] sm:$0xff] }
 0x342   :  { %v6909_v34 = vpack.c.bf16 %v1074_v62, %v1070_v17  ;;  %v1102_v48 = vld [vmem:[%s9986_s28 + $0x690] sm:$0xff]  ;;  %v1113_v17 = vld [vmem:[%s9986_s28 + $0x6e8] sm:$0xff]  ;;  %v1111_v62 = vld [vmem:[%s9986_s28 + $0x6d8] sm:$0xff] }
 0x344   :  { %6766 = vmatpush1.bf16.msra.mxu0 %v6765_v25  ;;  %6894 = vmatpush1.bf16.msra.mxu1 %v6893_v52  ;;  %v1080_v25 = vld [vmem:[%s9986_s28 + $0x5e0] sm:$0xff]  ;;  %v6783_v52 = vpack.c.bf16 %v1081_v29, %v1077_v59  ;;  %v1115_v59 = vld [vmem:[%s9986_s28 + $0x6f8] sm:$0xff] }
 0x345   :  { %6768 = vmatprep.subr.bf16.mxu0 %v6767_v31  ;;  %6896 = vmatprep.subr.bf16.mxu1 %v6895_v54  ;;  %v1082_v31 = vld [vmem:[%s9986_s28 + $0x5f0] sm:$0xff]  ;;  %v1085_v54 = vld [vmem:[%s9986_s28 + $0x608] sm:$0xff]  ;;  %v6785_v2 = vpack.c.bf16 %v1080_v25, %v1076_v15  ;;  %v6927_v15 = vpack.c.bf16 %v1115_v59, %v1111_v62  ;;  %v1140_v59 = vld [vmem:[%s9986_s28 + $0x7c0] sm:$0xff] }
 0x346   :  { %v6913_v20 = vpack.c.bf16 %v1082_v31, %v1078_v1  ;;  %v1110_v25 = vld [vmem:[%s9986_s28 + $0x6d0] sm:$0xff]  ;;  %v1121_v1 = vld [vmem:[%s9986_s28 + $0x728] sm:$0xff]  ;;  %v1119_v31 = vld [vmem:[%s9986_s28 + $0x718] sm:$0xff] }
 0x348   :  { %6770 = vmatpush1.bf16.msra.mxu0 %v6769_v32  ;;  %6898 = vmatpush1.bf16.msra.mxu1 %v6897_v37  ;;  %v1088_v32 = vld [vmem:[%s9986_s28 + $0x620] sm:$0xff]  ;;  %v6787_v37 = vpack.c.bf16 %v1089_v40, %v1085_v54  ;;  %v1123_v54 = vld [vmem:[%s9986_s28 + $0x738] sm:$0xff] }
 0x349   :  { %6772 = vmatprep.subr.bf16.mxu0 %v6771_v51  ;;  %6900 = vmatprep.subr.bf16.mxu1 %v6899_v3  ;;  %v1090_v51 = vld [vmem:[%s9986_s28 + $0x630] sm:$0xff]  ;;  %v1093_v3 = vld [vmem:[%s9986_s28 + $0x648] sm:$0xff]  ;;  %v6789_v30 = vpack.c.bf16 %v1088_v32, %v1084_v16  ;;  %v6931_v16 = vpack.c.bf16 %v1123_v54, %v1119_v31  ;;  %v860_v54 = vmul.f32 %v8638_v50, %v8201_v42 }
 0x34a   :  { %v6917_v4 = vpack.c.bf16 %v1090_v51, %v1086_v43  ;;  %v1118_v32 = vld [vmem:[%s9986_s28 + $0x710] sm:$0xff]  ;;  %v1129_v43 = vld [vmem:[%s9986_s28 + $0x768] sm:$0xff]  ;;  %v1127_v51 = vld [vmem:[%s9986_s28 + $0x758] sm:$0xff] }
 0x34c   :  { %6774 = vmatpush1.bf16.msra.mxu0 %v6773_v6  ;;  %6902 = vmatpush1.bf16.msra.mxu1 %v6901_v56  ;;  %v1096_v6 = vld [vmem:[%s9986_s28 + $0x660] sm:$0xff]  ;;  %v6791_v56 = vpack.c.bf16 %v1097_v12, %v1093_v3  ;;  %v1131_v3 = vld [vmem:[%s9986_s28 + $0x778] sm:$0xff] }
 0x34d   :  { %6776 = vmatprep.subr.bf16.mxu0 %v6775_v22  ;;  %6904 = vmatprep.subr.bf16.mxu1 %v6903_v8  ;;  %v1098_v22 = vld [vmem:[%s9986_s28 + $0x670] sm:$0xff]  ;;  %v1101_v8 = vld [vmem:[%s9986_s28 + $0x688] sm:$0xff]  ;;  %v6793_v0 = vpack.c.bf16 %v1096_v6, %v1092_v33  ;;  %v6935_v33 = vpack.c.bf16 %v1131_v3, %v1127_v51 }
 0x34e   :  { %v6921_v19 = vpack.c.bf16 %v1098_v22, %v1094_v44  ;;  %v1126_v6 = vld [vmem:[%s9986_s28 + $0x750] sm:$0xff]  ;;  %v1137_v44 = vld [vmem:[%s9986_s28 + $0x7a8] sm:$0xff]  ;;  %v1135_v22 = vld [vmem:[%s9986_s28 + $0x798] sm:$0xff] }
 0x350   :  { %6778 = vmatpush1.bf16.msra.mxu0 %v6777_v11  ;;  %6906 = vmatpush1.bf16.msra.mxu1 %v6905_v38  ;;  %v1104_v11 = vld [vmem:[%s9986_s28 + $0x6a0] sm:$0xff]  ;;  %v6795_v38 = vpack.c.bf16 %v1105_v7, %v1101_v8  ;;  %v1139_v8 = vld [vmem:[%s9986_s28 + $0x7b8] sm:$0xff] }
 0x351   :  { %6780 = vmatprep.subr.bf16.mxu0 %v6779_v55  ;;  %6908 = vmatprep.subr.bf16.mxu1 %v6907_v24  ;;  %v1106_v55 = vld [vmem:[%s9986_s28 + $0x6b0] sm:$0xff]  ;;  %v1109_v24 = vld [vmem:[%s9986_s28 + $0x6c8] sm:$0xff]  ;;  %v6797_v29 = vpack.c.bf16 %v1104_v11, %v1100_v63  ;;  %v6939_v63 = vpack.c.bf16 %v1139_v8, %v1135_v22 }
 0x352   :  { %v6925_v58 = vpack.c.bf16 %v1106_v55, %v1102_v48  ;;  %v1134_v11 = vld [vmem:[%s9986_s28 + $0x790] sm:$0xff]  ;;  %v1145_v48 = vld [vmem:[%s9986_s28 + $0x7e8] sm:$0xff]  ;;  %v1143_v55 = vld [vmem:[%s9986_s28 + $0x7d8] sm:$0xff] }
 0x354   :  { %6782 = vmatpush1.bf16.msra.mxu0 %v6781_v45  ;;  %6910 = vmatpush1.bf16.msra.mxu1 %v6909_v34  ;;  %v1112_v45 = vld [vmem:[%s9986_s28 + $0x6e0] sm:$0xff]  ;;  %v6799_v34 = vpack.c.bf16 %v1113_v17, %v1109_v24  ;;  %v1147_v24 = vld [vmem:[%s9986_s28 + $0x7f8] sm:$0xff] }
 0x355   :  { %6784 = vmatprep.subr.bf16.mxu0 %v6783_v52  ;;  %6912 = vmatprep.subr.bf16.mxu1 %v6911_v53  ;;  %v1114_v52 = vld [vmem:[%s9986_s28 + $0x6f0] sm:$0xff]  ;;  %v1117_v53 = vld [vmem:[%s9986_s28 + $0x708] sm:$0xff]  ;;  %v6801_v40 = vpack.c.bf16 %v1112_v45, %v1108_v36  ;;  %v1144_v36 = vld [vmem:[%s9986_s28 + $0x7e0] sm:$0xff] }
 0x356   :  { %v6929_v41 = vpack.c.bf16 %v1114_v52, %v1110_v25  ;;  %v1142_v45 = vld [vmem:[%s9986_s28 + $0x7d0] sm:$0xff] }
 0x358   :  { %6786 = vmatpush1.bf16.msra.mxu0 %v6785_v2  ;;  %6914 = vmatpush1.bf16.msra.mxu1 %v6913_v20  ;;  %v1120_v2 = vld [vmem:[%s9986_s28 + $0x720] sm:$0xff]  ;;  %v6803_v20 = vpack.c.bf16 %v1121_v1, %v1117_v53  ;;  %v861_v53 = vmul.f32 %v8638_v50, %v8204_v46 }
 0x359   :  { %6788 = vmatprep.subr.bf16.mxu0 %v6787_v37  ;;  %6916 = vmatprep.subr.bf16.mxu1 %v6915_v26  ;;  %v1122_v37 = vld [vmem:[%s9986_s28 + $0x730] sm:$0xff]  ;;  %v1125_v26 = vld [vmem:[%s9986_s28 + $0x748] sm:$0xff]  ;;  %v6805_v12 = vpack.c.bf16 %v1120_v2, %v1116_v61 }
 0x35a   :  { %v6933_v9 = vpack.c.bf16 %v1122_v37, %v1118_v32  ;;  %v879_v2 = vadd.f32 %v8650_v49, %v861_v53  ;;  %v878_v37 = vadd.f32 %v8650_v49, %v860_v54  ;;  %v7568_v49 = vmov 0.0  }
 0x35b   :  { %1461 = vst.msk [vmem:[#allocation2 + $0x20] sm:$0xff] %vm1460_vm8, %v7568_v49  ;;  %1466 = vst.msk [vmem:[#allocation2 + $0x48] sm:$0xff] %vm1460_vm8, %v7568_v49  ;;  %vm4574_vm8 = vcmask 875520  }
 0x35c   :  { %6790 = vmatpush1.bf16.msra.mxu0 %v6789_v30  ;;  %6918 = vmatpush1.bf16.msra.mxu1 %v6917_v4  ;;  %v1128_v30 = vld [vmem:[%s9986_s28 + $0x760] sm:$0xff]  ;;  %v6807_v4 = vpack.c.bf16 %v1129_v43, %v1125_v26  ;;  %v887_v46 = vmax.f32 %v879_v2, 0.0  ;;  %v886_v42 = vmax.f32 %v878_v37, 0.0 }
 0x35d   :  { %6792 = vmatprep.subr.bf16.mxu0 %v6791_v56  ;;  %6920 = vmatprep.subr.bf16.mxu1 %v6919_v28  ;;  %v1130_v56 = vld [vmem:[%s9986_s28 + $0x770] sm:$0xff]  ;;  %v1133_v28 = vld [vmem:[%s9986_s28 + $0x788] sm:$0xff]  ;;  %v6809_v7 = vpack.c.bf16 %v1128_v30, %v1124_v27 }
 0x35e   :  { %v6937_v5 = vpack.c.bf16 %v1130_v56, %v1126_v6 }
 0x360   :  { %6794 = vmatpush1.bf16.msra.mxu0 %v6793_v0  ;;  %6922 = vmatpush1.bf16.msra.mxu1 %v6921_v19  ;;  %v1136_v0 = vld [vmem:[%s9986_s28 + $0x7a0] sm:$0xff]  ;;  %v6811_v19 = vpack.c.bf16 %v1137_v44, %v1133_v28 }
 0x361   :  { %6796 = vmatprep.subr.bf16.mxu0 %v6795_v38  ;;  %6924 = vmatprep.subr.bf16.mxu1 %v6923_v21  ;;  %v1138_v38 = vld [vmem:[%s9986_s28 + $0x7b0] sm:$0xff]  ;;  %v1141_v21 = vld [vmem:[%s9986_s28 + $0x7c8] sm:$0xff]  ;;  %v6813_v17 = vpack.c.bf16 %v1136_v0, %v1132_v60 }
 0x362   :  { %v6941_v62 = vpack.c.bf16 %v1138_v38, %v1134_v11  ;;  %v1519_v28 = vld [vmem:[#allocation2 + $0x20] sm:$0xff]  ;;  %v1520_v44 = vld [vmem:[#allocation2 + $0x48] sm:$0xff] }
 0x363   :  { %v9058_v22 = vpack.c.bf16 %v1520_v44, %v1519_v28 }
 0x364   :  { %6798 = vmatpush1.bf16.msra.mxu0 %v6797_v29  ;;  %6926 = vmatpush1.bf16.msra.mxu1 %v6925_v58  ;;  %v6815_v29 = vpack.c.bf16 %v1145_v48, %v1141_v21  ;;  %v6943_v58 = vpack.c.bf16 %v1147_v24, %v1143_v55 }
 0x365   :  { %6800 = vmatprep.subr.bf16.mxu0 %v6799_v34  ;;  %6928 = vmatprep.subr.bf16.mxu1 %v6927_v15  ;;  %v1146_v34 = vld [vmem:[%s9986_s28 + $0x7f0] sm:$0xff]  ;;  %v6817_v15 = vpack.c.bf16 %v1144_v36, %v1140_v59  ;;  %s7569_s28 = smov 125  }
 0x366   :  { %v6945_v25 = vpack.c.bf16 %v1146_v34, %v1142_v45 }
 0x368   :  { %6802 = vmatpush1.bf16.msra.mxu0 %v6801_v40  ;;  %6930 = vmatpush1.bf16.msra.mxu1 %v6929_v41 }
 0x369   :  { %6804 = vmatprep.subr.bf16.mxu0 %v6803_v20  ;;  %6932 = vmatprep.subr.bf16.mxu1 %v6931_v16 }
 0x36c   :  { %6806 = vmatpush1.bf16.msra.mxu0 %v6805_v12  ;;  %6934 = vmatpush1.bf16.msra.mxu1 %v6933_v9 }
 0x36d   :  { %6808 = vmatprep.subr.bf16.mxu0 %v6807_v4  ;;  %6936 = vmatprep.subr.bf16.mxu1 %v6935_v33 }
 0x370   :  { %6810 = vmatpush1.bf16.msra.mxu0 %v6809_v7  ;;  %6938 = vmatpush1.bf16.msra.mxu1 %v6937_v5 }
 0x371   :  { %6812 = vmatprep.subr.bf16.mxu0 %v6811_v19  ;;  %6940 = vmatprep.subr.bf16.mxu1 %v6939_v63 }
 0x374   :  { %6814 = vmatpush1.bf16.msra.mxu0 %v6813_v17  ;;  %6942 = vmatpush1.bf16.msra.mxu1 %v6941_v62 }
 0x375   :  { %6816 = vmatprep.subr.bf16.mxu0 %v6815_v29  ;;  %6944 = vmatprep.subr.bf16.mxu1 %v6943_v58 }
 0x378   :  { %6818 = vmatpush1.bf16.msra.mxu0 %v6817_v15  ;;  %6946 = vmatpush1.bf16.msra.mxu1 %v6945_v25 }
 0x381   :  { %v856_v52 = vpop.permute.xlu1 %855 }
 0x382   :  { %v863_v1 = vmul.f32 %v856_v52, %v8216_v47  ;;  %v862_v31 = vmul.f32 %v856_v52, %v8214_v35  ;;  %v865_v32 = vmul.f32 %v856_v52, %v8220_v57  ;;  %v864_v35 = vmul.f32 %v856_v52, %v8218_v39 }
 0x385   :  { %v874_v40 = vpop.permute.xlu1 %873 }
 0x386   :  { %v881_v41 = vadd.f32 %v874_v40, %v863_v1  ;;  %v880_v61 = vadd.f32 %v874_v40, %v862_v31  ;;  %v883_v47 = vadd.f32 %v874_v40, %v865_v32  ;;  %v882_v50 = vadd.f32 %v874_v40, %v864_v35 }
 0x388   :  { %v889_v20 = vmax.f32 %v881_v41, 0.0  ;;  %v888_v16 = vmax.f32 %v880_v61, 0.0  ;;  %v891_v26 = vmax.f32 %v883_v47, 0.0  ;;  %v890_v57 = vmax.f32 %v882_v50, 0.0 }
 0x38a   :  { %1218 = vmatprep.mubr.f32.mxu0 %v889_v20  ;;  %1372 = vmatprep.mubr.f32.mxu1 %v889_v20 }
 0x38b   :  { %1219 = vmatmul.mubr.f32.gmra.mrb[2].mxu0 %v888_v16  ;;  %1373 = vmatmul.mubr.f32.gmra.mrb[2].mxu1 %v888_v16 }
 0x38c   :  { %1289 = vmatprep.mubr.f32.mxu0 %v887_v46  ;;  %1443 = vmatprep.mubr.f32.mxu1 %v887_v46 }
 0x38f   :  { %1290 = vmatmul.mubr.f32.vlgmr.msra.gmra.mrb[0].mxu0 %v886_v42  ;;  %1444 = vmatmul.mubr.f32.vlgmr.msra.gmra.mrb[0].mxu1 %v886_v42 }
 0x390   :  { %1295 = vmatprep.mubr.f32.mxu0 %v891_v26  ;;  %1449 = vmatprep.mubr.f32.mxu1 %v891_v26 }
 0x393   :  { %1296 = vmatmul.mubr.f32.gmra.mrb[2].mxu0 %v890_v57  ;;  %1450 = vmatmul.mubr.f32.gmra.mrb[2].mxu1 %v890_v57 }
 0x394   :  { %1587 = vmatprep.mubr.bf16.mxu1 %v7559_v10  ;;  %1794 = vmatprep.mubr.bf16.mxu0 %v7559_v10 }
 0x462   :  { %v1291_v39 = vpop.f32.mrb[0].mxu0  ;;  %v1445_v43 = vpop.f32.mrb[0].mxu1 }
 0x463   :  { %v1293_v51 = vpop.f32.mrb[1].mxu0  ;;  %v1447_v3 = vpop.f32.mrb[1].mxu1 }
 0x466   :  { %v1297_v12 = vpop.f32.mrb[2].mxu0  ;;  %v1451_v9 = vpop.f32.mrb[2].mxu1 }
 0x467   :  { %v9034_v27 = vpack.c.bf16 %v1297_v12, %v1291_v39  ;;  %v9036_v30 = vpack.c.bf16 %v1451_v9, %v1445_v43  ;;  %v1299_v4 = vpop.f32.mrb[3].mxu0  ;;  %v1453_v33 = vpop.f32.mrb[3].mxu1 }
 0x468   :  { %v9038_v6 = vpack.c.bf16 %v1299_v4, %v1293_v51  ;;  %v9040_v56 = vpack.c.bf16 %v1453_v33, %v1447_v3 }
 0x469   :  { %1744 = vrot.lane.b32.xlu0 %v9036_v30, %s7561_s30  ;;  %1536 = vrot.lane.b32.xlu1 %v9036_v30, %s7560_s9 }
 0x46d   :  { %1746 = vrot.lane.b32.xlu0 %v9040_v56, %s7561_s30  ;;  %1532 = vrot.lane.b32.xlu1 %v9034_v27, %s7560_s9 }
 0x471   :  { %1863 = vrot.lane.b32.xlu0 %v9038_v6, %s7569_s28  ;;  %1534 = vrot.lane.b32.xlu1 %v9038_v6, %s7560_s9 }
 0x475   :  { %1861 = vrot.lane.b32.xlu0 %v9034_v27, %s7569_s28  ;;  %1538 = vrot.lane.b32.xlu1 %v9040_v56, %s7560_s9 }
 0x479   :  { %1869 = vrot.lane.b32.xlu0 %v9058_v22, %s7569_s28  ;;  %1540 = vrot.lane.b32.xlu1 %v9058_v22, %s7560_s9 }
 0x47d   :  { %1986 = vrot.lane.b32.xlu0 %v9036_v30, %s9988_s0  ;;  %1742 = vrot.lane.b32.xlu1 %v9038_v6, %s7561_s30 }
 0x481   :  { %1988 = vrot.lane.b32.xlu0 %v9040_v56, %s9988_s0  ;;  %1740 = vrot.lane.b32.xlu1 %v9034_v27, %s7561_s30 }
 0x485   :  { %2105 = vrot.lane.b32.xlu0 %v9038_v6, %s9989_s2  ;;  %1748 = vrot.lane.b32.xlu1 %v9058_v22, %s7561_s30 }
 0x489   :  { %2103 = vrot.lane.b32.xlu0 %v9034_v27, %s9989_s2  ;;  %1865 = vrot.lane.b32.xlu1 %v9036_v30, %s7569_s28 }
 0x48d   :  { %2111 = vrot.lane.b32.xlu0 %v9058_v22, %s9989_s2  ;;  %1867 = vrot.lane.b32.xlu1 %v9040_v56, %s7569_s28 }
 0x491   :  { %2228 = vrot.lane.b32.xlu0 %v9036_v30, %s9990_s7  ;;  %1984 = vrot.lane.b32.xlu1 %v9038_v6, %s9988_s0 }
 0x495   :  { %2230 = vrot.lane.b32.xlu0 %v9040_v56, %s9990_s7  ;;  %1982 = vrot.lane.b32.xlu1 %v9034_v27, %s9988_s0 }
 0x499   :  { %2347 = vrot.lane.b32.xlu0 %v9038_v6, %s7570_s29  ;;  %1990 = vrot.lane.b32.xlu1 %v9058_v22, %s9988_s0  ;;  %s9994_s0 = sld [smem:[#allocation16_spill]] }
 0x49d   :  { %2345 = vrot.lane.b32.xlu0 %v9034_v27, %s7570_s29  ;;  %2107 = vrot.lane.b32.xlu1 %v9036_v30, %s9989_s2 }
 0x49f   :  { %v7430_v38 = vld [vmem:[%s9994_s0 + $0x8] sm:$0xff]   ;;  %v7431_v15 = vld [vmem:[%s9994_s0 + $0x10] sm:$0xff]   ;;  %v7432_v25 = vld [vmem:[%s9994_s0] sm:$0xff]  }
 0x4a0   :  { %v7433_v20 = vld [vmem:[%s9994_s0 + $0x18] sm:$0xff]   ;;  %v7434_v39 = vld [vmem:[%s9994_s0 + $0x20] sm:$0xff]   ;;  %v7435_v28 = vld [vmem:[%s9994_s0 + $0x28] sm:$0xff]  }
 0x4a1   :  { %2353 = vrot.lane.b32.xlu0 %v9058_v22, %s7570_s29  ;;  %2109 = vrot.lane.b32.xlu1 %v9040_v56, %s9989_s2  ;;  %s7575_s2 = smov 77  }
 0x4a5   :  { %2470 = vrot.lane.b32.xlu0 %v9036_v30, %s9991_s4  ;;  %2226 = vrot.lane.b32.xlu1 %v9038_v6, %s9990_s7 }
 0x4a9   :  { %2472 = vrot.lane.b32.xlu0 %v9040_v56, %s9991_s4  ;;  %2224 = vrot.lane.b32.xlu1 %v9034_v27, %s9990_s7 }
 0x4ad   :  { %2589 = vrot.lane.b32.xlu0 %v9038_v6, %s9992_s3  ;;  %2232 = vrot.lane.b32.xlu1 %v9058_v22, %s9990_s7 }
 0x4b1   :  { %2587 = vrot.lane.b32.xlu0 %v9034_v27, %s9992_s3  ;;  %2349 = vrot.lane.b32.xlu1 %v9036_v30, %s7570_s29 }
 0x4b5   :  { %2595 = vrot.lane.b32.xlu0 %v9058_v22, %s9992_s3  ;;  %2351 = vrot.lane.b32.xlu1 %v9040_v56, %s7570_s29 }
 0x4b9   :  { %2712 = vrot.lane.b32.xlu0 %v9036_v30, %s9993_s1  ;;  %2468 = vrot.lane.b32.xlu1 %v9038_v6, %s9991_s4 }
 0x4bd   :  { %2714 = vrot.lane.b32.xlu0 %v9040_v56, %s9993_s1  ;;  %2466 = vrot.lane.b32.xlu1 %v9034_v27, %s9991_s4 }
 0x4c1   :  { %2831 = vrot.lane.b32.xlu0 %v9038_v6, %s7571_s27  ;;  %2474 = vrot.lane.b32.xlu1 %v9058_v22, %s9991_s4  ;;  %s7577_s4 = smov 118  }
 0x4c5   :  { %2829 = vrot.lane.b32.xlu0 %v9034_v27, %s7571_s27  ;;  %2591 = vrot.lane.b32.xlu1 %v9036_v30, %s9992_s3 }
 0x4c9   :  { %2837 = vrot.lane.b32.xlu0 %v9058_v22, %s7571_s27  ;;  %2593 = vrot.lane.b32.xlu1 %v9040_v56, %s9992_s3  ;;  %s7579_s3 = smov 116  }
 0x4cd   :  { %2954 = vrot.lane.b32.xlu0 %v9036_v30, %s7572_s10  ;;  %2710 = vrot.lane.b32.xlu1 %v9038_v6, %s9993_s1 }
 0x4d1   :  { %2956 = vrot.lane.b32.xlu0 %v9040_v56, %s7572_s10  ;;  %2708 = vrot.lane.b32.xlu1 %v9034_v27, %s9993_s1 }
 0x4d5   :  { %3073 = vrot.lane.b32.xlu0 %v9038_v6, %s7573_s6  ;;  %2716 = vrot.lane.b32.xlu1 %v9058_v22, %s9993_s1  ;;  %s9995_s1 = sld [smem:[#allocation18_spill]] }
 0x4d9   :  { %3071 = vrot.lane.b32.xlu0 %v9034_v27, %s7573_s6  ;;  %2833 = vrot.lane.b32.xlu1 %v9036_v30, %s7571_s27 }
 0x4db   :  { %v9156_v8 = vpop.permute.xlu0 %1744  ;;  %v1537_v7 = vpop.permute.xlu1 %1536 }
 0x4dd   :  { %3079 = vrot.lane.b32.xlu0 %v9058_v22, %s7573_s6  ;;  %2835 = vrot.lane.b32.xlu1 %v9040_v56, %s7571_s27  ;;  %s7582_s27 = smov 101  }
 0x4df   :  { %v9161_v5 = vpop.permute.xlu0 %1746  ;;  %v1533_v60 = vpop.permute.xlu1 %1532 }
 0x4e0   :  { %v1753_v32 = vsel %vm297_vm1, %v9156_v8, %v9161_v5 }
 0x4e1   :  { %3196 = vrot.lane.b32.xlu0 %v9036_v30, %s7574_s22  ;;  %2952 = vrot.lane.b32.xlu1 %v9038_v6, %s7572_s10 }
 0x4e3   :  { %v1864_v0 = vpop.permute.xlu0 %1863  ;;  %v1535_v19 = vpop.permute.xlu1 %1534 }
 0x4e4   :  { %v1544_v63 = vsel %vm224_vm0, %v1535_v19, %v1537_v7  ;;  %v1543_v11 = vsel %vm224_vm0, %v1533_v60, %v1535_v19 }
 0x4e5   :  { %3198 = vrot.lane.b32.xlu0 %v9040_v56, %s7574_s22  ;;  %2950 = vrot.lane.b32.xlu1 %v9034_v27, %s7572_s10 }
 0x4e6   :  { %1555 = vmatprep.subr.bf16.mxu1 %v1544_v63 }
 0x4e7   :  { %1556 = vmatpush1.bf16.msra.mxu1 %v1543_v11  ;;  %v1862_v21 = vpop.permute.xlu0 %1861  ;;  %v1539_v48 = vpop.permute.xlu1 %1538  ;;  %v7436_v11 = vld [vmem:[%s9994_s0 + $0x30] sm:$0xff]  }
 0x4e8   :  { %v1545_v62 = vsel %vm224_vm0, %v1537_v7, %v1539_v48  ;;  %v1872_v41 = vsel %vm1871_vm10, %v1862_v21, %v1864_v0 }
 0x4e9   :  { %3315 = vrot.lane.b32.xlu0 %v9038_v6, %s7575_s2  ;;  %2958 = vrot.lane.b32.xlu1 %v9058_v22, %s7572_s10  ;;  %s7583_s10 = smov 100  }
 0x4ea   :  { %6403 = vmatmul.mubr.msk.bf16.vlgmr.msra.gmra.mrb[4].mxu1 %vm1551_vm9, %v7430_v38 }
 0x4eb   :  { %v1870_v55 = vpop.permute.xlu0 %1869  ;;  %v1541_v24 = vpop.permute.xlu1 %1540  ;;  %1630 = vmatprep.mubr.bf16.mxu1 %v7559_v10 }
 0x4ec   :  { %v1546_v17 = vsel %vm224_vm0, %v1539_v48, %v1541_v24 }
 0x4ed   :  { %3313 = vrot.lane.b32.xlu0 %v9034_v27, %s7575_s2  ;;  %3075 = vrot.lane.b32.xlu1 %v9036_v30, %s7573_s6 }
 0x4ee   :  { %1598 = vmatprep.subr.bf16.mxu1 %v1546_v17 }
 0x4ef   :  { %1599 = vmatpush1.bf16.msra.mxu1 %v1545_v62  ;;  %v9188_v59 = vpop.permute.xlu0 %1986  ;;  %v1743_v29 = vpop.permute.xlu1 %1742 }
 0x4f0   :  { %1649 = vmatprep.subr.bf16.mxu1 %v9038_v6  ;;  %v1752_v58 = vsel %vm297_vm1, %v1743_v29, %v9156_v8 }
 0x4f1   :  { %3077 = vrot.lane.b32.xlu1 %v9040_v56, %s7573_s6  ;;  %1762 = vmatprep.subr.bf16.mxu0 %v1752_v58  ;;  %v7437_v58 = vld [vmem:[%s9994_s0 + $0x38] sm:$0xff]   ;;  %s9996_s6 = sld [smem:[#allocation17_spill]] }
 0x4f2   :  { %6404 = vmatmul.mubr.msk.bf16.vlgmr.msra.gmra.mrb[8].mxu1 %vm1551_vm9, %v7430_v38  ;;  %3321 = vrot.lane.b32.xlu0 %v9058_v22, %s7575_s2 }
 0x4f3   :  { %1650 = vmatpush1.bf16.msra.mxu1 %v9034_v27  ;;  %v9199_v36 = vpop.permute.xlu0 %1988  ;;  %v1741_v45 = vpop.permute.xlu1 %1740  ;;  %1681 = vmatprep.mubr.bf16.mxu1 %v7559_v10 }
 0x4f4   :  { %1692 = vmatprep.subr.bf16.mxu1 %v9040_v56  ;;  %v1751_v34 = vsel %vm297_vm1, %v1741_v45, %v1743_v29  ;;  %v1995_v44 = vsel %vm370_vm2, %v9188_v59, %v9199_v36 }
 0x4f5   :  { %3194 = vrot.lane.b32.xlu1 %v9038_v6, %s7574_s22  ;;  %1763 = vmatpush1.bf16.msra.mxu0 %v1751_v34 }
 0x4f7   :  { %v2106_v52 = vpop.permute.xlu0 %2105  ;;  %v1749_v53 = vpop.permute.xlu1 %1748 }
 0x4f8   :  { %6409 = vmatmul.mubr.msk.bf16.vlgmr.msra.gmra.mrb[4].mxu0 %vm1551_vm9, %v7431_v15  ;;  %v1754_v1 = vsel %vm297_vm1, %v9161_v5, %v1749_v53 }
 0x4f9   :  { %3192 = vrot.lane.b32.xlu1 %v9034_v27, %s7574_s22  ;;  %1915 = vmatprep.mubr.bf16.mxu0 %v7559_v10 }
 0x4fa   :  { %6406 = vmatmul.mubr.msk.bf16.vlgmr.msra.gmra.mrb[4].mxu1 %vm1551_vm9, %v7432_v25 }
 0x4fb   :  { %1693 = vmatpush1.bf16.msra.mxu1 %v9036_v30  ;;  %v2104_v31 = vpop.permute.xlu0 %2103  ;;  %v1866_v54 = vpop.permute.xlu1 %1865  ;;  %1724 = vmatprep.mubr.bf16.mxu1 %v7559_v10 }
 0x4fc   :  { %1805 = vmatprep.subr.bf16.mxu1 %v1754_v1  ;;  %v1873_v40 = vsel %vm1871_vm10, %v1864_v0, %v1866_v54  ;;  %v2114_v27 = vsel %vm443_vm3, %v2104_v31, %v2106_v52 }
 0x4fd   :  { %3200 = vrot.lane.b32.xlu1 %v9058_v22, %s7574_s22  ;;  %1883 = vmatprep.subr.bf16.mxu0 %v1873_v40  ;;  %s7585_s22 = smov 98  }
 0x4fe   :  { %1884 = vmatpush1.bf16.msra.mxu0 %v1872_v41 }
 0x4ff   :  { %v2112_v61 = vpop.permute.xlu0 %2111  ;;  %v1868_v2 = vpop.permute.xlu1 %1867 }
 0x500   :  { %v1875_v16 = vsel %vm1871_vm10, %v1868_v2, %v1870_v55  ;;  %v1874_v51 = vsel %vm1871_vm10, %v1866_v54, %v1868_v2  ;;  %v7438_v54 = vld [vmem:[%s9994_s0 + $0x40] sm:$0xff]  }
 0x501   :  { %3317 = vrot.lane.b32.xlu1 %v9036_v30, %s7575_s2 }
 0x502   :  { %6407 = vmatmul.mubr.msk.bf16.vlgmr.msra.gmra.mrb[8].mxu1 %vm1551_vm9, %v7432_v25 }
 0x503   :  { %1806 = vmatpush1.bf16.msra.mxu1 %v1753_v32  ;;  %v9235_v37 = vpop.permute.xlu0 %2228  ;;  %v1985_v46 = vpop.permute.xlu1 %1984  ;;  %1837 = vmatprep.mubr.bf16.mxu1 %v7559_v10 }
 0x504   :  { %1926 = vmatprep.subr.bf16.mxu1 %v1875_v16  ;;  %6412 = vmatmul.mubr.msk.bf16.vlgmr.msra.gmra.mrb[4].mxu0 %vm1551_vm9, %v7433_v20  ;;  %v1994_v47 = vsel %vm370_vm2, %v1985_v46, %v9188_v59 }
 0x505   :  { %3319 = vrot.lane.b32.xlu1 %v9040_v56, %s7575_s2  ;;  %2004 = vmatprep.subr.bf16.mxu0 %v1994_v47  ;;  %v7439_v47 = vld [vmem:[%s9994_s0 + $0x48] sm:$0xff]   ;;  %s9997_s2 = sld [smem:[#allocation21_spill]] }
 0x506   :  { %2036 = vmatprep.mubr.bf16.mxu0 %v7559_v10 }
 0x507   :  { %v9244_v35 = vpop.permute.xlu0 %2230  ;;  %v1983_v42 = vpop.permute.xlu1 %1982 }
 0x508   :  { %v1993_v50 = vsel %vm370_vm2, %v1983_v42, %v1985_v46 }
 0x509   :  { %2005 = vmatpush1.bf16.msra.mxu0 %v1993_v50 }
 0x50b   :  { %v2348_v26 = vpop.permute.xlu0 %2347  ;;  %v1991_v57 = vpop.permute.xlu1 %1990 }
 0x50c   :  { %v1996_v43 = vsel %vm370_vm2, %v9199_v36, %v1991_v57  ;;  %v2237_v36 = vsel %vm516_vm4, %v9235_v37, %v9244_v35  ;;  %vm3323_vm2 = vcmask 629760  }
 0x50e   :  { %6410 = vmatmul.mubr.msk.bf16.vlgmr.msra.gmra.mrb[8].mxu1 %vm1551_vm9, %v7431_v15 }
 0x50f   :  { %1927 = vmatpush1.bf16.msra.mxu1 %v1874_v51  ;;  %v2346_v3 = vpop.permute.xlu0 %2345  ;;  %v2108_v12 = vpop.permute.xlu1 %2107  ;;  %1958 = vmatprep.mubr.bf16.mxu1 %v7559_v10 }
 0x510   :  { %2047 = vmatprep.subr.bf16.mxu1 %v1996_v43  ;;  %6415 = vmatmul.mubr.msk.bf16.vlgmr.msra.gmra.mrb[4].mxu0 %vm1551_vm9, %v7434_v39  ;;  %v2115_v9 = vsel %vm443_vm3, %v2106_v52, %v2108_v12  ;;  %v2356_v55 = vsel %vm2355_vm11, %v2346_v3, %v2348_v26 }
 0x511   :  { %2125 = vmatprep.subr.bf16.mxu0 %v2115_v9  ;;  %2157 = vmatprep.mubr.bf16.mxu0 %v7559_v10 }
 0x512   :  { %2126 = vmatpush1.bf16.msra.mxu0 %v2114_v27 }
 0x513   :  { %v2354_v30 = vpop.permute.xlu0 %2353  ;;  %v2110_v4 = vpop.permute.xlu1 %2109 }
 0x514   :  { %v2117_v22 = vsel %vm443_vm3, %v2110_v4, %v2112_v61  ;;  %v2116_v38 = vsel %vm443_vm3, %v2108_v12, %v2110_v4  ;;  %v7440_v12 = vld [vmem:[%s9994_s0 + $0x50] sm:$0xff]   ;;  %vm3844_vm3 = vcmask 523264  }
 0x515   :  { %3845 = vst.msk [vmem:[#allocation3 + $0x8] sm:$0xff] %vm3844_vm3, %v7568_v49  ;;  %3847 = vst.msk [vmem:[#allocation3 + $0x18] sm:$0xff] %vm3844_vm3, %v7568_v49  ;;  %vm7588_vm3 = vmmov 0  }
 0x517   :  { %v9259_v33 = vpop.permute.xlu0 %2470  ;;  %v2227_v6 = vpop.permute.xlu1 %2226 }
 0x518   :  { %v2236_v56 = vsel %vm516_vm4, %v2227_v6, %v9235_v37 }
 0x519   :  { %2246 = vmatprep.subr.bf16.mxu0 %v2236_v56 }
 0x51a   :  { %6413 = vmatmul.mubr.msk.bf16.vlgmr.msra.gmra.mrb[8].mxu1 %vm1551_vm9, %v7433_v20 }
 0x51b   :  { %2048 = vmatpush1.bf16.msra.mxu1 %v1995_v44  ;;  %v2225_v8 = vpop.permute.xlu1 %2224  ;;  %2079 = vmatprep.mubr.bf16.mxu1 %v7559_v10  ;;  %v9272_v7 = vpop.permute.xlu0 %2472 }
 0x51c   :  { %2168 = vmatprep.subr.bf16.mxu1 %v2117_v22  ;;  %v2235_v5 = vsel %vm516_vm4, %v2225_v8, %v2227_v6  ;;  %6418 = vmatmul.mubr.msk.bf16.vlgmr.msra.gmra.mrb[4].mxu0 %vm1551_vm9, %v7435_v28  ;;  %v7441_v22 = vld [vmem:[%s9994_s0 + $0x58] sm:$0xff]  }
 0x51d   :  { %2247 = vmatpush1.bf16.msra.mxu0 %v2235_v5  ;;  %2278 = vmatprep.mubr.bf16.mxu0 %v7559_v10 }
 0x51f   :  { %v2233_v60 = vpop.permute.xlu1 %2232  ;;  %v2590_v0 = vpop.permute.xlu0 %2589 }
 0x520   :  { %v2238_v21 = vsel %vm516_vm4, %v9244_v35, %v2233_v60  ;;  %v2479_v35 = vsel %vm589_vm5, %v9259_v33, %v9272_v7 }
 0x523   :  { %v2350_v19 = vpop.permute.xlu1 %2349  ;;  %v2588_v24 = vpop.permute.xlu0 %2587 }
 0x524   :  { %v2357_v63 = vsel %vm2355_vm11, %v2348_v26, %v2350_v19  ;;  %v2598_v2 = vsel %vm662_vm6, %v2588_v24, %v2590_v0 }
 0x525   :  { %2367 = vmatprep.subr.bf16.mxu0 %v2357_v63 }
 0x526   :  { %6416 = vmatmul.mubr.msk.bf16.vlgmr.msra.gmra.mrb[8].mxu1 %vm1551_vm9, %v7434_v39 }
 0x527   :  { %2169 = vmatpush1.bf16.msra.mxu1 %v2116_v38  ;;  %v2352_v48 = vpop.permute.xlu1 %2351  ;;  %2200 = vmatprep.mubr.bf16.mxu1 %v7559_v10  ;;  %v2596_v59 = vpop.permute.xlu0 %2595  ;;  %v7442_v38 = vld [vmem:[%s9994_s0 + $0x60] sm:$0xff]  }
 0x528   :  { %2289 = vmatprep.subr.bf16.mxu1 %v2238_v21  ;;  %6421 = vmatmul.mubr.msk.bf16.vlgmr.msra.gmra.mrb[4].mxu0 %vm1551_vm9, %v7436_v11  ;;  %v2359_v45 = vsel %vm2355_vm11, %v2352_v48, %v2354_v30  ;;  %v2358_v40 = vsel %vm2355_vm11, %v2350_v19, %v2352_v48 }
 0x529   :  { %2368 = vmatpush1.bf16.msra.mxu0 %v2356_v55  ;;  %2399 = vmatprep.mubr.bf16.mxu0 %v7559_v10 }
 0x52b   :  { %v2469_v17 = vpop.permute.xlu1 %2468  ;;  %v9300_v15 = vpop.permute.xlu0 %2712 }
 0x52c   :  { %v2478_v62 = vsel %vm589_vm5, %v2469_v17, %v9259_v33 }
 0x52d   :  { %2488 = vmatprep.subr.bf16.mxu0 %v2478_v62 }
 0x52f   :  { %v2467_v29 = vpop.permute.xlu1 %2466  ;;  %v2715_v1 = vpop.permute.xlu0 %2714 }
 0x530   :  { %v2477_v25 = vsel %vm589_vm5, %v2467_v29, %v2469_v17  ;;  %v2721_v8 = vsel %vm735_vm7, %v9300_v15, %v2715_v1 }
 0x532   :  { %6419 = vmatmul.mubr.msk.bf16.vlgmr.msra.gmra.mrb[8].mxu1 %vm1551_vm9, %v7435_v28 }
 0x533   :  { %2290 = vmatpush1.bf16.msra.mxu1 %v2237_v36  ;;  %v2475_v34 = vpop.permute.xlu1 %2474  ;;  %2321 = vmatprep.mubr.bf16.mxu1 %v7559_v10  ;;  %v2832_v20 = vpop.permute.xlu0 %2831 }
 0x534   :  { %2410 = vmatprep.subr.bf16.mxu1 %v2359_v45  ;;  %6424 = vmatmul.mubr.msk.bf16.vlgmr.msra.gmra.mrb[4].mxu0 %vm1551_vm9, %v7437_v58  ;;  %v2480_v41 = vsel %vm589_vm5, %v9272_v7, %v2475_v34  ;;  %vm3849_vm5 = vcmask 277504  }
 0x535   :  { %2489 = vmatpush1.bf16.msra.mxu0 %v2477_v25  ;;  %2520 = vmatprep.mubr.bf16.mxu0 %v7559_v10 }
 0x537   :  { %v2592_v52 = vpop.permute.xlu1 %2591  ;;  %v2830_v37 = vpop.permute.xlu0 %2829 }
 0x538   :  { %v2599_v53 = vsel %vm662_vm6, %v2590_v0, %v2592_v52  ;;  %v2840_v4 = vsel %vm2839_vm12, %v2830_v37, %v2832_v20 }
 0x539   :  { %2609 = vmatprep.subr.bf16.mxu0 %v2599_v53  ;;  %v7444_v53 = vld [vmem:[%s9994_s0 + $0x70] sm:$0xff]  }
 0x53b   :  { %v2594_v31 = vpop.permute.xlu1 %2593  ;;  %v2838_v26 = vpop.permute.xlu0 %2837 }
 0x53c   :  { %v2601_v42 = vsel %vm662_vm6, %v2594_v31, %v2596_v59  ;;  %v2600_v9 = vsel %vm662_vm6, %v2592_v52, %v2594_v31  ;;  %vm4261_vm6 = vcmask 957440  }
 0x53e   :  { %6422 = vmatmul.mubr.msk.bf16.vlgmr.msra.gmra.mrb[8].mxu1 %vm1551_vm9, %v7436_v11 }
 0x53f   :  { %2411 = vmatpush1.bf16.msra.mxu1 %v2358_v40  ;;  %v2711_v61 = vpop.permute.xlu1 %2710  ;;  %2442 = vmatprep.mubr.bf16.mxu1 %v7559_v10  ;;  %v2955_v51 = vpop.permute.xlu0 %2954 }
 0x540   :  { %2531 = vmatprep.subr.bf16.mxu1 %v2480_v41  ;;  %6427 = vmatmul.mubr.msk.bf16.vlgmr.msra.gmra.mrb[4].mxu0 %vm1551_vm9, %v7438_v54  ;;  %v2720_v16 = vsel %vm735_vm7, %v2711_v61, %v9300_v15 }
 0x541   :  { %2610 = vmatpush1.bf16.msra.mxu0 %v2598_v2  ;;  %2641 = vmatprep.mubr.bf16.mxu0 %v7559_v10  ;;  %v7445_v2 = vld [vmem:[%s9994_s0 + $0x78] sm:$0xff]  }
 0x542   :  { %2730 = vmatprep.subr.bf16.mxu0 %v2720_v16 }
 0x543   :  { %v2709_v32 = vpop.permute.xlu1 %2708  ;;  %v2957_v33 = vpop.permute.xlu0 %2956 }
 0x544   :  { %v2719_v57 = vsel %vm735_vm7, %v2709_v32, %v2711_v61  ;;  %v2963_v45 = vsel %vm2960_vm13, %v2955_v51, %v2957_v33 }
 0x547   :  { %v2717_v46 = vpop.permute.xlu1 %2716  ;;  %v3074_v28 = vpop.permute.xlu0 %3073 }
 0x548   :  { %v2722_v27 = vsel %vm735_vm7, %v2715_v1, %v2717_v46  ;;  %vm4324_vm7 = vcmask 949248  }
 0x54a   :  { %6425 = vmatmul.mubr.msk.bf16.vlgmr.msra.gmra.mrb[8].mxu1 %vm1551_vm9, %v7437_v58  ;;  %v7443_v58 = vld [vmem:[%s9994_s0 + $0x68] sm:$0xff]   ;;  %s7576_s0 = smov 119  }
 0x54b   :  { %2532 = vmatpush1.bf16.msra.mxu1 %v2479_v35  ;;  %v2834_v50 = vpop.permute.xlu1 %2833  ;;  %2563 = vmatprep.mubr.bf16.mxu1 %v7559_v10  ;;  %v3072_v60 = vpop.permute.xlu0 %3071 }
 0x54c   :  { %2652 = vmatprep.subr.bf16.mxu1 %v2601_v42  ;;  %6430 = vmatmul.mubr.msk.bf16.vlgmr.msra.gmra.mrb[4].mxu0 %vm1551_vm9, %v7439_v47  ;;  %v2841_v39 = vsel %vm2839_vm12, %v2832_v20, %v2834_v50  ;;  %v3082_v24 = vsel %vm3081_vm14, %v3072_v60, %v3074_v28 }
 0x54d   :  { %2731 = vmatpush1.bf16.msra.mxu0 %v2719_v57  ;;  %2762 = vmatprep.mubr.bf16.mxu0 %v7559_v10 }
 0x54e   :  { %2851 = vmatprep.subr.bf16.mxu0 %v2841_v39 }
 0x54f   :  { %v2836_v43 = vpop.permute.xlu1 %2835  ;;  %v3080_v11 = vpop.permute.xlu0 %3079 }
 0x550   :  { %v2843_v7 = vsel %vm2839_vm12, %v2836_v43, %v2838_v26  ;;  %v2842_v48 = vsel %vm2839_vm12, %v2834_v50, %v2836_v43  ;;  %vm4763_vm12 = vcmask 809984  }
 0x553   :  { %v2953_v3 = vpop.permute.xlu1 %2952  ;;  %v3197_v17 = vpop.permute.xlu0 %3196 }
 0x554   :  { %v2962_v6 = vsel %vm2960_vm13, %v2953_v3, %v2955_v51 }
 0x556   :  { %6428 = vmatmul.mubr.msk.bf16.vlgmr.msra.gmra.mrb[8].mxu1 %vm1551_vm9, %v7438_v54 }
 0x557   :  { %2653 = vmatpush1.bf16.msra.mxu1 %v2600_v9  ;;  %v2951_v30 = vpop.permute.xlu1 %2950  ;;  %2684 = vmatprep.mubr.bf16.mxu1 %v7559_v10  ;;  %v3199_v29 = vpop.permute.xlu0 %3198 }
 0x558   :  { %2773 = vmatprep.subr.bf16.mxu1 %v2722_v27  ;;  %6433 = vmatmul.mubr.msk.bf16.vlgmr.msra.gmra.mrb[4].mxu0 %vm1551_vm9, %v7440_v12  ;;  %v2961_v0 = vsel %vm2960_vm13, %v2951_v30, %v2953_v3  ;;  %v3205_v20 = vsel %vm3202_vm15, %v3197_v17, %v3199_v29 }
 0x559   :  { %2852 = vmatpush1.bf16.msra.mxu0 %v2840_v4  ;;  %2883 = vmatprep.mubr.bf16.mxu0 %v7559_v10 }
 0x55a   :  { %2972 = vmatprep.subr.bf16.mxu0 %v2962_v6 }
 0x55b   :  { %v2959_v56 = vpop.permute.xlu1 %2958  ;;  %v3316_v15 = vpop.permute.xlu0 %3315 }
 0x55c   :  { %v2964_v55 = vsel %vm2960_vm13, %v2957_v33, %v2959_v56  ;;  %vm4826_vm13 = vcmask 801792  }
 0x55f   :  { %v3076_v44 = vpop.permute.xlu1 %3075  ;;  %v3314_v1 = vpop.permute.xlu0 %3313 }
 0x560   :  { %v3083_v19 = vsel %vm3081_vm14, %v3074_v28, %v3076_v44  ;;  %v3324_v40 = vsel %vm3323_vm2, %v3314_v1, %v3316_v15 }
 0x562   :  { %6431 = vmatmul.mubr.msk.bf16.vlgmr.msra.gmra.mrb[8].mxu1 %vm1551_vm9, %v7439_v47 }
 0x563   :  { %2774 = vmatpush1.bf16.msra.mxu1 %v2721_v8  ;;  %v3078_v5 = vpop.permute.xlu1 %3077  ;;  %2805 = vmatprep.mubr.bf16.mxu1 %v7559_v10 }
 0x564   :  { %2894 = vmatprep.subr.bf16.mxu1 %v2843_v7  ;;  %6436 = vmatmul.mubr.msk.bf16.vlgmr.msra.gmra.mrb[4].mxu0 %vm1551_vm9, %v7441_v22  ;;  %v3085_v34 = vsel %vm3081_vm14, %v3078_v5, %v3080_v11  ;;  %v3084_v31 = vsel %vm3081_vm14, %v3076_v44, %v3078_v5  ;;  %v3322_v41 = vpop.permute.xlu0 %3321  ;;  %vm4923_vm14 = vcmask 1041408  }
 0x565   :  { %2973 = vmatpush1.bf16.msra.mxu0 %v2961_v0  ;;  %3004 = vmatprep.mubr.bf16.mxu0 %v7559_v10 }
 0x566   :  { %3093 = vmatprep.subr.bf16.mxu0 %v3083_v19 }
 0x567   :  { %v3195_v63 = vpop.permute.xlu1 %3194 }
 0x568   :  { %v3204_v62 = vsel %vm3202_vm15, %v3195_v63, %v3197_v17 }
 0x56b   :  { %v3193_v21 = vpop.permute.xlu1 %3192 }
 0x56c   :  { %v3203_v25 = vsel %vm3202_vm15, %v3193_v21, %v3195_v63 }
 0x56e   :  { %6434 = vmatmul.mubr.msk.bf16.vlgmr.msra.gmra.mrb[8].mxu1 %vm1551_vm9, %v7440_v12  ;;  %v3433_v12 = vld [vmem:[%s9944_s23] sm:$0xf]  ;;  %s7578_s23 = smov 117  }
 0x56f   :  { %2895 = vmatpush1.bf16.msra.mxu1 %v2842_v48  ;;  %2926 = vmatprep.mubr.bf16.mxu1 %v7559_v10  ;;  %v3201_v59 = vpop.permute.xlu1 %3200  ;;  %v3438_v9 = vrot.slane %v3433_v12, %v7750_v14  ;;  %v3442_v27 = vrot.slane %v3433_v12, %v7748_v13  ;;  %v3446_v33 = vrot.slane %v3433_v12, %v7761_v18 }
 0x570   :  { %3015 = vmatprep.subr.bf16.mxu1 %v2964_v55  ;;  %6439 = vmatmul.mubr.msk.bf16.vlgmr.msra.gmra.mrb[4].mxu0 %vm1551_vm9, %v7442_v38  ;;  %v3206_v54 = vsel %vm3202_vm15, %v3199_v29, %v3201_v59  ;;  %v3450_v6 = vrot.slane %v3433_v12, %v7768_v23  ;;  %v3563_v12 = vld [vmem:[#allocation5 + $0x10] sm:$0xff]  ;;  %vm5003_vm15 = vcmask 506880  }
 0x571   :  { %3094 = vmatpush1.bf16.msra.mxu0 %v3082_v24  ;;  %3125 = vmatprep.mubr.bf16.mxu0 %v7559_v10  ;;  %5004 = vst.msk [vmem:[#allocation4] sm:$0xff] %vm5003_vm15, %v7568_v49  ;;  %5005 = vst.msk [vmem:[#allocation4 + $0x8] sm:$0xff] %vm5003_vm15, %v7568_v49 }
 0x572   :  { %3214 = vmatprep.subr.bf16.mxu0 %v3204_v62 }
 0x573   :  { %v3318_v36 = vpop.permute.xlu1 %3317 }
 0x574   :  { %v3325_v52 = vsel %vm3323_vm2, %v3316_v15, %v3318_v36 }
 0x577   :  { %v3320_v61 = vpop.permute.xlu1 %3319 }
 0x578   :  { %v3327_v16 = vsel %vm3323_vm2, %v3320_v61, %v3322_v41  ;;  %v3326_v32 = vsel %vm3323_vm2, %v3318_v36, %v3320_v61  ;;  %vm5014_vm2 = vcmask 457776  }
 0x57a   :  { %6437 = vmatmul.mubr.msk.bf16.vlgmr.msra.gmra.mrb[8].mxu1 %vm1551_vm9, %v7441_v22 }
 0x57b   :  { %3016 = vmatpush1.bf16.msra.mxu1 %v2963_v45  ;;  %3047 = vmatprep.mubr.bf16.mxu1 %v7559_v10 }
 0x57c   :  { %3136 = vmatprep.subr.bf16.mxu1 %v3085_v34  ;;  %6442 = vmatmul.mubr.msk.bf16.vlgmr.msra.gmra.mrb[4].mxu0 %vm1551_vm9, %v7443_v58 }
 0x57d   :  { %3215 = vmatpush1.bf16.msra.mxu0 %v3203_v25  ;;  %3246 = vmatprep.mubr.bf16.mxu0 %v7559_v10 }
 0x57e   :  { %3335 = vmatprep.subr.bf16.mxu0 %v3325_v52 }
 0x586   :  { %6440 = vmatmul.mubr.msk.bf16.vlgmr.msra.gmra.mrb[8].mxu1 %vm1551_vm9, %v7442_v38 }
 0x587   :  { %3137 = vmatpush1.bf16.msra.mxu1 %v3084_v31  ;;  %3168 = vmatprep.mubr.bf16.mxu1 %v7559_v10 }
 0x588   :  { %3257 = vmatprep.subr.bf16.mxu1 %v3206_v54  ;;  %6445 = vmatmul.mubr.msk.bf16.vlgmr.msra.gmra.mrb[4].mxu0 %vm1551_vm9, %v7444_v53 }
 0x589   :  { %3336 = vmatpush1.bf16.msra.mxu0 %v3324_v40  ;;  %3367 = vmatprep.mubr.bf16.mxu0 %v7559_v10 }
 0x592   :  { %6443 = vmatmul.mubr.msk.bf16.vlgmr.msra.gmra.mrb[8].mxu1 %vm1551_vm9, %v7443_v58 }
 0x593   :  { %3258 = vmatpush1.bf16.msra.mxu1 %v3205_v20  ;;  %3289 = vmatprep.mubr.bf16.mxu1 %v7559_v10 }
 0x594   :  { %3378 = vmatprep.subr.bf16.mxu1 %v3327_v16  ;;  %6448 = vmatmul.mubr.msk.bf16.vlgmr.msra.gmra.mrb[4].mxu0 %vm1551_vm9, %v7445_v2 }
 0x59e   :  { %6446 = vmatmul.mubr.msk.bf16.vlgmr.msra.gmra.mrb[8].mxu1 %vm1551_vm9, %v7444_v53 }
 0x59f   :  { %3379 = vmatpush1.bf16.msra.mxu1 %v3326_v32  ;;  %3410 = vmatprep.mubr.bf16.mxu1 %v7559_v10 }
 0x5aa   :  { %6449 = vmatmul.mubr.msk.bf16.vlgmr.msra.gmra.mrb[8].mxu1 %vm1551_vm9, %v7445_v2 }
 0x5ab   :  { %3940 = vmatprep.mubr.bf16.mxu1 %v7559_v10 }
 0x5cd   :  { %v1683_v37 = vpop.f32.mrb[4].mxu1 }
 0x5ce   :  { %v1685_v46 = vpop.f32.mrb[5].mxu1 }
 0x5cf   :  { %v1687_v47 = vpop.f32.mrb[6].mxu1 }
 0x5d0   :  { %v1689_v35 = vpop.f32.mrb[7].mxu1 }
 0x667   :  { %v3369_v42 = vpop.f32.mrb[4].mxu0 }
 0x668   :  { %v7112_v50 = vadd.f32 %v3369_v42, %v1683_v37  ;;  %v3371_v26 = vpop.f32.mrb[5].mxu0 }
 0x669   :  { %v7113_v57 = vadd.f32 %v3371_v26, %v1685_v46  ;;  %v3373_v39 = vpop.f32.mrb[6].mxu0 }
 0x66a   :  { %v7114_v43 = vadd.f32 %v3373_v39, %v1687_v47  ;;  %v3375_v51 = vpop.f32.mrb[7].mxu0  ;;  %v3455_v30 = vmul.f32 %v7112_v50, %v3438_v9  ;;  %v3562_v39 = vld [vmem:[#allocation5 + $0x8] sm:$0xff] }
 0x66b   :  { %v7115_v3 = vadd.f32 %v3375_v51, %v1689_v35  ;;  %v3456_v4 = vmul.f32 %v7113_v57, %v3442_v27  ;;  %v3561_v51 = vld [vmem:[#allocation5] sm:$0xff] }
 0x66c   :  { %v3459_v56 = vmul.f32 %v7114_v43, %v3438_v9 }
 0x66d   :  { %v3460_v28 = vmul.f32 %v7115_v3, %v3442_v27  ;;  %v3463_v22 = vadd.f32 %v3456_v4, %v3455_v30  ;;  %v6949_v30 = vpack.c.bf16 %v3563_v12, %v3561_v51  ;;  %v3599_v12 = vld [vmem:[#allocation5 + $0x130] sm:$0xff] }
 0x66f   :  { %v3468_v0 = vadd.f32 %v3460_v28, %v3459_v56  ;;  %v3570_v56 = vld [vmem:[#allocation5 + $0x48] sm:$0xff]  ;;  %v3572_v28 = vld [vmem:[#allocation5 + $0x58] sm:$0xff] }
 0x67d   :  { %v3412_v44 = vpop.f32.mrb[8].mxu1 }
 0x67e   :  { %v3457_v8 = vmul.f32 %v3446_v33, %v3412_v44  ;;  %v3414_v7 = vpop.f32.mrb[9].mxu1 }
 0x67f   :  { %v3458_v5 = vmul.f32 %v3450_v6, %v3414_v7  ;;  %v3416_v60 = vpop.f32.mrb[10].mxu1 }
 0x680   :  { %v3464_v19 = vadd.f32 %v3463_v22, %v3457_v8  ;;  %v3461_v63 = vmul.f32 %v3446_v33, %v3416_v60  ;;  %v3418_v14 = vpop.f32.mrb[11].mxu1  ;;  %v6955_v22 = vpack.c.bf16 %v3572_v28, %v3570_v56  ;;  %v3569_v8 = vld [vmem:[#allocation5 + $0x40] sm:$0xff]  ;;  %v3606_v56 = vld [vmem:[#allocation5 + $0x168] sm:$0xff]  ;;  %v3608_v28 = vld [vmem:[#allocation5 + $0x178] sm:$0xff] }
 0x681   :  { %v3462_v11 = vmul.f32 %v3450_v6, %v3418_v14 }
 0x682   :  { %v3465_v13 = vadd.f32 %v3464_v19, %v3458_v5  ;;  %v3469_v38 = vadd.f32 %v3468_v0, %v3461_v63  ;;  %v3574_v5 = vld [vmem:[#allocation5 + $0x68] sm:$0xff]  ;;  %v3573_v63 = vld [vmem:[#allocation5 + $0x60] sm:$0xff] }
 0x684   :  { %v3470_v21 = vadd.f32 %v3469_v38, %v3462_v11  ;;  %3466 = vadd.xlane.f32.xlu1 %v3465_v13  ;;  %v3578_v11 = vld [vmem:[#allocation5 + $0x88] sm:$0xff]  ;;  %v3580_v13 = vld [vmem:[#allocation5 + $0x98] sm:$0xff] }
 0x686   :  { %3471 = vadd.xlane.f32.xlu0 %v3470_v21  ;;  %v6963_v21 = vpack.c.bf16 %v3580_v13, %v3578_v11  ;;  %v3614_v11 = vld [vmem:[#allocation5 + $0x1a8] sm:$0xff]  ;;  %v3616_v13 = vld [vmem:[#allocation5 + $0x1b8] sm:$0xff] }
 0x711   :  { %v3467_v18 = vpop.xlane.xlu1 %3466 }
 0x712   :  { %v3473_v23 = vmul.f32 0.010204081, %v3467_v18  ;;  %v3577_v18 = vld [vmem:[#allocation5 + $0x80] sm:$0xff] }
 0x713   :  { %v3472_v48 = vpop.xlane.xlu0 %3471 }
 0x714   :  { %v9407_v55 = vsub.f32 %v7112_v50, %v3473_v23  ;;  %v9409_v24 = vsub.f32 %v7113_v57, %v3473_v23  ;;  %v9411_v17 = vsub.f32 %v3412_v44, %v3473_v23  ;;  %v3474_v62 = vmul.f32 0.010204081, %v3472_v48  ;;  %v3431_v57 = vld [vmem:[%s9995_s1] sm:$0xff]  ;;  %v3582_v48 = vld [vmem:[#allocation5 + $0xa8] sm:$0xff] }
 0x715   :  { %v9413_v59 = vsub.f32 %v3414_v7, %v3473_v23  ;;  %v3571_v7 = vld [vmem:[#allocation5 + $0x50] sm:$0xff] }
 0x716   :  { %v9415_v29 = vsub.f32 %v7114_v43, %v3474_v62  ;;  %v9417_v58 = vsub.f32 %v7115_v3, %v3474_v62  ;;  %v9419_v36 = vsub.f32 %v3416_v60, %v3474_v62  ;;  %v3483_v45 = vmul.f32 %v9407_v55, %v3438_v9  ;;  %v3564_v43 = vld [vmem:[#allocation5 + $0x18] sm:$0xff]  ;;  %v3579_v23 = vld [vmem:[#allocation5 + $0x90] sm:$0xff] }
 0x717   :  { %v3484_v34 = vmul.f32 %v9409_v24, %v3442_v27  ;;  %v3485_v15 = vmul.f32 %v9411_v17, %v3446_v33  ;;  %v9424_v25 = vsub.f32 %v3418_v14, %v3474_v62  ;;  %v3486_v54 = vmul.f32 %v9413_v59, %v3450_v6  ;;  %v3576_v60 = vld [vmem:[#allocation5 + $0x78] sm:$0xff]  ;;  %v3575_v14 = vld [vmem:[#allocation5 + $0x70] sm:$0xff] }
 0x718   :  { %v3491_v52 = vmul.f32 %v3483_v45, %v3483_v45  ;;  %v3487_v53 = vmul.f32 %v9415_v29, %v3438_v9  ;;  %v3488_v1 = vmul.f32 %v9417_v58, %v3442_v27  ;;  %v3489_v31 = vmul.f32 %v9419_v36, %v3446_v33  ;;  %v3566_v9 = vld [vmem:[#allocation5 + $0x28] sm:$0xff]  ;;  %v3568_v27 = vld [vmem:[#allocation5 + $0x38] sm:$0xff]  ;;  %v3565_v33 = vld [vmem:[#allocation5 + $0x20] sm:$0xff] }
 0x719   :  { %v3492_v40 = vmul.f32 %v3484_v34, %v3484_v34  ;;  %v3490_v41 = vmul.f32 %v9424_v25, %v3450_v6  ;;  %v3493_v20 = vmul.f32 %v3485_v15, %v3485_v15  ;;  %v3494_v46 = vmul.f32 %v3486_v54, %v3486_v54  ;;  %v3567_v6 = vld [vmem:[#allocation5 + $0x30] sm:$0xff]  ;;  %v3584_v62 = vld [vmem:[#allocation5 + $0xb8] sm:$0xff]  ;;  %v3581_v15 = vld [vmem:[#allocation5 + $0xa0] sm:$0xff] }
 0x71a   :  { %v3495_v61 = vmul.f32 %v3487_v53, %v3487_v53  ;;  %v3496_v2 = vmul.f32 %v3488_v1, %v3488_v1  ;;  %v3497_v32 = vmul.f32 %v3489_v31, %v3489_v31  ;;  %v6947_v3 = vpack.c.bf16 %v3564_v43, %v3562_v39  ;;  %v3586_v53 = vld [vmem:[#allocation5 + $0xc8] sm:$0xff]  ;;  %v3588_v1 = vld [vmem:[#allocation5 + $0xd8] sm:$0xff] }
 0x71b   :  { %v3499_v16 = vadd.f32 %v3492_v40, %v3491_v52  ;;  %v3498_v35 = vmul.f32 %v3490_v41, %v3490_v41  ;;  %v6951_v4 = vpack.c.bf16 %v3568_v27, %v3566_v9  ;;  %v6953_v44 = vpack.c.bf16 %v3567_v6, %v3565_v33  ;;  %v3583_v52 = vld [vmem:[#allocation5 + $0xb0] sm:$0xff]  ;;  %v3585_v40 = vld [vmem:[#allocation5 + $0xc0] sm:$0xff]  ;;  %v3600_v39 = vld [vmem:[#allocation5 + $0x138] sm:$0xff] }
 0x71c   :  { %v3504_v37 = vadd.f32 %v3496_v2, %v3495_v61  ;;  %6948 = vmatprep.subr.bf16.mxu0 %v6947_v3  ;;  %v6957_v0 = vpack.c.bf16 %v3571_v7, %v3569_v8  ;;  %v6959_v19 = vpack.c.bf16 %v3576_v60, %v3574_v5  ;;  %v6961_v38 = vpack.c.bf16 %v3575_v14, %v3573_v63  ;;  %v3587_v41 = vld [vmem:[#allocation5 + $0xd0] sm:$0xff]  ;;  %v3590_v61 = vld [vmem:[#allocation5 + $0xe8] sm:$0xff]  ;;  %v3592_v2 = vld [vmem:[#allocation5 + $0xf8] sm:$0xff] }
 0x71d   :  { %v3500_v47 = vadd.f32 %v3499_v16, %v3493_v20  ;;  %6950 = vmatpush1.bf16.msra.mxu0 %v6949_v30  ;;  %v6965_v45 = vpack.c.bf16 %v3579_v23, %v3577_v18  ;;  %v6967_v34 = vpack.c.bf16 %v3584_v62, %v3582_v48  ;;  %v6969_v31 = vpack.c.bf16 %v3583_v52, %v3581_v15  ;;  %v3597_v3 = vld [vmem:[#allocation5 + $0x120] sm:$0xff]  ;;  %v3602_v9 = vld [vmem:[#allocation5 + $0x148] sm:$0xff]  ;;  %v3604_v27 = vld [vmem:[#allocation5 + $0x158] sm:$0xff] }
 0x71e   :  { %v3505_v42 = vadd.f32 %v3504_v37, %v3497_v32  ;;  %6952 = vmatprep.subr.bf16.mxu0 %v6951_v4  ;;  %v6971_v54 = vpack.c.bf16 %v3588_v1, %v3586_v53  ;;  %v6973_v20 = vpack.c.bf16 %v3587_v41, %v3585_v40  ;;  %v6975_v16 = vpack.c.bf16 %v3592_v2, %v3590_v61  ;;  %v3589_v32 = vld [vmem:[#allocation5 + $0xe0] sm:$0xff]  ;;  %v3591_v37 = vld [vmem:[#allocation5 + $0xf0] sm:$0xff]  ;;  %v3610_v5 = vld [vmem:[#allocation5 + $0x188] sm:$0xff] }
 0x71f   :  { %v3501_v50 = vadd.f32 %v3500_v47, %v3494_v46  ;;  %v3594_v46 = vld [vmem:[#allocation5 + $0x108] sm:$0xff]  ;;  %v3596_v47 = vld [vmem:[#allocation5 + $0x118] sm:$0xff]  ;;  %v6985_v30 = vpack.c.bf16 %v3599_v12, %v3597_v3  ;;  %v6987_v4 = vpack.c.bf16 %v3604_v27, %v3602_v9  ;;  %v3601_v33 = vld [vmem:[#allocation5 + $0x140] sm:$0xff] }
 0x720   :  { %v3506_v26 = vadd.f32 %v3505_v42, %v3498_v35  ;;  %v6977_v35 = vpack.c.bf16 %v3591_v37, %v3589_v32  ;;  %v6979_v42 = vpack.c.bf16 %v3596_v47, %v3594_v46  ;;  %v3603_v6 = vld [vmem:[#allocation5 + $0x150] sm:$0xff]  ;;  %v3605_v8 = vld [vmem:[#allocation5 + $0x160] sm:$0xff]  ;;  %v3612_v60 = vld [vmem:[#allocation5 + $0x198] sm:$0xff] }
 0x721   :  { %3502 = vadd.xlane.f32.xlu0 %v3501_v50  ;;  %6954 = vmatpush1.bf16.msra.mxu0 %v6953_v44  ;;  %v3593_v50 = vld [vmem:[#allocation5 + $0x100] sm:$0xff]  ;;  %v6989_v44 = vpack.c.bf16 %v3603_v6, %v3601_v33  ;;  %v3607_v7 = vld [vmem:[#allocation5 + $0x170] sm:$0xff]  ;;  %v3618_v48 = vld [vmem:[#allocation5 + $0x1c8] sm:$0xff] }
 0x722   :  { %3507 = vadd.xlane.f32.xlu1 %v3506_v26  ;;  %6956 = vmatprep.subr.bf16.mxu0 %v6955_v22  ;;  %v3595_v26 = vld [vmem:[#allocation5 + $0x110] sm:$0xff]  ;;  %v6991_v22 = vpack.c.bf16 %v3608_v28, %v3606_v56  ;;  %v3609_v63 = vld [vmem:[#allocation5 + $0x180] sm:$0xff]  ;;  %v3620_v62 = vld [vmem:[#allocation5 + $0x1d8] sm:$0xff] }
 0x723   :  { %v6981_v43 = vpack.c.bf16 %v3595_v26, %v3593_v50  ;;  %v3611_v14 = vld [vmem:[#allocation5 + $0x190] sm:$0xff]  ;;  %v3613_v18 = vld [vmem:[#allocation5 + $0x1a0] sm:$0xff]  ;;  %v3622_v47 = vld [vmem:[#allocation5 + $0x1e8] sm:$0xff] }
 0x724   :  { %v3615_v23 = vld [vmem:[#allocation5 + $0x1b0] sm:$0xff]  ;;  %v3617_v15 = vld [vmem:[#allocation5 + $0x1c0] sm:$0xff] }
 0x725   :  { %6958 = vmatpush1.bf16.msra.mxu0 %v6957_v0  ;;  %v6993_v0 = vpack.c.bf16 %v3607_v7, %v3605_v8  ;;  %v3619_v52 = vld [vmem:[#allocation5 + $0x1d0] sm:$0xff]  ;;  %v3429_v2 = vld [vmem:[%s9996_s6] sm:$0xff] }
 0x726   :  { %6960 = vmatprep.subr.bf16.mxu0 %v6959_v19  ;;  %v6995_v19 = vpack.c.bf16 %v3612_v60, %v3610_v5  ;;  %v7005_v53 = vpack.c.bf16 %v3619_v52, %v3617_v15  ;;  %v3621_v50 = vld [vmem:[#allocation5 + $0x1e0] sm:$0xff]  ;;  %v3623_v26 = vld [vmem:[#allocation5 + $0x1f0] sm:$0xff]  ;;  %v3630_v5 = vld [vmem:[#allocation5 + $0x228] sm:$0xff] }
 0x727   :  { %v3625_v28 = vld [vmem:[#allocation5 + $0x200] sm:$0xff]  ;;  %v3638_v15 = vld [vmem:[#allocation5 + $0x268] sm:$0xff]  ;;  %v3640_v52 = vld [vmem:[#allocation5 + $0x278] sm:$0xff] }
 0x729   :  { %6962 = vmatpush1.bf16.msra.mxu0 %v6961_v38  ;;  %v6997_v38 = vpack.c.bf16 %v3611_v14, %v3609_v63  ;;  %v3629_v14 = vld [vmem:[#allocation5 + $0x220] sm:$0xff] }
 0x72a   :  { %6964 = vmatprep.subr.bf16.mxu0 %v6963_v21  ;;  %v6999_v21 = vpack.c.bf16 %v3616_v13, %v3614_v11  ;;  %v3631_v11 = vld [vmem:[#allocation5 + $0x230] sm:$0xff] }
 0x72d   :  { %6966 = vmatpush1.bf16.msra.mxu0 %v6965_v45  ;;  %v7001_v45 = vpack.c.bf16 %v3615_v23, %v3613_v18  ;;  %v7017_v18 = vpack.c.bf16 %v3631_v11, %v3629_v14  ;;  %v3665_v11 = vld [vmem:[#allocation5 + $0x340] sm:$0xff] }
 0x72e   :  { %6968 = vmatprep.subr.bf16.mxu0 %v6967_v34  ;;  %v7003_v34 = vpack.c.bf16 %v3620_v62, %v3618_v48  ;;  %v3633_v62 = vld [vmem:[#allocation5 + $0x240] sm:$0xff] }
 0x731   :  { %6970 = vmatpush1.bf16.msra.mxu0 %v6969_v31 }
 0x732   :  { %6972 = vmatprep.subr.bf16.mxu0 %v6971_v54 }
 0x733   :  { %3537 = vperm.xlu1 %7429, %v3431_v57   ;;  %v3598_v57 = vld [vmem:[#allocation5 + $0x128] sm:$0xff] }
 0x734   :  { %v6983_v51 = vpack.c.bf16 %v3600_v39, %v3598_v57  ;;  %v3432_v57 = vld [vmem:[%s9995_s1 + $0x8] sm:$0xff]  ;;  %v7009_v39 = vpack.c.bf16 %v3623_v26, %v3621_v50  ;;  %v3652_v26 = vld [vmem:[#allocation5 + $0x2d8] sm:$0xff]  ;;  %s7580_s1 = smov 108  }
 0x735   :  { %6974 = vmatpush1.bf16.msra.mxu0 %v6973_v20  ;;  %v3430_v20 = vld [vmem:[%s9996_s6 + $0x8] sm:$0xff]  ;;  %s7584_s6 = smov 99  }
 0x736   :  { %6976 = vmatprep.subr.bf16.mxu0 %v6975_v16  ;;  %v3650_v50 = vld [vmem:[#allocation5 + $0x2c8] sm:$0xff] }
 0x739   :  { %6978 = vmatpush1.bf16.msra.mxu0 %v6977_v35  ;;  %v3624_v35 = vld [vmem:[#allocation5 + $0x1f8] sm:$0xff] }
 0x73a   :  { %6980 = vmatprep.subr.bf16.mxu0 %v6979_v42  ;;  %v7007_v42 = vpack.c.bf16 %v3624_v35, %v3622_v47  ;;  %v3645_v35 = vld [vmem:[#allocation5 + $0x2a0] sm:$0xff] }
 0x73d   :  { %6982 = vmatpush1.bf16.msra.mxu0 %v6981_v43  ;;  %v3626_v43 = vld [vmem:[#allocation5 + $0x208] sm:$0xff] }
 0x73e   :  { %6984 = vmatprep.subr.bf16.mxu0 %v6983_v51  ;;  %v3628_v51 = vld [vmem:[#allocation5 + $0x218] sm:$0xff] }
 0x73f   :  { %v7011_v3 = vpack.c.bf16 %v3628_v51, %v3626_v43  ;;  %v3649_v43 = vld [vmem:[#allocation5 + $0x2c0] sm:$0xff]  ;;  %v3651_v51 = vld [vmem:[#allocation5 + $0x2d0] sm:$0xff] }
 0x741   :  { %6986 = vmatpush1.bf16.msra.mxu0 %v6985_v30 }
 0x742   :  { %6988 = vmatprep.subr.bf16.mxu0 %v6987_v4 }
 0x745   :  { %6990 = vmatpush1.bf16.msra.mxu0 %v6989_v44  ;;  %v3627_v44 = vld [vmem:[#allocation5 + $0x210] sm:$0xff] }
 0x746   :  { %6992 = vmatprep.subr.bf16.mxu0 %v6991_v22 }
 0x749   :  { %6994 = vmatpush1.bf16.msra.mxu0 %v6993_v0 }
 0x74a   :  { %6996 = vmatprep.subr.bf16.mxu0 %v6995_v19  ;;  %v7013_v19 = vpack.c.bf16 %v3627_v44, %v3625_v28 }
 0x74d   :  { %6998 = vmatpush1.bf16.msra.mxu0 %v6997_v38  ;;  %v3634_v38 = vld [vmem:[#allocation5 + $0x248] sm:$0xff] }
 0x74e   :  { %7000 = vmatprep.subr.bf16.mxu0 %v6999_v21  ;;  %v3636_v21 = vld [vmem:[#allocation5 + $0x258] sm:$0xff] }
 0x74f   :  { %v7019_v48 = vpack.c.bf16 %v3636_v21, %v3634_v38  ;;  %v3672_v38 = vld [vmem:[#allocation5 + $0x378] sm:$0xff] }
 0x751   :  { %7002 = vmatpush1.bf16.msra.mxu0 %v7001_v45  ;;  %v3635_v45 = vld [vmem:[#allocation5 + $0x250] sm:$0xff] }
 0x752   :  { %7004 = vmatprep.subr.bf16.mxu0 %v7003_v34 }
 0x755   :  { %7006 = vmatpush1.bf16.msra.mxu0 %v7005_v53  ;;  %v7021_v53 = vpack.c.bf16 %v3635_v45, %v3633_v62  ;;  %v3674_v62 = vld [vmem:[#allocation5 + $0x388] sm:$0xff]  ;;  %v3676_v45 = vld [vmem:[#allocation5 + $0x398] sm:$0xff] }
 0x756   :  { %7008 = vmatprep.subr.bf16.mxu0 %v7007_v42  ;;  %v3647_v42 = vld [vmem:[#allocation5 + $0x2b0] sm:$0xff] }
 0x759   :  { %7010 = vmatpush1.bf16.msra.mxu0 %v7009_v39  ;;  %v7035_v39 = vpack.c.bf16 %v3652_v26, %v3650_v50  ;;  %v3685_v26 = vld [vmem:[#allocation5 + $0x3e0] sm:$0xff] }
 0x75a   :  { %7012 = vmatprep.subr.bf16.mxu0 %v7011_v3  ;;  %v3654_v3 = vld [vmem:[#allocation5 + $0x2e8] sm:$0xff] }
 0x7ae   :  { %v3503_v1 = vpop.xlane.xlu0 %3502 }
 0x7af   :  { %v3509_v31 = vmul.f32 0.010204081, %v3503_v1  ;;  %v3508_v54 = vpop.xlane.xlu1 %3507  ;;  %v7023_v1 = vpack.c.bf16 %v3640_v52, %v3638_v15  ;;  %v7059_v15 = vpack.c.bf16 %v3676_v45, %v3674_v62  ;;  %v3673_v52 = vld [vmem:[#allocation5 + $0x380] sm:$0xff] }
 0x7b0   :  { %v3510_v40 = vmul.f32 0.010204081, %v3508_v54  ;;  %v3639_v54 = vld [vmem:[#allocation5 + $0x270] sm:$0xff]  ;;  %v4896_v45 = vld [vmem:[%s9932_s11] sm:$0xff] }
 0x7b1   :  { %v3511_v41 = vadd.f32 1e-05, %v3509_v31  ;;  %v3637_v31 = vld [vmem:[#allocation5 + $0x260] sm:$0xff] }
 0x7b2   :  { %v3512_v61 = vadd.f32 1e-05, %v3510_v40  ;;  %v3642_v40 = vld [vmem:[#allocation5 + $0x288] sm:$0xff] }
 0x7b3   :  { %7484 = vrsqrt.f32 %v3511_v41  ;;  %v3538_v12 = vpop.permute.xlu1 %3537  ;;  %v3644_v41 = vld [vmem:[#allocation5 + $0x298] sm:$0xff] }
 0x7b4   :  { %7486 = vrsqrt.f32 %v3512_v61  ;;  %v7025_v61 = vpack.c.bf16 %v3639_v54, %v3637_v31  ;;  %v3680_v31 = vld [vmem:[#allocation5 + $0x3b8] sm:$0xff] }
 0x7bd   :  { %v7485_v16 = vpop.eup %7484 }
 0x7be   :  { %v7487_v32 = vpop.eup %7486  ;;  %v3515_v37 = vmul.f32 %v7485_v16, %v3429_v2  ;;  %v7027_v2 = vpack.c.bf16 %v3644_v41, %v3642_v40  ;;  %v3643_v16 = vld [vmem:[#allocation5 + $0x290] sm:$0xff]  ;;  %v3677_v41 = vld [vmem:[#allocation5 + $0x3a0] sm:$0xff] }
 0x7bf   :  { %v3516_v46 = vmul.f32 %v7487_v32, %v3430_v20  ;;  %v3641_v20 = vld [vmem:[#allocation5 + $0x280] sm:$0xff]  ;;  %v3646_v32 = vld [vmem:[#allocation5 + $0x2a8] sm:$0xff] }
 0x7c0   :  { %3519 = vperm.xlu0 %7426, %v3515_v37   ;;  %v3648_v37 = vld [vmem:[#allocation5 + $0x2b8] sm:$0xff] }
 0x7c1   :  { %3524 = vperm.xlu1 %7429, %v3516_v46   ;;  %v7029_v46 = vpack.c.bf16 %v3643_v16, %v3641_v20  ;;  %v7031_v47 = vpack.c.bf16 %v3648_v37, %v3646_v32  ;;  %v3684_v20 = vld [vmem:[#allocation5 + $0x3d8] sm:$0xff]  ;;  %v3681_v37 = vld [vmem:[#allocation5 + $0x3c0] sm:$0xff] }
 0x7c4   :  { %3542 = vperm.xlu0 %7426, %v3432_v57   ;;  %v7033_v57 = vpack.c.bf16 %v3647_v42, %v3645_v35  ;;  %v3688_v35 = vld [vmem:[#allocation5 + $0x3f8] sm:$0xff] }
 0x83f   :  { %v3520_v9 = vpop.permute.xlu0 %3519 }
 0x840   :  { %v3527_v27 = vmul.f32 %v3520_v9, %v9407_v55  ;;  %v3528_v30 = vmul.f32 %v3520_v9, %v9409_v24  ;;  %v3529_v4 = vmul.f32 %v3520_v9, %v9411_v17  ;;  %v9446_v33 = vpop.permute.xlu1 %3524  ;;  %v3530_v22 = vmul.f32 %v3520_v9, %v9413_v59  ;;  %v3632_v24 = vld [vmem:[#allocation5 + $0x238] sm:$0xff] }
 0x841   :  { %v3531_v6 = vmul.f32 %v9446_v33, %v9415_v29  ;;  %v3532_v56 = vmul.f32 %v9446_v33, %v9417_v58  ;;  %v7015_v63 = vpack.c.bf16 %v3632_v24, %v3630_v5  ;;  %v7037_v9 = vpack.c.bf16 %v3651_v51, %v3649_v43  ;;  %v3664_v5 = vld [vmem:[#allocation5 + $0x338] sm:$0xff] }
 0x842   :  { %v3545_v8 = vadd.f32 %v3538_v12, %v3527_v27  ;;  %v9453_v7 = vadd.f32 %v3538_v12, %v3529_v4  ;;  %v3546_v55 = vadd.f32 %v3538_v12, %v3528_v30  ;;  %v3548_v13 = vadd.f32 %v3538_v12, %v3530_v22  ;;  %v3656_v12 = vld [vmem:[#allocation5 + $0x2f8] sm:$0xff]  ;;  %v3653_v30 = vld [vmem:[#allocation5 + $0x2e0] sm:$0xff]  ;;  %v3655_v4 = vld [vmem:[#allocation5 + $0x2f0] sm:$0xff] }
 0x843   :  { %v9455_v60 = vpop.permute.xlu0 %3542  ;;  %v7039_v27 = vpack.c.bf16 %v3656_v12, %v3654_v3  ;;  %v7041_v28 = vpack.c.bf16 %v3655_v4, %v3653_v30  ;;  %v3657_v22 = vld [vmem:[#allocation5 + $0x300] sm:$0xff]  ;;  %v3533_v51 = vmul.f32 %v9446_v33, %v9419_v36 }
 0x844   :  { %v3554_v17 = vmax.f32 %v3546_v55, 0.0  ;;  %v3553_v0 = vmax.f32 %v3545_v8, 0.0  ;;  %v3550_v29 = vadd.f32 %v9455_v60, %v3532_v56  ;;  %v3549_v58 = vadd.f32 %v9455_v60, %v3531_v6  ;;  %v3658_v6 = vld [vmem:[#allocation5 + $0x308] sm:$0xff]  ;;  %v3660_v56 = vld [vmem:[#allocation5 + $0x318] sm:$0xff]  ;;  %v3659_v8 = vld [vmem:[#allocation5 + $0x310] sm:$0xff] }
 0x845   :  { %v3556_v34 = vmax.f32 %v3548_v13, 0.0  ;;  %v7043_v44 = vpack.c.bf16 %v3660_v56, %v3658_v6  ;;  %v3662_v55 = vld [vmem:[#allocation5 + $0x328] sm:$0xff]  ;;  %v7045_v24 = vpack.c.bf16 %v3659_v8, %v3657_v22  ;;  %v3555_v12 = vmax.f32 %v9453_v7, 0.0 }
 0x846   :  { %3753 = vmatprep.mubr.f32.mxu0 %v3554_v17  ;;  %v3558_v59 = vmax.f32 %v3550_v29, 0.0  ;;  %v3557_v23 = vmax.f32 %v3549_v58, 0.0  ;;  %v7047_v17 = vpack.c.bf16 %v3664_v5, %v3662_v55  ;;  %v3666_v29 = vld [vmem:[#allocation5 + $0x348] sm:$0xff] }
 0x847   :  { %3754 = vmatmul.mubr.f32.vlgmr.msra.gmra.mrb[8].mxu0 %v3553_v0  ;;  %v3661_v0 = vld [vmem:[#allocation5 + $0x320] sm:$0xff]  ;;  %v3670_v13 = vld [vmem:[#allocation5 + $0x368] sm:$0xff] }
 0x848   :  { %7014 = vmatpush1.bf16.msra.mxu0 %v7013_v19  ;;  %3759 = vmatprep.mubr.f32.mxu0 %v3558_v59  ;;  %v3663_v19 = vld [vmem:[#allocation5 + $0x330] sm:$0xff] }
 0x849   :  { %7016 = vmatprep.subr.bf16.mxu0 %v7015_v63  ;;  %v3668_v63 = vld [vmem:[#allocation5 + $0x358] sm:$0xff]  ;;  %v7049_v58 = vpack.c.bf16 %v3663_v19, %v3661_v0  ;;  %v3667_v59 = vld [vmem:[#allocation5 + $0x350] sm:$0xff] }
 0x84a   :  { %v7051_v14 = vpack.c.bf16 %v3668_v63, %v3666_v29  ;;  %v7053_v21 = vpack.c.bf16 %v3667_v59, %v3665_v11 }
 0x84b   :  { %3760 = vmatmul.mubr.f32.gmra.mrb[10].mxu0 %v3557_v23  ;;  %v3669_v23 = vld [vmem:[#allocation5 + $0x360] sm:$0xff] }
 0x84c   :  { %7018 = vmatpush1.bf16.msra.mxu0 %v7017_v18  ;;  %3830 = vmatprep.mubr.f32.mxu0 %v3556_v34  ;;  %v7055_v18 = vpack.c.bf16 %v3672_v38, %v3670_v13 }
 0x84d   :  { %7020 = vmatprep.subr.bf16.mxu0 %v7019_v48  ;;  %v3671_v48 = vld [vmem:[#allocation5 + $0x370] sm:$0xff] }
 0x84e   :  { %v7057_v34 = vpack.c.bf16 %v3671_v48, %v3669_v23 }
 0x850   :  { %7022 = vmatpush1.bf16.msra.mxu0 %v7021_v53  ;;  %v3675_v53 = vld [vmem:[#allocation5 + $0x390] sm:$0xff] }
 0x851   :  { %7024 = vmatprep.subr.bf16.mxu0 %v7023_v1  ;;  %v3678_v1 = vld [vmem:[#allocation5 + $0x3a8] sm:$0xff]  ;;  %v7061_v54 = vpack.c.bf16 %v3675_v53, %v3673_v52  ;;  %v7586_v52 = vmov 0.0|0.0  }
 0x852   :  { %v7063_v40 = vpack.c.bf16 %v3680_v31, %v3678_v1  ;;  %v4899_v1 = vld [vmem:[%s9932_s11 + $0x18] sm:$0xff] }
 0x854   :  { %7026 = vmatpush1.bf16.msra.mxu0 %v7025_v61  ;;  %v3679_v61 = vld [vmem:[#allocation5 + $0x3b0] sm:$0xff] }
 0x855   :  { %7028 = vmatprep.subr.bf16.mxu0 %v7027_v2  ;;  %v3682_v2 = vld [vmem:[#allocation5 + $0x3c8] sm:$0xff]  ;;  %v7065_v16 = vpack.c.bf16 %v3679_v61, %v3677_v41 }
 0x856   :  { %v7067_v32 = vpack.c.bf16 %v3684_v20, %v3682_v2  ;;  %v4901_v41 = vld [vmem:[%s9932_s11 + $0x28] sm:$0xff] }
 0x858   :  { %7030 = vmatpush1.bf16.msra.mxu0 %v7029_v46  ;;  %v3683_v46 = vld [vmem:[#allocation5 + $0x3d0] sm:$0xff] }
 0x859   :  { %7032 = vmatprep.subr.bf16.mxu0 %v7031_v47  ;;  %v3686_v47 = vld [vmem:[#allocation5 + $0x3e8] sm:$0xff]  ;;  %v7069_v42 = vpack.c.bf16 %v3683_v46, %v3681_v37 }
 0x85a   :  { %v7071_v50 = vpack.c.bf16 %v3688_v35, %v3686_v47  ;;  %v4904_v47 = vld [vmem:[%s9932_s11 + $0x40] sm:$0xff]  ;;  %v4905_v35 = vld [vmem:[%s9932_s11 + $0x48] sm:$0xff] }
 0x85c   :  { %7034 = vmatpush1.bf16.msra.mxu0 %v7033_v57  ;;  %v3687_v57 = vld [vmem:[#allocation5 + $0x3f0] sm:$0xff] }
 0x85d   :  { %7036 = vmatprep.subr.bf16.mxu0 %v7035_v39  ;;  %v3534_v39 = vmul.f32 %v9446_v33, %v9424_v25  ;;  %v7073_v43 = vpack.c.bf16 %v3687_v57, %v3685_v26  ;;  %v4906_v26 = vld [vmem:[%s9932_s11 + $0x50] sm:$0xff]  ;;  %v4907_v57 = vld [vmem:[%s9932_s11 + $0x58] sm:$0xff] }
 0x85f   :  { %v3552_v3 = vadd.f32 %v9455_v60, %v3534_v39 }
 0x860   :  { %7038 = vmatpush1.bf16.msra.mxu0 %v7037_v9  ;;  %v3551_v9 = vadd.f32 %v9455_v60, %v3533_v51 }
 0x861   :  { %7040 = vmatprep.subr.bf16.mxu0 %v7039_v27  ;;  %v3560_v27 = vmax.f32 %v3552_v3, 0.0  ;;  %v4908_v3 = vld [vmem:[%s9932_s11 + $0x60] sm:$0xff] }
 0x862   :  { %v3559_v30 = vmax.f32 %v3551_v9, 0.0 }
 0x864   :  { %7042 = vmatpush1.bf16.msra.mxu0 %v7041_v28  ;;  %v4880_v28 = vld [vmem:[%s9997_s2] sm:$0xff] }
 0x865   :  { %7044 = vmatprep.subr.bf16.mxu0 %v7043_v44  ;;  %v4881_v44 = vld [vmem:[%s9997_s2 + $0x8] sm:$0xff]  ;;  %s7590_s2 = smov 123  }
 0x868   :  { %7046 = vmatpush1.bf16.msra.mxu0 %v7045_v24 }
 0x869   :  { %7048 = vmatprep.subr.bf16.mxu0 %v7047_v17 }
 0x86c   :  { %7050 = vmatpush1.bf16.msra.mxu0 %v7049_v58 }
 0x86d   :  { %7052 = vmatprep.subr.bf16.mxu0 %v7051_v14 }
 0x870   :  { %7054 = vmatpush1.bf16.msra.mxu0 %v7053_v21 }
 0x871   :  { %7056 = vmatprep.subr.bf16.mxu0 %v7055_v18 }
 0x874   :  { %7058 = vmatpush1.bf16.msra.mxu0 %v7057_v34  ;;  %v4897_v34 = vld [vmem:[%s9932_s11 + $0x8] sm:$0xff] }
 0x875   :  { %7060 = vmatprep.subr.bf16.mxu0 %v7059_v15  ;;  %v4898_v15 = vld [vmem:[%s9932_s11 + $0x10] sm:$0xff]  ;;  %v7076_v53 = vpack.c.bf16 %v4897_v34, %v4896_v45 }
 0x876   :  { %v7079_v31 = vpack.c.bf16 %v4899_v1, %v4898_v15 }
 0x878   :  { %7062 = vmatpush1.bf16.msra.mxu0 %v7061_v54 }
 0x879   :  { %7064 = vmatprep.subr.bf16.mxu0 %v7063_v40  ;;  %v4900_v40 = vld [vmem:[%s9932_s11 + $0x20] sm:$0xff] }
 0x87a   :  { %v7082_v2 = vpack.c.bf16 %v4901_v41, %v4900_v40  ;;  %v4915_v40 = vld [vmem:[%s9932_s11 + $0x98] sm:$0xff] }
 0x87c   :  { %7066 = vmatpush1.bf16.msra.mxu0 %v7065_v16  ;;  %v4902_v16 = vld [vmem:[%s9932_s11 + $0x30] sm:$0xff] }
 0x87d   :  { %7068 = vmatprep.subr.bf16.mxu0 %v7067_v32  ;;  %v4903_v32 = vld [vmem:[%s9932_s11 + $0x38] sm:$0xff] }
 0x87e   :  { %v7085_v46 = vpack.c.bf16 %v4903_v32, %v4902_v16 }
 0x880   :  { %7070 = vmatpush1.bf16.msra.mxu0 %v7069_v42  ;;  %v7088_v42 = vpack.c.bf16 %v4905_v35, %v4904_v47 }
 0x881   :  { %7072 = vmatprep.subr.bf16.mxu0 %v7071_v50 }
 0x884   :  { %7074 = vmatpush1.bf16.msra.mxu0 %v7073_v43  ;;  %v7091_v43 = vpack.c.bf16 %v4907_v57, %v4906_v26 }
 0x885   :  { %7075 = vmatprep.subr.bf16.mxu0 %v7586_v52 }
 0x887   :  { %3831 = vmatmul.mubr.f32.vlgmr.msra.gmra.mrb[8].mxu0 %v3555_v12  ;;  %v4909_v12 = vld [vmem:[%s9932_s11 + $0x68] sm:$0xff] }
 0x888   :  { %3836 = vmatprep.mubr.f32.mxu0 %v3560_v27  ;;  %7077 = vmatpush1.bf16.msra.mxu0 %v7076_v53  ;;  %v7094_v27 = vpack.c.bf16 %v4909_v12, %v4908_v3 }
 0x889   :  { %7078 = vmatprep.subr.bf16.mxu0 %v7586_v52 }
 0x88b   :  { %3837 = vmatmul.mubr.f32.gmra.mrb[10].mxu0 %v3559_v30  ;;  %v4910_v30 = vld [vmem:[%s9932_s11 + $0x70] sm:$0xff] }
 0x88c   :  { %7080 = vmatpush1.bf16.msra.mxu0 %v7079_v31 }
 0x88d   :  { %7081 = vmatprep.subr.bf16.mxu0 %v7586_v52 }
 0x890   :  { %7083 = vmatpush1.bf16.msra.mxu0 %v7082_v2 }
 0x891   :  { %7084 = vmatprep.subr.bf16.mxu0 %v7586_v52 }
 0x894   :  { %7086 = vmatpush1.bf16.msra.mxu0 %v7085_v46 }
 0x895   :  { %7087 = vmatprep.subr.bf16.mxu0 %v7586_v52 }
 0x898   :  { %7089 = vmatpush1.bf16.msra.mxu0 %v7088_v42 }
 0x899   :  { %7090 = vmatprep.subr.bf16.mxu0 %v7586_v52 }
 0x89c   :  { %7092 = vmatpush1.bf16.msra.mxu0 %v7091_v43 }
 0x89d   :  { %7093 = vmatprep.subr.bf16.mxu0 %v7586_v52 }
 0x8a0   :  { %7095 = vmatpush1.bf16.msra.mxu0 %v7094_v27 }
 0x8a1   :  { %7096 = vmatprep.subr.bf16.mxu0 %v7586_v52 }
 0x95a   :  { %v3832_v36 = vpop.f32.mrb[8].mxu0 }
 0x95b   :  { %v3834_v25 = vpop.f32.mrb[9].mxu0 }
 0x95c   :  { %3850 = vst.msk [vmem:[#allocation3 + $0x8] sm:$0xff] %vm3849_vm5, %v3834_v25 }
 0x95e   :  { %v3838_v33 = vpop.f32.mrb[10].mxu0 }
 0x95f   :  { %v3889_v4 = vpack.c.bf16 %v3838_v33, %v3832_v36  ;;  %v3840_v7 = vpop.f32.mrb[11].mxu0  ;;  %v4911_v36 = vld [vmem:[%s9932_s11 + $0x78] sm:$0xff] }
 0x960   :  { %3852 = vst.msk [vmem:[#allocation3 + $0x18] sm:$0xff] %vm3849_vm5, %v3840_v7  ;;  %v7097_v25 = vpack.c.bf16 %v4911_v36, %v4910_v30  ;;  %v4913_v7 = vld [vmem:[%s9932_s11 + $0x88] sm:$0xff]  ;;  %v7463_v36 = vld [vmem:[%s9933_s12] sm:$0xff]  }
 0x961   :  { %3898 = vrot.lane.b32.xlu1 %v3889_v4, %s7560_s9  ;;  %v7462_v30 = vld [vmem:[%s9933_s12 + $0x8] sm:$0xff]  }
 0x962   :  { %7098 = vmatpush1.bf16.msra.mxu0 %v7097_v25 }
 0x963   :  { %v3886_v60 = vld [vmem:[#allocation3 + $0x8] sm:$0xff]  ;;  %7099 = vmatprep.subr.bf16.mxu0 %v7586_v52 }
 0x965   :  { %4007 = vrot.lane.b32.xlu1 %v3889_v4, %s7561_s30 }
 0x967   :  { %v3888_v6 = vld [vmem:[#allocation3 + $0x18] sm:$0xff] }
 0x968   :  { %v3890_v56 = vpack.c.bf16 %v3888_v6, %v3886_v60 }
 0x969   :  { %4069 = vrot.lane.b32.xlu1 %v3889_v4, %s7569_s28 }
 0x96a   :  { %3900 = vrot.lane.b32.xlu0 %v3890_v56, %s7560_s9 }
 0x96d   :  { %4131 = vrot.lane.b32.xlu1 %v3889_v4, %s7576_s0 }
 0x96e   :  { %4009 = vrot.lane.b32.xlu0 %v3890_v56, %s7561_s30 }
 0x971   :  { %4194 = vrot.lane.b32.xlu1 %v3889_v4, %s7577_s4 }
 0x972   :  { %4071 = vrot.lane.b32.xlu0 %v3890_v56, %s7569_s28  ;;  %s7581_s28 = smov 107  }
 0x975   :  { %4257 = vrot.lane.b32.xlu1 %v3889_v4, %s7578_s23 }
 0x976   :  { %4133 = vrot.lane.b32.xlu0 %v3890_v56, %s7576_s0 }
 0x979   :  { %4320 = vrot.lane.b32.xlu1 %v3889_v4, %s7579_s3 }
 0x97a   :  { %4196 = vrot.lane.b32.xlu0 %v3890_v56, %s7577_s4 }
 0x97d   :  { %4383 = vrot.lane.b32.xlu1 %v3889_v4, %s9990_s7 }
 0x97e   :  { %4259 = vrot.lane.b32.xlu0 %v3890_v56, %s7578_s23 }
 0x981   :  { %4445 = vrot.lane.b32.xlu1 %v3889_v4, %s7570_s29 }
 0x982   :  { %4322 = vrot.lane.b32.xlu0 %v3890_v56, %s7579_s3 }
 0x985   :  { %4507 = vrot.lane.b32.xlu1 %v3889_v4, %s7580_s1 }
 0x986   :  { %4385 = vrot.lane.b32.xlu0 %v3890_v56, %s9990_s7  ;;  %s7591_s7 = smov 121  }
 0x989   :  { %4570 = vrot.lane.b32.xlu1 %v3889_v4, %s7581_s28 }
 0x98a   :  { %4447 = vrot.lane.b32.xlu0 %v3890_v56, %s7570_s29 }
 0x98d   :  { %4633 = vrot.lane.b32.xlu1 %v3889_v4, %s7582_s27 }
 0x98e   :  { %4509 = vrot.lane.b32.xlu0 %v3890_v56, %s7580_s1 }
 0x991   :  { %4696 = vrot.lane.b32.xlu1 %v3889_v4, %s7583_s10 }
 0x992   :  { %4572 = vrot.lane.b32.xlu0 %v3890_v56, %s7581_s28  ;;  %s9998_s28 = sld [smem:[#allocation20_spill]] }
 0x995   :  { %4759 = vrot.lane.b32.xlu1 %v3889_v4, %s7584_s6 }
 0x996   :  { %4635 = vrot.lane.b32.xlu0 %v3890_v56, %s7582_s27 }
 0x998   :  { %v7446_v5 = vld [vmem:[%s9998_s28 + $0x8] sm:$0xff]   ;;  %v7447_v17 = vld [vmem:[%s9998_s28] sm:$0xff]   ;;  %v7448_v63 = vld [vmem:[%s9998_s28 + $0x10] sm:$0xff]  }
 0x999   :  { %4822 = vrot.lane.b32.xlu1 %v3889_v4, %s7585_s22  ;;  %v7449_v59 = vld [vmem:[%s9998_s28 + $0x18] sm:$0xff]   ;;  %v7450_v18 = vld [vmem:[%s9998_s28 + $0x20] sm:$0xff]   ;;  %v7451_v54 = vld [vmem:[%s9998_s28 + $0x28] sm:$0xff]  }
 0x99a   :  { %4698 = vrot.lane.b32.xlu0 %v3890_v56, %s7583_s10  ;;  %v7452_v50 = vld [vmem:[%s9998_s28 + $0x30] sm:$0xff]   ;;  %v7453_v33 = vld [vmem:[%s9998_s28 + $0x38] sm:$0xff]  }
 0x99b   :  { %v7460_v15 = vld [vmem:[%s9998_s28 + $0x70] sm:$0xff]   ;;  %v7461_v31 = vld [vmem:[%s9998_s28 + $0x78] sm:$0xff]  }
 0x99d   :  { %4884 = vperm.xlu1 %7429, %v4880_v28  }
 0x99e   :  { %4761 = vrot.lane.b32.xlu0 %v3890_v56, %s7584_s6 }
 0x9a2   :  { %4824 = vrot.lane.b32.xlu0 %v3890_v56, %s7585_s22 }
 0x9a6   :  { %4889 = vperm.xlu0 %7426, %v4881_v44   ;;  %v7454_v44 = vld [vmem:[%s9998_s28 + $0x40] sm:$0xff]  }
 0x9d3   :  { %v3899_v22 = vpop.permute.xlu1 %3898 }
 0x9d7   :  { %v4008_v0 = vpop.permute.xlu1 %4007 }
 0x9db   :  { %v4070_v58 = vpop.permute.xlu1 %4069 }
 0x9dc   :  { %v3901_v8 = vpop.permute.xlu0 %3900 }
 0x9dd   :  { %v3902_v55 = vsel %vm224_vm0, %v3899_v22, %v3901_v8  ;;  %3908 = vmatprep.subr.bf16.mxu1 %v3901_v8  ;;  %vm4135_vm0 = vcmask 973824  }
 0x9de   :  { %3909 = vmatpush1.bf16.msra.mxu1 %v3902_v55 }
 0x9df   :  { %3959 = vmatprep.subr.bf16.mxu1 %v3890_v56  ;;  %v4132_v13 = vpop.permute.xlu1 %4131 }
 0x9e0   :  { %v4010_v24 = vpop.permute.xlu0 %4009 }
 0x9e1   :  { %6451 = vmatmul.mubr.msk.bf16.vlgmr.msra.gmra.mrb[12].mxu1 %vm1551_vm9, %v7446_v5  ;;  %v4011_v19 = vsel %vm297_vm1, %v4008_v0, %v4010_v24  ;;  %vm4198_vm1 = vcmask 965632   ;;  %v7455_v5 = vld [vmem:[%s9998_s28 + $0x48] sm:$0xff]  }
 0x9e2   :  { %3960 = vmatpush1.bf16.msra.mxu1 %v3889_v4  ;;  %3991 = vmatprep.mubr.bf16.mxu1 %v7559_v10  ;;  %v4912_v4 = vld [vmem:[%s9932_s11 + $0x80] sm:$0xff] }
 0x9e3   :  { %4017 = vmatprep.subr.bf16.mxu1 %v4010_v24  ;;  %v4195_v23 = vpop.permute.xlu1 %4194  ;;  %v7100_v6 = vpack.c.bf16 %v4913_v7, %v4912_v4  ;;  %v7465_v7 = vld [vmem:[%s9933_s12 + $0x18] sm:$0xff]  }
 0x9e4   :  { %v4072_v29 = vpop.permute.xlu0 %4071 }
 0x9e5   :  { %v4073_v14 = vsel %vm1871_vm10, %v4070_v58, %v4072_v29  ;;  %7101 = vmatpush1.bf16.msra.mxu0 %v7100_v6  ;;  %vm4637_vm10 = vcmask 826368   ;;  %v7466_v6 = vld [vmem:[%s9933_s12 + $0x20] sm:$0xff]  }
 0x9e6   :  { %7102 = vmatprep.subr.bf16.mxu0 %v7586_v52 }
 0x9e7   :  { %v4258_v61 = vpop.permute.xlu1 %4257 }
 0x9e8   :  { %v4134_v11 = vpop.permute.xlu0 %4133 }
 0x9e9   :  { %v4136_v38 = vsel %vm4135_vm0, %v4132_v13, %v4134_v11 }
 0x9eb   :  { %v4321_v39 = vpop.permute.xlu1 %4320 }
 0x9ec   :  { %v4197_v21 = vpop.permute.xlu0 %4196 }
 0x9ed   :  { %6453 = vmatmul.mubr.msk.bf16.vlgmr.msra.gmra.mrb[12].mxu1 %vm1551_vm9, %v7447_v17  ;;  %v4199_v48 = vsel %vm4198_vm1, %v4195_v23, %v4197_v21 }
 0x9ee   :  { %4018 = vmatpush1.bf16.msra.mxu1 %v4011_v19  ;;  %4049 = vmatprep.mubr.bf16.mxu1 %v7559_v10  ;;  %v7456_v19 = vld [vmem:[%s9998_s28 + $0x50] sm:$0xff]  }
 0x9ef   :  { %4079 = vmatprep.subr.bf16.mxu1 %v4072_v29  ;;  %v4384_v60 = vpop.permute.xlu1 %4383 }
 0x9f0   :  { %v4260_v62 = vpop.permute.xlu0 %4259 }
 0x9f1   :  { %v4262_v20 = vsel %vm4261_vm6, %v4258_v61, %v4260_v62 }
 0x9f3   :  { %v4446_v22 = vpop.permute.xlu1 %4445 }
 0x9f4   :  { %v4323_v37 = vpop.permute.xlu0 %4322 }
 0x9f5   :  { %v4325_v51 = vsel %vm4324_vm7, %v4321_v39, %v4323_v37 }
 0x9f7   :  { %v4508_v24 = vpop.permute.xlu1 %4507 }
 0x9f8   :  { %v4386_v9 = vpop.permute.xlu0 %4385 }
 0x9f9   :  { %6455 = vmatmul.mubr.msk.bf16.vlgmr.msra.gmra.mrb[12].mxu1 %vm1551_vm9, %v7448_v63  ;;  %v4387_v56 = vsel %vm516_vm4, %v4384_v60, %v4386_v9  ;;  %vm4511_vm4 = vcmask 883712  }
 0x9fa   :  { %4080 = vmatpush1.bf16.msra.mxu1 %v4073_v14  ;;  %4111 = vmatprep.mubr.bf16.mxu1 %v7559_v10  ;;  %v7457_v14 = vld [vmem:[%s9998_s28 + $0x58] sm:$0xff]  }
 0x9fb   :  { %4142 = vmatprep.subr.bf16.mxu1 %v4134_v11  ;;  %v4571_v29 = vpop.permute.xlu1 %4570 }
 0x9fc   :  { %v4448_v28 = vpop.permute.xlu0 %4447 }
 0x9fd   :  { %v4449_v8 = vsel %vm2355_vm11, %v4446_v22, %v4448_v28  ;;  %vm4700_vm11 = vcmask 818176   ;;  %v7468_v22 = vld [vmem:[%s9933_s12 + $0x30] sm:$0xff]  }
 0x9ff   :  { %v4634_v11 = vpop.permute.xlu1 %4633 }
 0xa00   :  { %v4510_v55 = vpop.permute.xlu0 %4509 }
 0xa01   :  { %v4512_v17 = vsel %vm4511_vm4, %v4508_v24, %v4510_v55  ;;  %v7470_v24 = vld [vmem:[%s9933_s12 + $0x40] sm:$0xff]  }
 0xa04   :  { %v4573_v0 = vpop.permute.xlu0 %4572 }
 0xa05   :  { %6457 = vmatmul.mubr.msk.bf16.vlgmr.msra.gmra.mrb[12].mxu1 %vm1551_vm9, %v7449_v59  ;;  %v4575_v63 = vsel %vm4574_vm8, %v4571_v29, %v4573_v0 }
 0xa06   :  { %4143 = vmatpush1.bf16.msra.mxu1 %v4136_v38  ;;  %4174 = vmatprep.mubr.bf16.mxu1 %v7559_v10  ;;  %v7458_v38 = vld [vmem:[%s9998_s28 + $0x60] sm:$0xff]  }
 0xa07   :  { %4205 = vmatprep.subr.bf16.mxu1 %v4197_v21  ;;  %v4697_v21 = vpop.permute.xlu1 %4696 }
 0xa08   :  { %v4636_v58 = vpop.permute.xlu0 %4635 }
 0xa09   :  { %v4638_v59 = vsel %vm4637_vm10, %v4634_v11, %v4636_v58 }
 0xa0c   :  { %v4699_v13 = vpop.permute.xlu0 %4698 }
 0xa10   :  { %v4762_v23 = vpop.permute.xlu0 %4761 }
 0xa11   :  { %6459 = vmatmul.mubr.msk.bf16.vlgmr.msra.gmra.mrb[12].mxu1 %vm1551_vm9, %v7450_v18  ;;  %v4701_v18 = vsel %vm4700_vm11, %v4697_v21, %v4699_v13 }
 0xa12   :  { %4206 = vmatpush1.bf16.msra.mxu1 %v4199_v48  ;;  %4237 = vmatprep.mubr.bf16.mxu1 %v7559_v10  ;;  %v7459_v48 = vld [vmem:[%s9998_s28 + $0x68] sm:$0xff]   ;;  %s7589_s28 = smov 122  }
 0xa13   :  { %4268 = vmatprep.subr.bf16.mxu1 %v4260_v62  ;;  %v4760_v62 = vpop.permute.xlu1 %4759 }
 0xa14   :  { %v4764_v45 = vsel %vm4763_vm12, %v4760_v62, %v4762_v23  ;;  %v4825_v34 = vpop.permute.xlu0 %4824 }
 0xa17   :  { %v4823_v53 = vpop.permute.xlu1 %4822 }
 0xa18   :  { %v4827_v1 = vsel %vm4826_vm13, %v4823_v53, %v4825_v34 }
 0xa1c   :  { %v4885_v2 = vpop.permute.xlu1 %4884 }
 0xa1d   :  { %6461 = vmatmul.mubr.msk.bf16.vlgmr.msra.gmra.mrb[12].mxu1 %vm1551_vm9, %v7451_v54  ;;  %v4914_v54 = vld [vmem:[%s9932_s11 + $0x90] sm:$0xff] }
 0xa1e   :  { %4269 = vmatpush1.bf16.msra.mxu1 %v4262_v20  ;;  %4300 = vmatprep.mubr.bf16.mxu1 %v7559_v10  ;;  %v7103_v41 = vpack.c.bf16 %v4915_v40, %v4914_v54 }
 0xa1f   :  { %4331 = vmatprep.subr.bf16.mxu1 %v4323_v37 }
 0xa20   :  { %7104 = vmatpush1.bf16.msra.mxu0 %v7103_v41 }
 0xa21   :  { %4967 = vmatprep.subr.mxu0 %v7568_v49 }
 0xa25   :  { %v4890_v37 = vpop.permute.xlu0 %4889 }
 0xa29   :  { %6463 = vmatmul.mubr.msk.bf16.vlgmr.msra.gmra.mrb[12].mxu1 %vm1551_vm9, %v7452_v50 }
 0xa2a   :  { %4332 = vmatpush1.bf16.msra.mxu1 %v4325_v51  ;;  %4363 = vmatprep.mubr.bf16.mxu1 %v7559_v10 }
 0xa2b   :  { %4393 = vmatprep.subr.bf16.mxu1 %v4386_v9 }
 0xa35   :  { %6465 = vmatmul.mubr.msk.bf16.vlgmr.msra.gmra.mrb[12].mxu1 %vm1551_vm9, %v7453_v33  ;;  %v7464_v33 = vld [vmem:[%s9933_s12 + $0x10] sm:$0xff]  }
 0xa36   :  { %4394 = vmatpush1.bf16.msra.mxu1 %v4387_v56  ;;  %4425 = vmatprep.mubr.bf16.mxu1 %v7559_v10 }
 0xa37   :  { %4455 = vmatprep.subr.bf16.mxu1 %v4448_v28  ;;  %v7467_v28 = vld [vmem:[%s9933_s12 + $0x28] sm:$0xff]  }
 0xa41   :  { %6467 = vmatmul.mubr.msk.bf16.vlgmr.msra.gmra.mrb[12].mxu1 %vm1551_vm9, %v7454_v44 }
 0xa42   :  { %4456 = vmatpush1.bf16.msra.mxu1 %v4449_v8  ;;  %4487 = vmatprep.mubr.bf16.mxu1 %v7559_v10 }
 0xa43   :  { %4518 = vmatprep.subr.bf16.mxu1 %v4510_v55  ;;  %v7469_v55 = vld [vmem:[%s9933_s12 + $0x38] sm:$0xff]  }
 0xa4d   :  { %6469 = vmatmul.mubr.msk.bf16.vlgmr.msra.gmra.mrb[12].mxu1 %vm1551_vm9, %v7455_v5 }
 0xa4e   :  { %4519 = vmatpush1.bf16.msra.mxu1 %v4512_v17  ;;  %4550 = vmatprep.mubr.bf16.mxu1 %v7559_v10  ;;  %v9750_v17 = vld [vmem:[%s9945_s24] ss:$0 sm:$0xff] }
 0xa4f   :  { %4581 = vmatprep.subr.bf16.mxu1 %v4573_v0 }
 0xa59   :  { %6471 = vmatmul.mubr.msk.bf16.vlgmr.msra.gmra.mrb[12].mxu1 %vm1551_vm9, %v7456_v19 }
 0xa5a   :  { %4582 = vmatpush1.bf16.msra.mxu1 %v4575_v63  ;;  %4613 = vmatprep.mubr.bf16.mxu1 %v7559_v10 }
 0xa5b   :  { %4644 = vmatprep.subr.bf16.mxu1 %v4636_v58 }
 0xa65   :  { %6473 = vmatmul.mubr.msk.bf16.vlgmr.msra.gmra.mrb[12].mxu1 %vm1551_vm9, %v7457_v14 }
 0xa66   :  { %4645 = vmatpush1.bf16.msra.mxu1 %v4638_v59  ;;  %4676 = vmatprep.mubr.bf16.mxu1 %v7559_v10 }
 0xa67   :  { %4707 = vmatprep.subr.bf16.mxu1 %v4699_v13 }
 0xa71   :  { %6475 = vmatmul.mubr.msk.bf16.vlgmr.msra.gmra.mrb[12].mxu1 %vm1551_vm9, %v7458_v38 }
 0xa72   :  { %4708 = vmatpush1.bf16.msra.mxu1 %v4701_v18  ;;  %4739 = vmatprep.mubr.bf16.mxu1 %v7559_v10 }
 0xa73   :  { %4770 = vmatprep.subr.bf16.mxu1 %v4762_v23 }
 0xa7d   :  { %6477 = vmatmul.mubr.msk.bf16.vlgmr.msra.gmra.mrb[12].mxu1 %vm1551_vm9, %v7459_v48 }
 0xa7e   :  { %4771 = vmatpush1.bf16.msra.mxu1 %v4764_v45  ;;  %4802 = vmatprep.mubr.bf16.mxu1 %v7559_v10 }
 0xa7f   :  { %4833 = vmatprep.subr.bf16.mxu1 %v4825_v34 }
 0xa89   :  { %6479 = vmatmul.mubr.msk.bf16.vlgmr.msra.gmra.mrb[12].mxu1 %vm1551_vm9, %v7460_v15 }
 0xa8a   :  { %4834 = vmatpush1.bf16.msra.mxu1 %v4827_v1  ;;  %4865 = vmatprep.mubr.bf16.mxu1 %v7559_v10  ;;  %v4916_v10 = vld [vmem:[%s9932_s11 + $0xa0] sm:$0x3]  ;;  %s7587_s11 = smov 6  }
 0xa8b   :  { %6569 = vmatprep.subr.bf16.mxu1 %v7568_v49  ;;  %6482 = vmatpush1.msk.msra.mxu0 %vm4923_vm14, %v4916_v10 }
 0xa8c   :  { %6623 = vmatprep.subr.bf16.mxu0 %v7568_v49 }
 0xa95   :  { %6481 = vmatmul.mubr.msk.bf16.vlgmr.msra.gmra.mrb[12].mxu1 %vm1551_vm9, %v7461_v31 }
 0xa96   :  { %6571 = vmatprep.mubr.msk.bf16.mxu1 %vm7588_vm3, %v7568_v49 }
 0xb68   :  { %v4867_v61 = vpop.f32.mrb[12].mxu1 }
 0xb69   :  { %v4869_v20 = vpop.f32.mrb[13].mxu1  ;;  %v4892_v46 = vadd.f32 %v4885_v2, %v4867_v61 }
 0xb6a   :  { %v4893_v16 = vadd.f32 %v4885_v2, %v4869_v20  ;;  %v4871_v32 = vpop.f32.mrb[14].mxu1  ;;  %v5518_v2 = vld [vmem:[%s9934_s13] sm:$0xff] }
 0xb6b   :  { %v4873_v47 = vpop.f32.mrb[15].mxu1  ;;  %v4894_v42 = vadd.f32 %v4890_v37, %v4871_v32 }
 0xb6c   :  { %v4895_v35 = vadd.f32 %v4890_v37, %v4873_v47  ;;  %6483 = vmatprep.mubr.msk.f32.mxu0 %vm3849_vm5, %v4893_v16  ;;  %v5519_v16 = vld [vmem:[%s9934_s13 + $0x8] sm:$0xff] }
 0xb6d   :  { %4992 = vmatmul.mubr.f32.vlgmr.msra.gmra.mrb[12].mxu0 %v4892_v46  ;;  %v5521_v47 = vld [vmem:[%s9935_s14 + $0x8] sm:$0xff] }
 0xb6e   :  { %6484 = vmatprep.mubr.msk.f32.mxu0 %vm3849_vm5, %v4895_v35  ;;  %vm5530_vm5 = vcmask 408576   ;;  %v5520_v35 = vld [vmem:[%s9935_s14] sm:$0xff] }
 0xb6f   :  { %vm7107_vm0 = vmpackc.low %vm5530_vm5, %vm5530_vm5 }
 0xb71   :  { %4997 = vmatmul.mubr.f32.gmra.mrb[14].mxu0 %v4894_v42 }
 0xb72   :  { %6625 = vmatprep.mubr.msk.bf16.mxu0 %vm7588_vm3, %v7568_v49 }
 0xc40   :  { %v9658_v50 = vpop.f32.mrb[12].mxu0 }
 0xc41   :  { %5008 = vrot.lane.b32.xlu1 %v9658_v50, %s7587_s11  ;;  %v4995_v26 = vpop.f32.mrb[13].mxu0 }
 0xc44   :  { %v9662_v57 = vpop.f32.mrb[14].mxu0 }
 0xc45   :  { %5010 = vrot.lane.b32.xlu0 %v9662_v57, %s7587_s11  ;;  %v5000_v39 = vpop.f32.mrb[15].mxu0 }
 0xcb3   :  { %v5009_v43 = vpop.permute.xlu1 %5008 }
 0xcb4   :  { %5015 = vst.msk [vmem:[#allocation4] sm:$0xff] %vm5014_vm2, %v5009_v43 }
 0xcb7   :  { %v5011_v51 = vpop.permute.xlu0 %5010 }
 0xcb8   :  { %5016 = vst.msk [vmem:[#allocation4 + $0x8] sm:$0xff] %vm5014_vm2, %v5011_v51 }
 0xcbb   :  { %v5035_v3 = vld [vmem:[#allocation4] sm:$0xff] }
 0xcbc   :  { %5587 = vst.msk [vmem:[#allocation4] sm:$0xff] %vm5003_vm15, %v7568_v49 }
 0xcbf   :  { %v5036_v12 = vld [vmem:[#allocation4 + $0x8] sm:$0xff] }
 0xcc0   :  { %v5037_v9 = vpack.c.bf16 %v5036_v12, %v5035_v3  ;;  %5588 = vst.msk [vmem:[#allocation4 + $0x8] sm:$0xff] %vm5003_vm15, %v7568_v49 }
 0xcc2   :  { %5145 = vrot.lane.b32.xlu0 %v5037_v9, %s7561_s30  ;;  %5044 = vrot.lane.b32.xlu1 %v5037_v9, %s7560_s9 }
 0xcc6   :  { %5253 = vrot.lane.b32.xlu0 %v5037_v9, %s7589_s28  ;;  %5199 = vrot.lane.b32.xlu1 %v5037_v9, %s7590_s2 }
 0xcca   :  { %5361 = vrot.lane.b32.xlu0 %v5037_v9, %s7577_s4  ;;  %5307 = vrot.lane.b32.xlu1 %v5037_v9, %s7591_s7 }
 0xcce   :  { %5469 = vrot.lane.b32.xlu0 %v5037_v9, %s7579_s3  ;;  %5415 = vrot.lane.b32.xlu1 %v5037_v9, %s7578_s23 }
 0xd34   :  { %v5045_v27 = vpop.permute.xlu1 %5044  ;;  %v5146_v25 = vpop.permute.xlu0 %5145 }
 0xd35   :  { %6570 = vmatpush3.bf16.msra.mxu1 %v5045_v27 }
 0xd36   :  { %6575 = vmatprep.subr.bf16.mxu1 %v7568_v49 }
 0xd38   :  { %6572 = vmatmul.mubr.msk.bf16.vlgmr.msra.gmra.mrb[16].mxu1 %vm1551_vm9, %v7462_v30  ;;  %v5200_v4 = vpop.permute.xlu1 %5199  ;;  %v5254_v60 = vpop.permute.xlu0 %5253 }
 0xd39   :  { %6576 = vmatpush3.bf16.msra.mxu1 %v5037_v9  ;;  %6577 = vmatprep.mubr.msk.bf16.mxu1 %vm7588_vm3, %v7568_v49 }
 0xd3a   :  { %6581 = vmatprep.subr.bf16.mxu1 %v7568_v49 }
 0xd3c   :  { %v5308_v56 = vpop.permute.xlu1 %5307  ;;  %v5362_v44 = vpop.permute.xlu0 %5361 }
 0xd40   :  { %v5416_v8 = vpop.permute.xlu1 %5415  ;;  %v5470_v5 = vpop.permute.xlu0 %5469 }
 0xd44   :  { %6578 = vmatmul.mubr.msk.bf16.vlgmr.msra.gmra.mrb[16].mxu1 %vm1551_vm9, %v7463_v36 }
 0xd45   :  { %6582 = vmatpush3.bf16.msra.mxu1 %v5146_v25  ;;  %6583 = vmatprep.mubr.msk.bf16.mxu1 %vm7588_vm3, %v7568_v49 }
 0xd46   :  { %6587 = vmatprep.subr.bf16.mxu1 %v7568_v49 }
 0xd50   :  { %6584 = vmatmul.mubr.msk.bf16.vlgmr.msra.gmra.mrb[16].mxu1 %vm1551_vm9, %v7464_v33 }
 0xd51   :  { %6588 = vmatpush3.bf16.msra.mxu1 %v5200_v4  ;;  %6589 = vmatprep.mubr.msk.bf16.mxu1 %vm7588_vm3, %v7568_v49 }
 0xd52   :  { %6593 = vmatprep.subr.bf16.mxu1 %v7568_v49 }
 0xd5c   :  { %6590 = vmatmul.mubr.msk.bf16.vlgmr.msra.gmra.mrb[16].mxu1 %vm1551_vm9, %v7465_v7 }
 0xd5d   :  { %6594 = vmatpush3.bf16.msra.mxu1 %v5254_v60  ;;  %6595 = vmatprep.mubr.msk.bf16.mxu1 %vm7588_vm3, %v7568_v49 }
 0xd5e   :  { %6599 = vmatprep.subr.bf16.mxu1 %v7568_v49 }
 0xd68   :  { %6596 = vmatmul.mubr.msk.bf16.vlgmr.msra.gmra.mrb[16].mxu1 %vm1551_vm9, %v7466_v6 }
 0xd69   :  { %6600 = vmatpush3.bf16.msra.mxu1 %v5308_v56  ;;  %6601 = vmatprep.mubr.msk.bf16.mxu1 %vm7588_vm3, %v7568_v49 }
 0xd6a   :  { %6605 = vmatprep.subr.bf16.mxu1 %v7568_v49 }
 0xd74   :  { %6602 = vmatmul.mubr.msk.bf16.vlgmr.msra.gmra.mrb[16].mxu1 %vm1551_vm9, %v7467_v28  ;;  %v7471_v28 = vld [vmem:[%s9936_s15 + $0x8] sm:$0xff]  }
 0xd75   :  { %6606 = vmatpush3.bf16.msra.mxu1 %v5362_v44  ;;  %6607 = vmatprep.mubr.msk.bf16.mxu1 %vm7588_vm3, %v7568_v49  ;;  %v7472_v44 = vld [vmem:[%s9936_s15] sm:$0xff]  }
 0xd76   :  { %6611 = vmatprep.subr.bf16.mxu1 %v7568_v49 }
 0xd80   :  { %6608 = vmatmul.mubr.msk.bf16.vlgmr.msra.gmra.mrb[16].mxu1 %vm1551_vm9, %v7468_v22 }
 0xd81   :  { %6612 = vmatpush3.bf16.msra.mxu1 %v5416_v8  ;;  %6613 = vmatprep.mubr.msk.bf16.mxu1 %vm7588_vm3, %v7568_v49  ;;  %v7473_v8 = vld [vmem:[%s9936_s15 + $0x10] sm:$0xff]  }
 0xd82   :  { %6617 = vmatprep.subr.bf16.mxu1 %v7568_v49 }
 0xd8c   :  { %6614 = vmatmul.mubr.msk.bf16.vlgmr.msra.gmra.mrb[16].mxu1 %vm1551_vm9, %v7469_v55 }
 0xd8d   :  { %6618 = vmatpush3.bf16.msra.mxu1 %v5470_v5  ;;  %6619 = vmatprep.mubr.msk.bf16.mxu1 %vm7588_vm3, %v7568_v49  ;;  %v7474_v5 = vld [vmem:[%s9936_s15 + $0x18] sm:$0xff]  }
 0xd8e   :  { %7105 = vmatprep.subr.bf16.mxu1 %v7586_v52 }
 0xd98   :  { %6620 = vmatmul.mubr.msk.bf16.vlgmr.msra.gmra.mrb[16].mxu1 %vm1551_vm9, %v7470_v24 }
 0xd99   :  { %6681 = vmatprep.mubr.msk.f32.mxu1 %vm7588_vm3, %v7568_v49 }
 0xe6b   :  { %v5509_v0 = vpop.f32.mrb[16].mxu1 }
 0xe6c   :  { %v5528_v19 = vmul.f32 %v9750_v17, %v5509_v0  ;;  %v6621_v29 = vpop.f32.mrb[17].mxu1 }
 0xe6d   :  { %v5512_v63 = vpop.f32.mrb[18].mxu1  ;;  %v7476_v29 = vld [vmem:[%s9936_s15 + $0x28] sm:$0xff]  }
 0xe6e   :  { %v5529_v58 = vmul.f32 %v9750_v17, %v5512_v63  ;;  %v6622_v14 = vpop.f32.mrb[19].mxu1  ;;  %v5531_v11 = vsel %vm5530_vm5, %v5528_v19, 0.0 }
 0xe6f   :  { %5532 = vadd.xlane.f32.xlu1 %v5531_v11  ;;  %v7478_v11 = vld [vmem:[%s9936_s15 + $0x38] sm:$0xff]  }
 0xe70   :  { %v5534_v59 = vsel %vm5530_vm5, %v5529_v58, 0.0  ;;  %v7477_v58 = vld [vmem:[%s9936_s15 + $0x30] sm:$0xff]  }
 0xe71   :  { %5535 = vadd.xlane.f32.xlu0 %v5534_v59 }
 0xefc   :  { %v5533_v13 = vpop.xlane.xlu1 %5532 }
 0xefd   :  { %v5537_v38 = vmul.f32 0.055555556, %v5533_v13  ;;  %v7479_v13 = vld [vmem:[%s9936_s15 + $0x40] sm:$0xff]  }
 0xefe   :  { %v5536_v21 = vpop.xlane.xlu0 %5535 }
 0xeff   :  { %v5539_v18 = vsub.f32 %v5509_v0, %v5537_v38  ;;  %v5538_v23 = vmul.f32 0.055555556, %v5536_v21  ;;  %v7475_v0 = vld [vmem:[%s9936_s15 + $0x20] sm:$0xff]  }
 0xf01   :  { %v5540_v48 = vsub.f32 %v5512_v63, %v5538_v23  ;;  %v5541_v62 = vmul.f32 %v9750_v17, %v5539_v18 }
 0xf03   :  { %v5543_v45 = vmul.f32 %v5541_v62, %v5541_v62  ;;  %v5542_v34 = vmul.f32 %v9750_v17, %v5540_v48 }
 0xf05   :  { %v5545_v15 = vsel %vm5530_vm5, %v5543_v45, 0.0  ;;  %v5544_v53 = vmul.f32 %v5542_v34, %v5542_v34 }
 0xf06   :  { %5546 = vadd.xlane.f32.xlu0 %v5545_v15 }
 0xf07   :  { %v5548_v1 = vsel %vm5530_vm5, %v5544_v53, 0.0 }
 0xf08   :  { %5549 = vadd.xlane.f32.xlu1 %v5548_v1 }
 0xf93   :  { %v5547_v31 = vpop.xlane.xlu0 %5546 }
 0xf94   :  { %v5551_v54 = vmul.f32 0.055555556, %v5547_v31 }
 0xf95   :  { %v5550_v40 = vpop.xlane.xlu1 %5549 }
 0xf96   :  { %v5553_v41 = vadd.f32 1e-05, %v5551_v54  ;;  %v5552_v10 = vmul.f32 0.055555556, %v5550_v40 }
 0xf98   :  { %7488 = vrsqrt.f32 %v5553_v41  ;;  %v5554_v61 = vadd.f32 1e-05, %v5552_v10 }
 0xf9a   :  { %7490 = vrsqrt.f32 %v5554_v61 }
 0xfa2   :  { %v7489_v20 = vpop.eup %7488 }
 0xfa3   :  { %v5557_v32 = vmul.f32 %v7489_v20, %v5518_v2 }
 0xfa4   :  { %v7491_v37 = vpop.eup %7490 }
 0xfa5   :  { %5561 = vperm.xlu0 %7426, %v5557_v32   ;;  %v5558_v46 = vmul.f32 %v7491_v37, %v5519_v16 }
 0xfa7   :  { %5566 = vperm.xlu1 %7429, %v5558_v46  }
 0xfa9   :  { %5578 = vperm.xlu0 %7426, %v5521_v47  }
 0xfab   :  { %5573 = vperm.xlu1 %7429, %v5520_v35  }
0x1024   :  { %v5562_v42 = vpop.permute.xlu0 %5561 }
0x1025   :  { %v5569_v51 = vmul.f32 %v5562_v42, %v5539_v18 }
0x1026   :  { %v5567_v26 = vpop.permute.xlu1 %5566 }
0x1027   :  { %v5570_v39 = vmul.f32 %v5567_v26, %v5540_v48  ;;  %v6100_v26 = vld [vmem:[%s9937_s16] sm:$0xff] }
0x1028   :  { %v5579_v43 = vpop.permute.xlu0 %5578 }
0x1029   :  { %v5582_v3 = vadd.f32 %v5579_v43, %v5570_v39  ;;  %v6101_v43 = vld [vmem:[%s9937_s16 + $0x8] sm:$0xff] }
0x102a   :  { %v5574_v12 = vpop.permute.xlu1 %5573 }
0x102b   :  { %v5584_v9 = vmax.f32 %v5582_v3, 0.0  ;;  %v5581_v27 = vadd.f32 %v5574_v12, %v5569_v51 }
0x102d   :  { %v5586_v30 = vmul.f32 %v9750_v17, %v5584_v9  ;;  %v5583_v36 = vmax.f32 %v5581_v27, 0.0  ;;  %v6103_v9 = vld [vmem:[%s9938_s17 + $0x8] sm:$0xff]  ;;  %v6102_v27 = vld [vmem:[%s9938_s17] sm:$0xff] }
0x102f   :  { %v5585_v25 = vmul.f32 %v9750_v17, %v5583_v36  ;;  %5593 = vrot.lane.b32.xlu0 %v5586_v30, %s7587_s11 }
0x1031   :  { %5591 = vrot.lane.b32.xlu1 %v5585_v25, %s7587_s11 }
0x10a1   :  { %v5594_v33 = vpop.permute.xlu0 %5593 }
0x10a2   :  { %5598 = vst.msk [vmem:[#allocation4 + $0x8] sm:$0xff] %vm5014_vm2, %v5594_v33 }
0x10a3   :  { %v5592_v4 = vpop.permute.xlu1 %5591 }
0x10a4   :  { %5597 = vst.msk [vmem:[#allocation4] sm:$0xff] %vm5014_vm2, %v5592_v4 }
0x10a9   :  { %v5618_v7 = vld [vmem:[#allocation4 + $0x8] sm:$0xff] }
0x10ab   :  { %v5617_v60 = vld [vmem:[#allocation4] sm:$0xff] }
0x10ac   :  { %v5619_v6 = vpack.c.bf16 %v5618_v7, %v5617_v60 }
0x10ae   :  { %5727 = vrot.lane.b32.xlu0 %v5619_v6, %s7561_s30  ;;  %5626 = vrot.lane.b32.xlu1 %v5619_v6, %s7560_s9 }
0x10b2   :  { %5835 = vrot.lane.b32.xlu0 %v5619_v6, %s7589_s28  ;;  %5781 = vrot.lane.b32.xlu1 %v5619_v6, %s7590_s2 }
0x10b6   :  { %5943 = vrot.lane.b32.xlu0 %v5619_v6, %s7577_s4  ;;  %5889 = vrot.lane.b32.xlu1 %v5619_v6, %s7591_s7 }
0x10ba   :  { %6051 = vrot.lane.b32.xlu0 %v5619_v6, %s7579_s3  ;;  %5997 = vrot.lane.b32.xlu1 %v5619_v6, %s7578_s23 }
0x1120   :  { %v5627_v56 = vpop.permute.xlu1 %5626  ;;  %v5728_v22 = vpop.permute.xlu0 %5727 }
0x1121   :  { %6624 = vmatpush3.bf16.msra.mxu0 %v5627_v56 }
0x1122   :  { %6629 = vmatprep.subr.bf16.mxu0 %v7568_v49 }
0x1124   :  { %6626 = vmatmul.mubr.msk.bf16.vlgmr.msra.gmra.mrb[16].mxu0 %vm1551_vm9, %v7471_v28  ;;  %v5782_v55 = vpop.permute.xlu1 %5781  ;;  %v5836_v24 = vpop.permute.xlu0 %5835 }
0x1125   :  { %6630 = vmatpush3.bf16.msra.mxu0 %v5619_v6  ;;  %6631 = vmatprep.mubr.msk.bf16.mxu0 %vm7588_vm3, %v7568_v49 }
0x1126   :  { %6635 = vmatprep.subr.bf16.mxu0 %v7568_v49 }
0x1128   :  { %v5890_v19 = vpop.permute.xlu1 %5889  ;;  %v5944_v63 = vpop.permute.xlu0 %5943 }
0x112c   :  { %v5998_v14 = vpop.permute.xlu1 %5997  ;;  %v6052_v59 = vpop.permute.xlu0 %6051 }
0x1130   :  { %6632 = vmatmul.mubr.msk.bf16.vlgmr.msra.gmra.mrb[16].mxu0 %vm1551_vm9, %v7472_v44 }
0x1131   :  { %6636 = vmatpush3.bf16.msra.mxu0 %v5728_v22  ;;  %6637 = vmatprep.mubr.msk.bf16.mxu0 %vm7588_vm3, %v7568_v49 }
0x1132   :  { %6641 = vmatprep.subr.bf16.mxu0 %v7568_v49 }
0x113c   :  { %6638 = vmatmul.mubr.msk.bf16.vlgmr.msra.gmra.mrb[16].mxu0 %vm1551_vm9, %v7473_v8 }
0x113d   :  { %6642 = vmatpush3.bf16.msra.mxu0 %v5782_v55  ;;  %6643 = vmatprep.mubr.msk.bf16.mxu0 %vm7588_vm3, %v7568_v49 }
0x113e   :  { %6647 = vmatprep.subr.bf16.mxu0 %v7568_v49 }
0x1148   :  { %6644 = vmatmul.mubr.msk.bf16.vlgmr.msra.gmra.mrb[16].mxu0 %vm1551_vm9, %v7474_v5 }
0x1149   :  { %6648 = vmatpush3.bf16.msra.mxu0 %v5836_v24  ;;  %6649 = vmatprep.mubr.msk.bf16.mxu0 %vm7588_vm3, %v7568_v49 }
0x114a   :  { %6653 = vmatprep.subr.bf16.mxu0 %v7568_v49 }
0x1154   :  { %6650 = vmatmul.mubr.msk.bf16.vlgmr.msra.gmra.mrb[16].mxu0 %vm1551_vm9, %v7475_v0 }
0x1155   :  { %6654 = vmatpush3.bf16.msra.mxu0 %v5890_v19  ;;  %6655 = vmatprep.mubr.msk.bf16.mxu0 %vm7588_vm3, %v7568_v49 }
0x1156   :  { %6659 = vmatprep.subr.bf16.mxu0 %v7568_v49 }
0x1160   :  { %6656 = vmatmul.mubr.msk.bf16.vlgmr.msra.gmra.mrb[16].mxu0 %vm1551_vm9, %v7476_v29 }
0x1161   :  { %6660 = vmatpush3.bf16.msra.mxu0 %v5944_v63  ;;  %6661 = vmatprep.mubr.msk.bf16.mxu0 %vm7588_vm3, %v7568_v49 }
0x1162   :  { %6665 = vmatprep.subr.bf16.mxu0 %v7568_v49 }
0x116c   :  { %6662 = vmatmul.mubr.msk.bf16.vlgmr.msra.gmra.mrb[16].mxu0 %vm1551_vm9, %v7477_v58 }
0x116d   :  { %6666 = vmatpush3.bf16.msra.mxu0 %v5998_v14  ;;  %6667 = vmatprep.mubr.msk.bf16.mxu0 %vm7588_vm3, %v7568_v49 }
0x116e   :  { %6671 = vmatprep.subr.bf16.mxu0 %v7568_v49 }
0x1178   :  { %6668 = vmatmul.mubr.msk.bf16.vlgmr.msra.gmra.mrb[16].mxu0 %vm1551_vm9, %v7478_v11 }
0x1179   :  { %6672 = vmatpush3.bf16.msra.mxu0 %v6052_v59  ;;  %6673 = vmatprep.mubr.msk.bf16.mxu0 %vm7588_vm3, %v7568_v49 }
0x1184   :  { %6674 = vmatmul.mubr.msk.bf16.vlgmr.msra.gmra.mrb[16].mxu0 %vm1551_vm9, %v7479_v13 }
0x1257   :  { %v6091_v38 = vpop.f32.mrb[16].mxu0 }
0x1258   :  { %v6104_v21 = vmul.f32 %v9750_v17, %v6091_v38  ;;  %v6675_v18 = vpop.f32.mrb[17].mxu0 }
0x1259   :  { %v6094_v23 = vpop.f32.mrb[18].mxu0 }
0x125a   :  { %v6105_v48 = vmul.f32 %v9750_v17, %v6094_v23  ;;  %v6676_v62 = vpop.f32.mrb[19].mxu0  ;;  %v6106_v45 = vsel %vm5530_vm5, %v6104_v21, 0.0 }
0x125b   :  { %6107 = vadd.xlane.f32.xlu1 %v6106_v45 }
0x125c   :  { %v6109_v34 = vsel %vm5530_vm5, %v6105_v48, 0.0 }
0x125d   :  { %6110 = vadd.xlane.f32.xlu0 %v6109_v34 }
0x12e8   :  { %v6108_v15 = vpop.xlane.xlu1 %6107 }
0x12e9   :  { %v6112_v53 = vmul.f32 0.055555556, %v6108_v15 }
0x12ea   :  { %v6111_v1 = vpop.xlane.xlu0 %6110 }
0x12eb   :  { %v6114_v31 = vsub.f32 %v6091_v38, %v6112_v53  ;;  %v6113_v54 = vmul.f32 0.055555556, %v6111_v1  ;;  %v6165_v53 = vld [vmem:[%s9939_s18 + $0x8] sm:$0xff]  ;;  %v6164_v1 = vld [vmem:[%s9939_s18] sm:$0xff] }
0x12ed   :  { %v6115_v40 = vsub.f32 %v6094_v23, %v6113_v54  ;;  %v6116_v41 = vmul.f32 %v9750_v17, %v6114_v31 }
0x12ef   :  { %v6118_v10 = vmul.f32 %v6116_v41, %v6116_v41  ;;  %v6117_v61 = vmul.f32 %v9750_v17, %v6115_v40  ;;  %v6166_v41 = vld [vmem:[%s9940_s19] sm:$0xff] }
0x12f1   :  { %v6120_v2 = vsel %vm5530_vm5, %v6118_v10, 0.0  ;;  %v6119_v20 = vmul.f32 %v6117_v61, %v6117_v61  ;;  %v6167_v10 = vld [vmem:[%s9940_s19 + $0x8] sm:$0xff] }
0x12f2   :  { %6121 = vadd.xlane.f32.xlu0 %v6120_v2 }
0x12f3   :  { %v6123_v16 = vsel %vm5530_vm5, %v6119_v20, 0.0 }
0x12f4   :  { %6124 = vadd.xlane.f32.xlu1 %v6123_v16 }
0x137f   :  { %v6122_v32 = vpop.xlane.xlu0 %6121 }
0x1380   :  { %v6126_v37 = vmul.f32 0.055555556, %v6122_v32 }
0x1381   :  { %v6125_v46 = vpop.xlane.xlu1 %6124 }
0x1382   :  { %v6128_v47 = vadd.f32 1e-05, %v6126_v37  ;;  %v6127_v35 = vmul.f32 0.055555556, %v6125_v46 }
0x1384   :  { %7492 = vrsqrt.f32 %v6128_v47  ;;  %v6129_v42 = vadd.f32 1e-05, %v6127_v35 }
0x1386   :  { %7494 = vrsqrt.f32 %v6129_v42 }
0x138e   :  { %v7493_v39 = vpop.eup %7492 }
0x138f   :  { %v6132_v51 = vmul.f32 %v7493_v39, %v6100_v26  ;;  %v6304_v39 = vld [vmem:[%s9941_s20] sm:$0xff] }
0x1390   :  { %v7495_v3 = vpop.eup %7494 }
0x1391   :  { %6136 = vperm.xlu0 %7426, %v6132_v51   ;;  %v6133_v12 = vmul.f32 %v7495_v3, %v6101_v43  ;;  %v6305_v43 = vld [vmem:[%s9941_s20 + $0x8] sm:$0xff]  ;;  %v6224_v51 = vld [vmem:[%s9946_s25] sm:$0x3]  ;;  %s7592_s20 = smov [#allocation8]  }
0x1392   :  { %v7110_v3 = vpack.c.bf16 %v6305_v43, %v6304_v39  ;;  %s6393_s24 = sshll.u32 %s7592_s20, 4  ;;  %s6394_s24 = int_to_ptr.vmem [resolvable:$true] %s6393_s24 }
0x1393   :  { %6141 = vperm.xlu1 %7429, %v6133_v12   ;;  %s7522_s25 = scalar_lea.vmem %s6394_s24, 32  ;;  %p7527_p9 = scmp.lt.s32.totalorder %s6394_s24, %s6394_s24 }
0x1394   :  { %p7523_p8 = scmp.ne.s32.totalorder %s6394_s24, %s7522_s25  ;;  %p7528_p10 = scmp.lt.s32.totalorder %s7522_s25, %s7522_s25 }
0x1395   :  { %6153 = vperm.xlu0 %7426, %v6103_v9   ;;  %v6525_v9 = vld [vmem:[%s9942_s21] ss:$0 sm:$0xff] }
0x1396   :  { %p7529_p11 = por %p7528_p10, %p7527_p9 }
0x1397   :  { %6148 = vperm.xlu1 %7429, %v6102_v27  }
0x1398   :  { %p7530_p12 = pnand %p7529_p11, %p7523_p8 }
0x1410   :  { %v6137_v30 = vpop.permute.xlu0 %6136 }
0x1411   :  { %v6144_v4 = vmul.f32 %v6137_v30, %v6114_v31 }
0x1412   :  { %v6142_v36 = vpop.permute.xlu1 %6141 }
0x1413   :  { %v6145_v25 = vmul.f32 %v6142_v36, %v6115_v40 }
0x1414   :  { %v6154_v33 = vpop.permute.xlu0 %6153 }
0x1415   :  { %v6157_v7 = vadd.f32 %v6154_v33, %v6145_v25 }
0x1416   :  { %v6149_v60 = vpop.permute.xlu1 %6148 }
0x1417   :  { %v6159_v6 = vadd.f32 %v6157_v7, %v9662_v57  ;;  %v6156_v56 = vadd.f32 %v6149_v60, %v6144_v4 }
0x1419   :  { %v6161_v28 = vmax.f32 %v6159_v6, 0.0  ;;  %v6158_v44 = vadd.f32 %v6156_v56, %v9658_v50 }
0x141b   :  { %v6163_v22 = vmul.f32 %v9750_v17, %v6161_v28  ;;  %v6160_v8 = vmax.f32 %v6158_v44, 0.0 }
0x141d   :  { %v6162_v55 = vmul.f32 %v9750_v17, %v6160_v8  ;;  %v6169_v5 = vmul.f32 %v9750_v17, %v6163_v22 }
0x141f   :  { %v6173_v24 = vsel %vm5530_vm5, %v6169_v5, 0.0  ;;  %v6168_v0 = vmul.f32 %v9750_v17, %v6162_v55 }
0x1420   :  { %6174 = vadd.xlane.f32.xlu0 %v6173_v24 }
0x1421   :  { %v6170_v19 = vsel %vm5530_vm5, %v6168_v0, 0.0 }
0x1422   :  { %6171 = vadd.xlane.f32.xlu1 %v6170_v19 }
0x14ad   :  { %v6175_v57 = vpop.xlane.xlu0 %6174 }
0x14ae   :  { %v6177_v29 = vmul.f32 0.055555556, %v6175_v57 }
0x14af   :  { %v6172_v63 = vpop.xlane.xlu1 %6171 }
0x14b0   :  { %v6179_v58 = vsub.f32 %v6163_v22, %v6177_v29  ;;  %v6176_v50 = vmul.f32 0.055555556, %v6172_v63 }
0x14b2   :  { %v6178_v14 = vsub.f32 %v6162_v55, %v6176_v50  ;;  %v6181_v11 = vmul.f32 %v9750_v17, %v6179_v58 }
0x14b4   :  { %v6183_v59 = vmul.f32 %v6181_v11, %v6181_v11  ;;  %v6180_v13 = vmul.f32 %v9750_v17, %v6178_v14 }
0x14b6   :  { %v6187_v38 = vsel %vm5530_vm5, %v6183_v59, 0.0  ;;  %v6182_v21 = vmul.f32 %v6180_v13, %v6180_v13 }
0x14b7   :  { %6188 = vadd.xlane.f32.xlu1 %v6187_v38 }
0x14b8   :  { %v6184_v18 = vsel %vm5530_vm5, %v6182_v21, 0.0 }
0x14b9   :  { %6185 = vadd.xlane.f32.xlu0 %v6184_v18 }
0x1544   :  { %v6189_v23 = vpop.xlane.xlu1 %6188 }
0x1545   :  { %v6191_v48 = vmul.f32 0.055555556, %v6189_v23 }
0x1546   :  { %v6186_v62 = vpop.xlane.xlu0 %6185 }
0x1547   :  { %v6193_v45 = vadd.f32 1e-05, %v6191_v48  ;;  %v6190_v34 = vmul.f32 0.055555556, %v6186_v62 }
0x1549   :  { %7496 = vrsqrt.f32 %v6193_v45  ;;  %v6192_v15 = vadd.f32 1e-05, %v6190_v34 }
0x154b   :  { %7498 = vrsqrt.f32 %v6192_v15 }
0x1553   :  { %v7497_v17 = vpop.eup %7496 }
0x1554   :  { %v6197_v31 = vmul.f32 %v7497_v17, %v6165_v53 }
0x1555   :  { %v7499_v54 = vpop.eup %7498 }
0x1556   :  { %6205 = vperm.xlu1 %7429, %v6197_v31   ;;  %v6196_v40 = vmul.f32 %v7499_v54, %v6164_v1 }
0x1558   :  { %6200 = vperm.xlu0 %7426, %v6196_v40  }
0x155a   :  { %6212 = vperm.xlu1 %7429, %v6166_v41  }
0x155c   :  { %6217 = vperm.xlu0 %7426, %v6167_v10  }
0x15d5   :  { %v6206_v61 = vpop.permute.xlu1 %6205 }
0x15d6   :  { %v6209_v32 = vmul.f32 %v6206_v61, %v6179_v58 }
0x15d7   :  { %v6201_v2 = vpop.permute.xlu0 %6200 }
0x15d8   :  { %v6208_v20 = vmul.f32 %v6201_v2, %v6178_v14 }
0x15d9   :  { %v6213_v16 = vpop.permute.xlu1 %6212 }
0x15da   :  { %v6220_v37 = vadd.f32 %v6213_v16, %v6208_v20 }
0x15db   :  { %v6218_v46 = vpop.permute.xlu0 %6217 }
0x15dc   :  { %v6221_v47 = vadd.f32 %v6218_v46, %v6209_v32  ;;  %v6222_v35 = vmax.f32 %v6220_v37, 0.0 }
0x15de   :  { %v6223_v42 = vmax.f32 %v6221_v47, 0.0 }
0x15e0   :  { %v7106_v26 = vpack.c.bf16 %v6223_v42, %v6222_v35 }
0x15e2   :  { %7108 = vmatpush3.bf16.xpose.msk.msra.mxu1 %vm7107_vm0, %v7106_v26 }
0x15e3   :  { %7109 = vmatprep.subr.bf16.mxu1 %v7586_v52 }
0x15e9   :  { %6682 = vmatmul.mubr.msk.f32.vlgmr.msra.gmra.mrb[20].mxu1 %vm5530_vm5, %v6224_v51 }
0x15ea   :  { %7111 = vmatpush3.bf16.msra.mxu1 %v7110_v3  ;;  %6688 = vmatprep.mubr.msk.f32.mxu1 %vm7588_vm3, %v7568_v49 }
0x16bc   :  { %v6300_v52 = vpop.f32.mrb[20].mxu1 }
0x16bd   :  { %v6683_v12 = vpop.f32.mrb[21].mxu1  ;;  %6689 = vmatmul.mubr.msk.f32.vlgmr.msra.gmra.mrb[22].mxu1 %vm1551_vm9, %v6300_v52 }
0x1790   :  { %v6382_v27 = vpop.f32.mrb[22].mxu1 }
0x1791   :  { %v6383_v30 = vadd.f32 %v6525_v9, %v6382_v27  ;;  %v6690_v36 = vpop.f32.mrb[23].mxu1 }
0x1793   :  { %6386 = vst [vmem:[#allocation8] sm:$0x3] %v6383_v30 }
0x1794   :  { %7533 = shalt.err (!%p7530_p12)
}
0x1795   :  { %s7534_s15 = scalar_lea.hbm %s9947_s26, 32 }
0x1796   :  { %p7535_p13 = scmp.ne.s32.totalorder %s9947_s26, %s7534_s15  ;;  %p7538_p0 = scmp.lt.u32.totalorder %s7534_s15, %s9947_s26 }
0x1798   :  { %p7540_p1 = pnand %p7538_p0, %p7535_p13 }
0x179a   :  { %7543 = shalt.err (!%p7540_p1)
}
0x179b   :  { %6396 = dma.vmem_to_hbm [thread:$0]  %s6394_s24, 32, %s9947_s26, [#allocation7]  }
0x179c   :  { %7546 = dma.done.wait [#allocation7], 32  }
0x179d   :  { %7547 = vsyncadd [#allocation7], 4294967264 }
0x179e   :  { %6400 = vsyncpa [#allocation6], 1 }
0x179f   :  { %6401 = vsyncpa [#allocation7], 1 }

</bundles_post_ra>
